<compile_context>
chip_gen: v7x
topology: tpu7x:2x2x1
jax: 0.10.0
libtpu: 0.0.40
codegen_flags: <defaults>
</compile_context>

<pallas_src>
import math

import jax
import jax.numpy as jnp
from jax.experimental import pallas as pl
from jax.experimental.pallas import tpu as pltpu


_GSTRIDE = 128   # lane-aligned per-direction gate block in the batched projection
_OUT_PAD = 128   # lane-dense padded dense output width


# ----------------------------------------------------------------------------
# Fused Pallas kernel (runs once per relation candidate, grid=(B,))
# ----------------------------------------------------------------------------
def _fused_kernel(ot_ref, dt_ref,                       # scalar prefetch (SMEM)
                  feats_ref, chare_ref,
                  wih_ref, b_all_ref,
                  whh_oe_ref, whh_de_ref, whh_se_ref,
                  wih_top_ref, whh_top_ref, b_top_ref,
                  cw_ref, cb_ref, dw_ref, db_ref,
                  out_ref,
                  gall_ref):
    """Whole relation head for one candidate.

    ot_ref/dt_ref: (B, n_o)/(B, n_d) int32 token indices in SMEM (prefetched)
    feats_ref:     (T, D_rest) non-char features [bert|word|postag|dep|etype|etag]
    chare_ref:     (T, L*C)    flattened char embeddings per token
    wih_ref:       (D_total, 6*128) bf16 merged input projection, one 128-lane
                   block per BiLSTM direction (of, ob, df, db, sf, sb), gate
                   order i,f,g,o inside each block, zero-padded to 128 lanes
    b_all_ref:     (1, 6*128) combined b_ih + b_hh in the same layout
    whh_oe/de/se:  (2H, 8H) bf16 block-diagonal fused fwd+bwd hidden->gates,
                   gate columns interleaved [i_f i_b f_f f_b g_f g_b o_f o_b]
    wih_top/whh_top/b_top: top nn.LSTM weights (bf16 / bf16 / f32)
    cw_ref:        (L*C, (L-2)*Cc) bf16 banded CharCNN filter (conv k=3, valid)
    dw/db:         (dense_in, 128) / (1, 128) zero-padded dense layer
    out_ref:       (1, 1, 128) output block for this candidate
    gall_ref:      (T, 6*128) f32 VMEM scratch (projected gates, for dynamic
                   per-candidate row reads)
    """
    f32 = jnp.float32
    bf16 = jnp.bfloat16
    T = feats_ref.shape[0]
    Cc = cb_ref.shape[1]
    n_win = cw_ref.shape[1] // Cc
    He = whh_oe_ref.shape[0] // 2
    Hs = whh_se_ref.shape[0] // 2
    Ht = whh_top_ref.shape[0]
    n_o = ot_ref.shape[1]
    n_d = dt_ref.shape[1]
    b = pl.program_id(0)

    # ---- CharCNN: one banded matmul == conv(k=3,'valid'); then ReLU + max ----
    conv_all = jnp.dot(chare_ref[...].astype(bf16), cw_ref[...],
                       preferred_element_type=f32)            # (T, (L-2)*Cc)
    cb = cb_ref[...]
    pooled = None
    for p in range(n_win):
        w = jnp.maximum(conv_all[:, p * Cc:(p + 1) * Cc] + cb, 0.0)
        pooled = w if pooled is None else jnp.maximum(pooled, w)
    # pooled: (T, Cc) char features per token

    # ---- ONE batched input projection for all six BiLSTM directions ----
    x = jnp.concatenate([feats_ref[...], pooled], axis=-1)     # (T, D_total)
    gall = (jnp.dot(x.astype(bf16), wih_ref[...], preferred_element_type=f32)
            + b_all_ref[...])                                  # (T, 6*128)
    gall_ref[...] = gall      # VMEM copy: dynamic per-candidate row reads below

    def interleave(pre_f, pre_b, H):
        # -> [i_f i_b | f_f f_b | g_f g_b | o_f o_b]: contiguous gate slices
        blocks = []
        for q in range(4):
            blocks.append(pre_f[:, q * H:(q + 1) * H])
            blocks.append(pre_b[:, q * H:(q + 1) * H])
        return jnp.concatenate(blocks, axis=-1)                # (n, 8H)

    def lstm_pair(pre, whh, H, n):
        """Fused fwd+bwd recurrence via block-diagonal W_hh.
        pre: (n, 8H) input-projected gates (fwd row k / bwd row n-1-k already
        interleaved).  bf16 only on MXU operands; state & gates stay f32."""
        h = jnp.zeros((1, 2 * H), f32)
        c = jnp.zeros((1, 2 * H), f32)
        hs = []
        for k in range(n):
            g = pre[k:k + 1, :] + jnp.dot(h.astype(bf16), whh,
                                          preferred_element_type=f32)
            i = jax.nn.sigmoid(g[:, 0:2 * H])
            f = jax.nn.sigmoid(g[:, 2 * H:4 * H])
            gg = jnp.tanh(g[:, 4 * H:6 * H])
            o = jax.nn.sigmoid(g[:, 6 * H:8 * H])
            c = f * c + i * gg
            h = o * jnp.tanh(c)
            hs.append(h)
        return h, hs

    # ---- origin / destination entity BiLSTMs (dynamic token indices) ----
    def entity_pre(idx_ref, n, col_f, col_b, H):
        rows = [gall_ref[pl.ds(idx_ref[b, k], 1), :] for k in range(n)]
        pre_f = jnp.concatenate(
            [rows[k][:, col_f:col_f + 4 * H] for k in range(n)], axis=0)
        pre_b = jnp.concatenate(
            [rows[n - 1 - k][:, col_b:col_b + 4 * H] for k in range(n)], axis=0)
        return interleave(pre_f, pre_b, H)

    h_o, _ = lstm_pair(entity_pre(ot_ref, n_o, 0 * _GSTRIDE, 1 * _GSTRIDE, He),
                       whh_oe_ref[...], He, n_o)               # (1, 2He)
    h_d, _ = lstm_pair(entity_pre(dt_ref, n_d, 2 * _GSTRIDE, 3 * _GSTRIDE, He),
                       whh_de_ref[...], He, n_d)               # (1, 2He)

    # ---- sentence BiLSTM (static row order; output assembled in registers) ----
    pre_sf = gall[:, 4 * _GSTRIDE:4 * _GSTRIDE + 4 * Hs]
    pre_sb = jnp.concatenate(
        [gall[T - 1 - t:T - t, 5 * _GSTRIDE:5 * _GSTRIDE + 4 * Hs]
         for t in range(T)], axis=0)                           # reversed rows
    _, hs_s = lstm_pair(interleave(pre_sf, pre_sb, Hs), whh_se_ref[...], Hs, T)
    sent = jnp.concatenate(
        [jnp.concatenate([hs_s[t][:, 0:Hs], hs_s[T - 1 - t][:, Hs:2 * Hs]],
                         axis=-1) for t in range(T)], axis=0)  # (T, 2Hs)

    # ---- top LSTM over the sentence encoding (projection hoisted) ----
    gtop = (jnp.dot(sent.astype(bf16), wih_top_ref[...],
                    preferred_element_type=f32) + b_top_ref[...])   # (T, 4Ht)
    whh_top = whh_top_ref[...]
    h = jnp.zeros((1, Ht), f32)
    c = jnp.zeros((1, Ht), f32)
    for t in range(T):
        g = gtop[t:t + 1, :] + jnp.dot(h.astype(bf16), whh_top,
                                       preferred_element_type=f32)
        i = jax.nn.sigmoid(g[:, 0:Ht])
        f = jax.nn.sigmoid(g[:, Ht:2 * Ht])
        gg = jnp.tanh(g[:, 2 * Ht:3 * Ht])
        o = jax.nn.sigmoid(g[:, 3 * Ht:4 * Ht])
        c = f * c + i * gg
        h = o * jnp.tanh(c)

    # ---- dense + sigmoid epilogue (dropouts identity; lane-dense padded out) --
    enc = jnp.concatenate([h_o, h_d, h], axis=-1)              # (1, dense_in)
    out_ref[0] = jax.nn.sigmoid(
        jnp.dot(enc, dw_ref[...], preferred_element_type=f32) + db_ref[...])


# ----------------------------------------------------------------------------
# Wrapper
# ----------------------------------------------------------------------------
def fused_relation_head(params, feats, chare_flat, origin_idx, dest_idx):
    """Score B relation candidates of one sentence in a single pallas_call."""
    T = feats.shape[0]
    B = origin_idx.shape[0]
    G = params["b_all"].shape[1]
    out_pad = params["dense_w"].shape[1]

    args = (feats, chare_flat,
            params["wih_all"], params["b_all"],
            params["whh_oe"], params["whh_de"], params["whh_se"],
            params["wih_top"], params["whh_top"], params["b_top"],
            params["char_conv_w"], params["char_conv_b"],
            params["dense_w"], params["dense_b"])
    const_block = lambda b, ot, dt: (0, 0)     # weights stay VMEM-resident
    grid_spec = pltpu.PrefetchScalarGridSpec(
        num_scalar_prefetch=2,                  # origin_idx, dest_idx -> SMEM
        grid=(B,),
        in_specs=[pl.BlockSpec(a.shape, const_block) for a in args],
        out_specs=pl.BlockSpec((1, 1, out_pad), lambda b, ot, dt: (b, 0, 0)),
        scratch_shapes=[pltpu.VMEM((T, G), jnp.float32)],
    )
    logits = pl.pallas_call(
        _fused_kernel,
        out_shape=jax.ShapeDtypeStruct((B, 1, out_pad), jnp.float32),
        grid_spec=grid_spec,
        compiler_params=pltpu.CompilerParams(
            dimension_semantics=("parallel",)),   # v7x: shard candidates on 2 TCs
    )(origin_idx, dest_idx, *args)
    return logits


# ----------------------------------------------------------------------------
# Parameter construction (deterministic, synthetic)
# ----------------------------------------------------------------------------
def _uniform(key, shape, scale):
    return jax.random.uniform(key, shape, jnp.float32, -scale, scale)


def make_params(key, cfg):
    emb = cfg["embedding_size"]
    bert = cfg["bert_size"]
    cc = cfg["charencoding_size"]
    L = cfg["char_len"]
    He = cfg["bilstm_entities_size"] // 2
    Hs = cfg["lstm_sentence_input_size"] // 2
    Ht = cfg["lstm_sentence_hidden_size"]
    d_rest = (bert + emb + cfg["postag_size"] + cfg["dependency_size"]
              + cfg["entity_type_size"] + cfg["entity_tag_size"])
    d_total = d_rest + cc
    dense_in = Ht + 2 * cfg["bilstm_entities_size"]
    assert 4 * He <= _GSTRIDE and 4 * Hs <= _GSTRIDE

    keys = iter(jax.random.split(key, 48))
    nk = lambda: next(keys)

    def lstm_dir(input_size, H):
        s = 1.0 / math.sqrt(H)
        return (_uniform(nk(), (input_size, 4 * H), s),   # W_ih, gate cols i,f,g,o
                _uniform(nk(), (H, 4 * H), s),            # W_hh
                _uniform(nk(), (1, 4 * H), s))            # b_ih + b_hh combined

    # six BiLSTM directions: origin f/b, destination f/b, sentence f/b
    dirs = ([lstm_dir(d_total, He) for _ in range(4)]
            + [lstm_dir(d_total, Hs) for _ in range(2)])

    # merged input projection, one 128-lane-aligned block per direction
    wih_all = jnp.zeros((d_total, 6 * _GSTRIDE), jnp.float32)
    b_all = jnp.zeros((1, 6 * _GSTRIDE), jnp.float32)
    for d, (wih, _, bias) in enumerate(dirs):
        w = wih.shape[1]
        wih_all = wih_all.at[:, d * _GSTRIDE:d * _GSTRIDE + w].set(wih)
        b_all = b_all.at[:, d * _GSTRIDE:d * _GSTRIDE + w].set(bias)

    def fuse_pair(whh_f, whh_b, H):
        # block-diagonal fused W_hh; gate columns interleaved [i_f i_b f_f f_b ...]
        w = jnp.zeros((2 * H, 8 * H), jnp.float32)
        for q in range(4):
            w = w.at[0:H, (2 * q) * H:(2 * q + 1) * H].set(
                whh_f[:, q * H:(q + 1) * H])
            w = w.at[H:2 * H, (2 * q + 1) * H:(2 * q + 2) * H].set(
                whh_b[:, q * H:(q + 1) * H])
        return w.astype(jnp.bfloat16)

    whh_oe = fuse_pair(dirs[0][1], dirs[1][1], He)
    whh_de = fuse_pair(dirs[2][1], dirs[3][1], He)
    whh_se = fuse_pair(dirs[4][1], dirs[5][1], Hs)

    wih_top, whh_top, b_top = lstm_dir(cfg["lstm_sentence_input_size"], Ht)

    # CharCNN (k=3, valid) as a banded matmul over the flattened (L*C) char axis
    w3 = _uniform(nk(), (3, cc, cc), 0.3)        # 3 taps, (C_in, C_out)
    band = jnp.zeros((L * cc, (L - 2) * cc), jnp.float32)
    for p in range(L - 2):
        for s in range(3):
            band = band.at[(p + s) * cc:(p + s + 1) * cc,
                           p * cc:(p + 1) * cc].set(w3[s])

    no_rel = cfg["no_relations"]
    dense_w = _uniform(nk(), (dense_in, no_rel), 0.3)
    dense_b = _uniform(nk(), (1, no_rel), 0.3)
    dw_pad = jnp.zeros((dense_in, _OUT_PAD), jnp.float32).at[:, :no_rel].set(dense_w)
    db_pad = jnp.zeros((1, _OUT_PAD), jnp.float32).at[:, :no_rel].set(dense_b)

    return dict(
        wv=_uniform(nk(), (cfg["vocab"], emb), 0.5),
        char_emb=_uniform(nk(), (cfg["no_chars"], cc), 0.5),
        postag_emb=_uniform(nk(), (cfg["no_postags"], cfg["postag_size"]), 0.5),
        dep_emb=_uniform(nk(), (cfg["no_dependencies"], cfg["dependency_size"]), 0.5),
        ent_type_emb=_uniform(nk(), (cfg["no_entity_types"], cfg["entity_type_size"]), 0.5),
        ent_tag_emb=_uniform(nk(), (cfg["no_entity_tags"], cfg["entity_tag_size"]), 0.5),
        # bf16 is confined to MXU operands; gate math / state stay f32 in-kernel
        wih_all=wih_all.astype(jnp.bfloat16),
        b_all=b_all,
        whh_oe=whh_oe, whh_de=whh_de, whh_se=whh_se,
        wih_top=wih_top.astype(jnp.bfloat16),
        whh_top=whh_top.astype(jnp.bfloat16),
        b_top=b_top,
        char_conv_w=band.astype(jnp.bfloat16),
        char_conv_b=_uniform(nk(), (1, cc), 0.3),
        dense_w=dw_pad, dense_b=db_pad,
    )


# ----------------------------------------------------------------------------
# Forward pass (mirrors BERTBiLSTMRelationModel.forward, eval mode,
# batched over relation candidates of one sentence)
# ----------------------------------------------------------------------------
def forward(params, arrays, origin_idx, dest_idx, cfg):
    (word_inputs, char_inputs, bert_embeddings, postag_inputs,
     dependency_inputs, entity_type_inputs, entity_tag_inputs) = arrays
    assert word_inputs.shape[0] == 1, "one sentence per call"

    # embedding lookups / concat stay in XLA glue (gathers)
    bert = bert_embeddings[:, :, :cfg["bert_size"]]
    word = jnp.take(params["wv"], word_inputs, axis=0)
    postag = jnp.take(params["postag_emb"], postag_inputs, axis=0)
    dep = jnp.take(params["dep_emb"], dependency_inputs, axis=0)
    etype = jnp.take(params["ent_type_emb"], entity_type_inputs, axis=0)
    etag = jnp.take(params["ent_tag_emb"], entity_tag_inputs, axis=0)

    feats = jnp.concatenate([bert, word, postag, dep, etype, etag], axis=-1)[0]  # (T, D_rest)
    chare = jnp.take(params["char_emb"], char_inputs, axis=0)[0]                 # (T, L, C)
    chare_flat = chare.reshape(chare.shape[0], -1)                               # (T, L*C)

    logits = fused_relation_head(params, feats, chare_flat,
                                 origin_idx.astype(jnp.int32),
                                 dest_idx.astype(jnp.int32))
    return logits[:, 0, :cfg["no_relations"]]


# ----------------------------------------------------------------------------
# Main
# ----------------------------------------------------------------------------
if __name__ == "__main__":
    cfg = dict(
        vocab=50, embedding_size=16,
        bert_size=32, bert_raw_size=40,
        no_chars=20, charencoding_size=8, char_len=10,
        no_postags=10, postag_size=8,
        no_dependencies=12, dependency_size=8,
        no_entity_types=5, entity_type_size=8,
        no_entity_tags=5, entity_tag_size=8,
        bilstm_entities_size=32,
        lstm_sentence_input_size=32,
        lstm_sentence_hidden_size=32,
        no_relations=6,
        seq_len=8,
    )

    key = jax.random.PRNGKey(0)
    pkey, ikey = jax.random.split(key)
    params = make_params(pkey, cfg)

    iks = jax.random.split(ikey, 7)
    T, L = cfg["seq_len"], cfg["char_len"]
    word_inputs = jax.random.randint(iks[0], (1, T), 0, cfg["vocab"], jnp.int32)
    char_inputs = jax.random.randint(iks[1], (1, T, L), 0, cfg["no_chars"], jnp.int32)
    bert_embeddings = jax.random.normal(iks[2], (1, T, cfg["bert_raw_size"]), jnp.float32)
    postag_inputs = jax.random.randint(iks[3], (1, T), 0, cfg["no_postags"], jnp.int32)
    dependency_inputs = jax.random.randint(iks[4], (1, T), 0, cfg["no_dependencies"], jnp.int32)
    entity_type_inputs = jax.random.randint(iks[5], (1, T), 0, cfg["no_entity_types"], jnp.int32)
    entity_tag_inputs = jax.random.randint(iks[6], (1, T), 0, cfg["no_entity_tags"], jnp.int32)

    # B = 4 relation candidates for the same sentence.  These are runtime data
    # (scalar prefetch) -- changing them does NOT trigger a recompile.
    origin_idx = jnp.array([[1, 2], [0, 1], [3, 4], [2, 3]], jnp.int32)
    dest_idx = jnp.array([[5, 6, 7], [4, 5, 6], [5, 6, 7], [0, 6, 7]], jnp.int32)

    arrays = (word_inputs, char_inputs, bert_embeddings, postag_inputs,
              dependency_inputs, entity_type_inputs, entity_tag_inputs)

    fwd = jax.jit(lambda p, a, oi, di: forward(p, a, oi, di, cfg))
    out = jax.block_until_ready(fwd(params, arrays, origin_idx, dest_idx))

    assert out.shape == (origin_idx.shape[0], cfg["no_relations"]), out.shape
    assert bool(jnp.all(jnp.isfinite(out)))
    assert bool(jnp.all((out >= 0.0) & (out <= 1.0)))
    print("KERNEL_OK")
</pallas_src>

<mosaic_0001>
module attributes {stable_mosaic.version = 11 : i64} {
  func.func @_fused_kernel(%arg0: i32, %arg1: memref<4x2xi32, #tpu.memory_space<smem>>, %arg2: memref<4x3xi32, #tpu.memory_space<smem>>, %arg3: memref<8x80xf32, #tpu.memory_space<vmem>>, %arg4: memref<8x80xf32, #tpu.memory_space<vmem>>, %arg5: memref<88x768xbf16, #tpu.memory_space<vmem>>, %arg6: memref<1x768xf32, #tpu.memory_space<vmem>>, %arg7: memref<32x128xbf16, #tpu.memory_space<vmem>>, %arg8: memref<32x128xbf16, #tpu.memory_space<vmem>>, %arg9: memref<32x128xbf16, #tpu.memory_space<vmem>>, %arg10: memref<32x128xbf16, #tpu.memory_space<vmem>>, %arg11: memref<32x128xbf16, #tpu.memory_space<vmem>>, %arg12: memref<1x128xf32, #tpu.memory_space<vmem>>, %arg13: memref<80x64xbf16, #tpu.memory_space<vmem>>, %arg14: memref<1x8xf32, #tpu.memory_space<vmem>>, %arg15: memref<96x128xf32, #tpu.memory_space<vmem>>, %arg16: memref<1x128xf32, #tpu.memory_space<vmem>>, %arg17: memref<1x1x128xf32, #tpu.memory_space<vmem>>, %arg18: memref<8x768xf32, #tpu.memory_space<vmem>>) attributes {dimension_semantics = [#tpu.dimension_semantics<parallel>], iteration_bounds = array<i64: 4>, scalar_prefetch = 2 : i64, scratch_operands = 1 : i64, tpu.core_type = #tpu.core_type<tc>, window_params = [{pipeline_mode = #tpu.pipeline_mode<synchronous>, transform_indices = @transform_0, window_bounds = array<i64: 8, 80>}, {pipeline_mode = #tpu.pipeline_mode<synchronous>, transform_indices = @transform_1, window_bounds = array<i64: 8, 80>}, {pipeline_mode = #tpu.pipeline_mode<synchronous>, transform_indices = @transform_2, window_bounds = array<i64: 88, 768>}, {pipeline_mode = #tpu.pipeline_mode<synchronous>, transform_indices = @transform_3, window_bounds = array<i64: 1, 768>}, {pipeline_mode = #tpu.pipeline_mode<synchronous>, transform_indices = @transform_4, window_bounds = array<i64: 32, 128>}, {pipeline_mode = #tpu.pipeline_mode<synchronous>, transform_indices = @transform_5, window_bounds = array<i64: 32, 128>}, {pipeline_mode = #tpu.pipeline_mode<synchronous>, transform_indices = @transform_6, window_bounds = array<i64: 32, 128>}, {pipeline_mode = #tpu.pipeline_mode<synchronous>, transform_indices = @transform_7, window_bounds = array<i64: 32, 128>}, {pipeline_mode = #tpu.pipeline_mode<synchronous>, transform_indices = @transform_8, window_bounds = array<i64: 32, 128>}, {pipeline_mode = #tpu.pipeline_mode<synchronous>, transform_indices = @transform_9, window_bounds = array<i64: 1, 128>}, {pipeline_mode = #tpu.pipeline_mode<synchronous>, transform_indices = @transform_10, window_bounds = array<i64: 80, 64>}, {pipeline_mode = #tpu.pipeline_mode<synchronous>, transform_indices = @transform_11, window_bounds = array<i64: 1, 8>}, {pipeline_mode = #tpu.pipeline_mode<synchronous>, transform_indices = @transform_12, window_bounds = array<i64: 96, 128>}, {pipeline_mode = #tpu.pipeline_mode<synchronous>, transform_indices = @transform_13, window_bounds = array<i64: 1, 128>}, {transform_indices = @transform_14, window_bounds = array<i64: 1, 1, 128>}]} {
    %c0 = arith.constant 0 : index
    %c0_0 = arith.constant 0 : index
    %0 = vector.load %arg4[%c0, %c0_0] : memref<8x80xf32, #tpu.memory_space<vmem>>, vector<8x80xf32>
    %1 = arith.truncf %0 : vector<8x80xf32> to vector<8x80xbf16>
    %c0_1 = arith.constant 0 : index
    %c0_2 = arith.constant 0 : index
    %2 = vector.load %arg13[%c0_1, %c0_2] : memref<80x64xbf16, #tpu.memory_space<vmem>>, vector<80x64xbf16>
    %cst = arith.constant dense<0.000000e+00> : vector<8x64xf32>
    %3 = tpu.matmul %1, %2, %cst {dimension_numbers = #tpu.dot_dimension_numbers<[1], [0], [0], [1], [0, 0, 1, 1], [], []>} : vector<8x80xbf16>, vector<80x64xbf16>, vector<8x64xf32> -> vector<8x64xf32>
    %c0_3 = arith.constant 0 : index
    %c0_4 = arith.constant 0 : index
    %4 = vector.load %arg14[%c0_3, %c0_4] : memref<1x8xf32, #tpu.memory_space<vmem>>, vector<1x8xf32>
    %5 = vector.extract_strided_slice %3 {offsets = [0, 0], sizes = [8, 8], strides = [1, 1]} : vector<8x64xf32> to vector<8x8xf32>
    %6 = vector.broadcast %4 : vector<1x8xf32> to vector<8x8xf32>
    %7 = arith.addf %5, %6 : vector<8x8xf32>
    %cst_5 = arith.constant 0.000000e+00 : f32
    %8 = vector.broadcast %cst_5 : f32 to vector<8x8xf32>
    %9 = arith.maximumf %7, %8 : vector<8x8xf32>
    %10 = vector.extract_strided_slice %3 {offsets = [0, 8], sizes = [8, 8], strides = [1, 1]} : vector<8x64xf32> to vector<8x8xf32>
    %11 = vector.broadcast %4 : vector<1x8xf32> to vector<8x8xf32>
    %12 = arith.addf %10, %11 : vector<8x8xf32>
    %cst_6 = arith.constant 0.000000e+00 : f32
    %13 = vector.broadcast %cst_6 : f32 to vector<8x8xf32>
    %14 = arith.maximumf %12, %13 : vector<8x8xf32>
    %15 = arith.maximumf %9, %14 : vector<8x8xf32>
    %16 = vector.extract_strided_slice %3 {offsets = [0, 16], sizes = [8, 8], strides = [1, 1]} : vector<8x64xf32> to vector<8x8xf32>
    %17 = vector.broadcast %4 : vector<1x8xf32> to vector<8x8xf32>
    %18 = arith.addf %16, %17 : vector<8x8xf32>
    %cst_7 = arith.constant 0.000000e+00 : f32
    %19 = vector.broadcast %cst_7 : f32 to vector<8x8xf32>
    %20 = arith.maximumf %18, %19 : vector<8x8xf32>
    %21 = arith.maximumf %15, %20 : vector<8x8xf32>
    %22 = vector.extract_strided_slice %3 {offsets = [0, 24], sizes = [8, 8], strides = [1, 1]} : vector<8x64xf32> to vector<8x8xf32>
    %23 = vector.broadcast %4 : vector<1x8xf32> to vector<8x8xf32>
    %24 = arith.addf %22, %23 : vector<8x8xf32>
    %cst_8 = arith.constant 0.000000e+00 : f32
    %25 = vector.broadcast %cst_8 : f32 to vector<8x8xf32>
    %26 = arith.maximumf %24, %25 : vector<8x8xf32>
    %27 = arith.maximumf %21, %26 : vector<8x8xf32>
    %28 = vector.extract_strided_slice %3 {offsets = [0, 32], sizes = [8, 8], strides = [1, 1]} : vector<8x64xf32> to vector<8x8xf32>
    %29 = vector.broadcast %4 : vector<1x8xf32> to vector<8x8xf32>
    %30 = arith.addf %28, %29 : vector<8x8xf32>
    %cst_9 = arith.constant 0.000000e+00 : f32
    %31 = vector.broadcast %cst_9 : f32 to vector<8x8xf32>
    %32 = arith.maximumf %30, %31 : vector<8x8xf32>
    %33 = arith.maximumf %27, %32 : vector<8x8xf32>
    %34 = vector.extract_strided_slice %3 {offsets = [0, 40], sizes = [8, 8], strides = [1, 1]} : vector<8x64xf32> to vector<8x8xf32>
    %35 = vector.broadcast %4 : vector<1x8xf32> to vector<8x8xf32>
    %36 = arith.addf %34, %35 : vector<8x8xf32>
    %cst_10 = arith.constant 0.000000e+00 : f32
    %37 = vector.broadcast %cst_10 : f32 to vector<8x8xf32>
    %38 = arith.maximumf %36, %37 : vector<8x8xf32>
    %39 = arith.maximumf %33, %38 : vector<8x8xf32>
    %40 = vector.extract_strided_slice %3 {offsets = [0, 48], sizes = [8, 8], strides = [1, 1]} : vector<8x64xf32> to vector<8x8xf32>
    %41 = vector.broadcast %4 : vector<1x8xf32> to vector<8x8xf32>
    %42 = arith.addf %40, %41 : vector<8x8xf32>
    %cst_11 = arith.constant 0.000000e+00 : f32
    %43 = vector.broadcast %cst_11 : f32 to vector<8x8xf32>
    %44 = arith.maximumf %42, %43 : vector<8x8xf32>
    %45 = arith.maximumf %39, %44 : vector<8x8xf32>
    %46 = vector.extract_strided_slice %3 {offsets = [0, 56], sizes = [8, 8], strides = [1, 1]} : vector<8x64xf32> to vector<8x8xf32>
    %47 = vector.broadcast %4 : vector<1x8xf32> to vector<8x8xf32>
    %48 = arith.addf %46, %47 : vector<8x8xf32>
    %cst_12 = arith.constant 0.000000e+00 : f32
    %49 = vector.broadcast %cst_12 : f32 to vector<8x8xf32>
    %50 = arith.maximumf %48, %49 : vector<8x8xf32>
    %51 = arith.maximumf %45, %50 : vector<8x8xf32>
    %c0_13 = arith.constant 0 : index
    %c0_14 = arith.constant 0 : index
    %52 = vector.load %arg3[%c0_13, %c0_14] : memref<8x80xf32, #tpu.memory_space<vmem>>, vector<8x80xf32>
    %53 = tpu.concatenate %52, %51 in 1 : vector<8x80xf32>, vector<8x8xf32> -> vector<8x88xf32>
    %54 = arith.truncf %53 : vector<8x88xf32> to vector<8x88xbf16>
    %c0_15 = arith.constant 0 : index
    %c0_16 = arith.constant 0 : index
    %55 = vector.load %arg5[%c0_15, %c0_16] : memref<88x768xbf16, #tpu.memory_space<vmem>>, vector<88x768xbf16>
    %cst_17 = arith.constant dense<0.000000e+00> : vector<8x768xf32>
    %56 = tpu.matmul %54, %55, %cst_17 {dimension_numbers = #tpu.dot_dimension_numbers<[1], [0], [0], [1], [0, 0, 1, 1], [], []>} : vector<8x88xbf16>, vector<88x768xbf16>, vector<8x768xf32> -> vector<8x768xf32>
    %c0_18 = arith.constant 0 : index
    %c0_19 = arith.constant 0 : index
    %57 = vector.load %arg6[%c0_18, %c0_19] : memref<1x768xf32, #tpu.memory_space<vmem>>, vector<1x768xf32>
    %58 = vector.broadcast %57 : vector<1x768xf32> to vector<8x768xf32>
    %59 = arith.addf %56, %58 : vector<8x768xf32>
    %c0_20 = arith.constant 0 : index
    %c0_21 = arith.constant 0 : index
    %60 = vector.load %arg18[%c0_20, %c0_21] : memref<8x768xf32, #tpu.memory_space<vmem>>, vector<8x768xf32>
    tpu.vector_store %arg18[%c0_20, %c0_21], %59 {strides = array<i32>} : memref<8x768xf32, #tpu.memory_space<vmem>>, vector<8x768xf32>,
    %61 = arith.index_cast %arg0 : i32 to index
    %c0_22 = arith.constant 0 : index
    %62 = memref.load %arg1[%61, %c0_22] : memref<4x2xi32, #tpu.memory_space<smem>>
    %63 = arith.index_cast %62 : i32 to index
    %c0_23 = arith.constant 0 : index
    %64 = vector.load %arg18[%63, %c0_23] : memref<8x768xf32, #tpu.memory_space<vmem>>, vector<1x768xf32>
    %65 = arith.index_cast %arg0 : i32 to index
    %c1 = arith.constant 1 : index
    %66 = memref.load %arg1[%65, %c1] : memref<4x2xi32, #tpu.memory_space<smem>>
    %67 = arith.index_cast %66 : i32 to index
    %c0_24 = arith.constant 0 : index
    %68 = vector.load %arg18[%67, %c0_24] : memref<8x768xf32, #tpu.memory_space<vmem>>, vector<1x768xf32>
    %69 = vector.extract_strided_slice %64 {offsets = [0, 0], sizes = [1, 64], strides = [1, 1]} : vector<1x768xf32> to vector<1x64xf32>
    %70 = vector.extract_strided_slice %68 {offsets = [0, 0], sizes = [1, 64], strides = [1, 1]} : vector<1x768xf32> to vector<1x64xf32>
    %71 = tpu.concatenate %69, %70 in 0 : vector<1x64xf32>, vector<1x64xf32> -> vector<2x64xf32>
    %72 = vector.extract_strided_slice %68 {offsets = [0, 128], sizes = [1, 64], strides = [1, 1]} : vector<1x768xf32> to vector<1x64xf32>
    %73 = vector.extract_strided_slice %64 {offsets = [0, 128], sizes = [1, 64], strides = [1, 1]} : vector<1x768xf32> to vector<1x64xf32>
    %74 = tpu.concatenate %72, %73 in 0 : vector<1x64xf32>, vector<1x64xf32> -> vector<2x64xf32>
    %75 = vector.extract_strided_slice %71 {offsets = [0, 0], sizes = [2, 16], strides = [1, 1]} : vector<2x64xf32> to vector<2x16xf32>
    %76 = vector.extract_strided_slice %74 {offsets = [0, 0], sizes = [2, 16], strides = [1, 1]} : vector<2x64xf32> to vector<2x16xf32>
    %77 = vector.extract_strided_slice %71 {offsets = [0, 16], sizes = [2, 16], strides = [1, 1]} : vector<2x64xf32> to vector<2x16xf32>
    %78 = vector.extract_strided_slice %74 {offsets = [0, 16], sizes = [2, 16], strides = [1, 1]} : vector<2x64xf32> to vector<2x16xf32>
    %79 = vector.extract_strided_slice %71 {offsets = [0, 32], sizes = [2, 16], strides = [1, 1]} : vector<2x64xf32> to vector<2x16xf32>
    %80 = vector.extract_strided_slice %74 {offsets = [0, 32], sizes = [2, 16], strides = [1, 1]} : vector<2x64xf32> to vector<2x16xf32>
    %81 = vector.extract_strided_slice %71 {offsets = [0, 48], sizes = [2, 16], strides = [1, 1]} : vector<2x64xf32> to vector<2x16xf32>
    %82 = vector.extract_strided_slice %74 {offsets = [0, 48], sizes = [2, 16], strides = [1, 1]} : vector<2x64xf32> to vector<2x16xf32>
    %83 = tpu.concatenate %75, %76, %77, %78, %79, %80, %81, %82 in 1 : vector<2x16xf32>, vector<2x16xf32>, vector<2x16xf32>, vector<2x16xf32>, vector<2x16xf32>, vector<2x16xf32>, vector<2x16xf32>, vector<2x16xf32> -> vector<2x128xf32>
    %c0_25 = arith.constant 0 : index
    %c0_26 = arith.constant 0 : index
    %84 = vector.load %arg7[%c0_25, %c0_26] : memref<32x128xbf16, #tpu.memory_space<vmem>>, vector<32x128xbf16>
    %cst_27 = arith.constant 0.000000e+00 : f32
    %85 = vector.broadcast %cst_27 : f32 to vector<1x32xf32>
    %cst_28 = arith.constant 0.000000e+00 : f32
    %86 = vector.broadcast %cst_28 : f32 to vector<1x32xf32>
    %87 = vector.extract_strided_slice %83 {offsets = [0, 0], sizes = [1, 128], strides = [1, 1]} : vector<2x128xf32> to vector<1x128xf32>
    %88 = arith.truncf %85 : vector<1x32xf32> to vector<1x32xbf16>
    %cst_29 = arith.constant dense<0.000000e+00> : vector<1x128xf32>
    %89 = tpu.matmul %88, %84, %cst_29 {dimension_numbers = #tpu.dot_dimension_numbers<[1], [0], [0], [1], [0, 0, 1, 1], [], []>} : vector<1x32xbf16>, vector<32x128xbf16>, vector<1x128xf32> -> vector<1x128xf32>
    %90 = arith.addf %87, %89 : vector<1x128xf32>
    %91 = vector.extract_strided_slice %90 {offsets = [0, 0], sizes = [1, 32], strides = [1, 1]} : vector<1x128xf32> to vector<1x32xf32>
    %92 = arith.negf %91 : vector<1x32xf32>
    %93 = math.exp %92 : vector<1x32xf32>
    %cst_30 = arith.constant 1.000000e+00 : f32
    %94 = vector.broadcast %cst_30 : f32 to vector<1x32xf32>
    %95 = arith.addf %94, %93 : vector<1x32xf32>
    %96 = arith.divf %94, %95 : vector<1x32xf32>
    %97 = vector.extract_strided_slice %90 {offsets = [0, 32], sizes = [1, 32], strides = [1, 1]} : vector<1x128xf32> to vector<1x32xf32>
    %98 = arith.negf %97 : vector<1x32xf32>
    %99 = math.exp %98 : vector<1x32xf32>
    %cst_31 = arith.constant 1.000000e+00 : f32
    %100 = vector.broadcast %cst_31 : f32 to vector<1x32xf32>
    %101 = arith.addf %100, %99 : vector<1x32xf32>
    %102 = arith.divf %100, %101 : vector<1x32xf32>
    %103 = vector.extract_strided_slice %90 {offsets = [0, 64], sizes = [1, 32], strides = [1, 1]} : vector<1x128xf32> to vector<1x32xf32>
    %104 = math.tanh %103 : vector<1x32xf32>
    %105 = vector.extract_strided_slice %90 {offsets = [0, 96], sizes = [1, 32], strides = [1, 1]} : vector<1x128xf32> to vector<1x32xf32>
    %106 = arith.negf %105 : vector<1x32xf32>
    %107 = math.exp %106 : vector<1x32xf32>
    %cst_32 = arith.constant 1.000000e+00 : f32
    %108 = vector.broadcast %cst_32 : f32 to vector<1x32xf32>
    %109 = arith.addf %108, %107 : vector<1x32xf32>
    %110 = arith.divf %108, %109 : vector<1x32xf32>
    %111 = arith.mulf %102, %86 : vector<1x32xf32>
    %112 = arith.mulf %96, %104 : vector<1x32xf32>
    %113 = arith.addf %111, %112 : vector<1x32xf32>
    %114 = math.tanh %113 : vector<1x32xf32>
    %115 = arith.mulf %110, %114 : vector<1x32xf32>
    %116 = vector.extract_strided_slice %83 {offsets = [1, 0], sizes = [1, 128], strides = [1, 1]} : vector<2x128xf32> to vector<1x128xf32>
    %117 = arith.truncf %115 : vector<1x32xf32> to vector<1x32xbf16>
    %cst_33 = arith.constant dense<0.000000e+00> : vector<1x128xf32>
    %118 = tpu.matmul %117, %84, %cst_33 {dimension_numbers = #tpu.dot_dimension_numbers<[1], [0], [0], [1], [0, 0, 1, 1], [], []>} : vector<1x32xbf16>, vector<32x128xbf16>, vector<1x128xf32> -> vector<1x128xf32>
    %119 = arith.addf %116, %118 : vector<1x128xf32>
    %120 = vector.extract_strided_slice %119 {offsets = [0, 0], sizes = [1, 32], strides = [1, 1]} : vector<1x128xf32> to vector<1x32xf32>
    %121 = arith.negf %120 : vector<1x32xf32>
    %122 = math.exp %121 : vector<1x32xf32>
    %cst_34 = arith.constant 1.000000e+00 : f32
    %123 = vector.broadcast %cst_34 : f32 to vector<1x32xf32>
    %124 = arith.addf %123, %122 : vector<1x32xf32>
    %125 = arith.divf %123, %124 : vector<1x32xf32>
    %126 = vector.extract_strided_slice %119 {offsets = [0, 32], sizes = [1, 32], strides = [1, 1]} : vector<1x128xf32> to vector<1x32xf32>
    %127 = arith.negf %126 : vector<1x32xf32>
    %128 = math.exp %127 : vector<1x32xf32>
    %cst_35 = arith.constant 1.000000e+00 : f32
    %129 = vector.broadcast %cst_35 : f32 to vector<1x32xf32>
    %130 = arith.addf %129, %128 : vector<1x32xf32>
    %131 = arith.divf %129, %130 : vector<1x32xf32>
    %132 = vector.extract_strided_slice %119 {offsets = [0, 64], sizes = [1, 32], strides = [1, 1]} : vector<1x128xf32> to vector<1x32xf32>
    %133 = math.tanh %132 : vector<1x32xf32>
    %134 = vector.extract_strided_slice %119 {offsets = [0, 96], sizes = [1, 32], strides = [1, 1]} : vector<1x128xf32> to vector<1x32xf32>
    %135 = arith.negf %134 : vector<1x32xf32>
    %136 = math.exp %135 : vector<1x32xf32>
    %cst_36 = arith.constant 1.000000e+00 : f32
    %137 = vector.broadcast %cst_36 : f32 to vector<1x32xf32>
    %138 = arith.addf %137, %136 : vector<1x32xf32>
    %139 = arith.divf %137, %138 : vector<1x32xf32>
    %140 = arith.mulf %131, %113 : vector<1x32xf32>
    %141 = arith.mulf %125, %133 : vector<1x32xf32>
    %142 = arith.addf %140, %141 : vector<1x32xf32>
    %143 = math.tanh %142 : vector<1x32xf32>
    %144 = arith.mulf %139, %143 : vector<1x32xf32>
    %145 = arith.index_cast %arg0 : i32 to index
    %c0_37 = arith.constant 0 : index
    %146 = memref.load %arg2[%145, %c0_37] : memref<4x3xi32, #tpu.memory_space<smem>>
    %147 = arith.index_cast %146 : i32 to index
    %c0_38 = arith.constant 0 : index
    %148 = vector.load %arg18[%147, %c0_38] : memref<8x768xf32, #tpu.memory_space<vmem>>, vector<1x768xf32>
    %149 = arith.index_cast %arg0 : i32 to index
    %c1_39 = arith.constant 1 : index
    %150 = memref.load %arg2[%149, %c1_39] : memref<4x3xi32, #tpu.memory_space<smem>>
    %151 = arith.index_cast %150 : i32 to index
    %c0_40 = arith.constant 0 : index
    %152 = vector.load %arg18[%151, %c0_40] : memref<8x768xf32, #tpu.memory_space<vmem>>, vector<1x768xf32>
    %153 = arith.index_cast %arg0 : i32 to index
    %c2 = arith.constant 2 : index
    %154 = memref.load %arg2[%153, %c2] : memref<4x3xi32, #tpu.memory_space<smem>>
    %155 = arith.index_cast %154 : i32 to index
    %c0_41 = arith.constant 0 : index
    %156 = vector.load %arg18[%155, %c0_41] : memref<8x768xf32, #tpu.memory_space<vmem>>, vector<1x768xf32>
    %157 = vector.extract_strided_slice %148 {offsets = [0, 256], sizes = [1, 64], strides = [1, 1]} : vector<1x768xf32> to vector<1x64xf32>
    %158 = vector.extract_strided_slice %152 {offsets = [0, 256], sizes = [1, 64], strides = [1, 1]} : vector<1x768xf32> to vector<1x64xf32>
    %159 = vector.extract_strided_slice %156 {offsets = [0, 256], sizes = [1, 64], strides = [1, 1]} : vector<1x768xf32> to vector<1x64xf32>
    %160 = tpu.concatenate %157, %158, %159 in 0 : vector<1x64xf32>, vector<1x64xf32>, vector<1x64xf32> -> vector<3x64xf32>
    %161 = vector.extract_strided_slice %156 {offsets = [0, 384], sizes = [1, 64], strides = [1, 1]} : vector<1x768xf32> to vector<1x64xf32>
    %162 = vector.extract_strided_slice %152 {offsets = [0, 384], sizes = [1, 64], strides = [1, 1]} : vector<1x768xf32> to vector<1x64xf32>
    %163 = vector.extract_strided_slice %148 {offsets = [0, 384], sizes = [1, 64], strides = [1, 1]} : vector<1x768xf32> to vector<1x64xf32>
    %164 = tpu.concatenate %161, %162, %163 in 0 : vector<1x64xf32>, vector<1x64xf32>, vector<1x64xf32> -> vector<3x64xf32>
    %165 = vector.extract_strided_slice %160 {offsets = [0, 0], sizes = [3, 16], strides = [1, 1]} : vector<3x64xf32> to vector<3x16xf32>
    %166 = vector.extract_strided_slice %164 {offsets = [0, 0], sizes = [3, 16], strides = [1, 1]} : vector<3x64xf32> to vector<3x16xf32>
    %167 = vector.extract_strided_slice %160 {offsets = [0, 16], sizes = [3, 16], strides = [1, 1]} : vector<3x64xf32> to vector<3x16xf32>
    %168 = vector.extract_strided_slice %164 {offsets = [0, 16], sizes = [3, 16], strides = [1, 1]} : vector<3x64xf32> to vector<3x16xf32>
    %169 = vector.extract_strided_slice %160 {offsets = [0, 32], sizes = [3, 16], strides = [1, 1]} : vector<3x64xf32> to vector<3x16xf32>
    %170 = vector.extract_strided_slice %164 {offsets = [0, 32], sizes = [3, 16], strides = [1, 1]} : vector<3x64xf32> to vector<3x16xf32>
    %171 = vector.extract_strided_slice %160 {offsets = [0, 48], sizes = [3, 16], strides = [1, 1]} : vector<3x64xf32> to vector<3x16xf32>
    %172 = vector.extract_strided_slice %164 {offsets = [0, 48], sizes = [3, 16], strides = [1, 1]} : vector<3x64xf32> to vector<3x16xf32>
    %173 = tpu.concatenate %165, %166, %167, %168, %169, %170, %171, %172 in 1 : vector<3x16xf32>, vector<3x16xf32>, vector<3x16xf32>, vector<3x16xf32>, vector<3x16xf32>, vector<3x16xf32>, vector<3x16xf32>, vector<3x16xf32> -> vector<3x128xf32>
    %c0_42 = arith.constant 0 : index
    %c0_43 = arith.constant 0 : index
    %174 = vector.load %arg8[%c0_42, %c0_43] : memref<32x128xbf16, #tpu.memory_space<vmem>>, vector<32x128xbf16>
    %cst_44 = arith.constant 0.000000e+00 : f32
    %175 = vector.broadcast %cst_44 : f32 to vector<1x32xf32>
    %cst_45 = arith.constant 0.000000e+00 : f32
    %176 = vector.broadcast %cst_45 : f32 to vector<1x32xf32>
    %177 = vector.extract_strided_slice %173 {offsets = [0, 0], sizes = [1, 128], strides = [1, 1]} : vector<3x128xf32> to vector<1x128xf32>
    %178 = arith.truncf %175 : vector<1x32xf32> to vector<1x32xbf16>
    %cst_46 = arith.constant dense<0.000000e+00> : vector<1x128xf32>
    %179 = tpu.matmul %178, %174, %cst_46 {dimension_numbers = #tpu.dot_dimension_numbers<[1], [0], [0], [1], [0, 0, 1, 1], [], []>} : vector<1x32xbf16>, vector<32x128xbf16>, vector<1x128xf32> -> vector<1x128xf32>
    %180 = arith.addf %177, %179 : vector<1x128xf32>
    %181 = vector.extract_strided_slice %180 {offsets = [0, 0], sizes = [1, 32], strides = [1, 1]} : vector<1x128xf32> to vector<1x32xf32>
    %182 = arith.negf %181 : vector<1x32xf32>
    %183 = math.exp %182 : vector<1x32xf32>
    %cst_47 = arith.constant 1.000000e+00 : f32
    %184 = vector.broadcast %cst_47 : f32 to vector<1x32xf32>
    %185 = arith.addf %184, %183 : vector<1x32xf32>
    %186 = arith.divf %184, %185 : vector<1x32xf32>
    %187 = vector.extract_strided_slice %180 {offsets = [0, 32], sizes = [1, 32], strides = [1, 1]} : vector<1x128xf32> to vector<1x32xf32>
    %188 = arith.negf %187 : vector<1x32xf32>
    %189 = math.exp %188 : vector<1x32xf32>
    %cst_48 = arith.constant 1.000000e+00 : f32
    %190 = vector.broadcast %cst_48 : f32 to vector<1x32xf32>
    %191 = arith.addf %190, %189 : vector<1x32xf32>
    %192 = arith.divf %190, %191 : vector<1x32xf32>
    %193 = vector.extract_strided_slice %180 {offsets = [0, 64], sizes = [1, 32], strides = [1, 1]} : vector<1x128xf32> to vector<1x32xf32>
    %194 = math.tanh %193 : vector<1x32xf32>
    %195 = vector.extract_strided_slice %180 {offsets = [0, 96], sizes = [1, 32], strides = [1, 1]} : vector<1x128xf32> to vector<1x32xf32>
    %196 = arith.negf %195 : vector<1x32xf32>
    %197 = math.exp %196 : vector<1x32xf32>
    %cst_49 = arith.constant 1.000000e+00 : f32
    %198 = vector.broadcast %cst_49 : f32 to vector<1x32xf32>
    %199 = arith.addf %198, %197 : vector<1x32xf32>
    %200 = arith.divf %198, %199 : vector<1x32xf32>
    %201 = arith.mulf %192, %176 : vector<1x32xf32>
    %202 = arith.mulf %186, %194 : vector<1x32xf32>
    %203 = arith.addf %201, %202 : vector<1x32xf32>
    %204 = math.tanh %203 : vector<1x32xf32>
    %205 = arith.mulf %200, %204 : vector<1x32xf32>
    %206 = vector.extract_strided_slice %173 {offsets = [1, 0], sizes = [1, 128], strides = [1, 1]} : vector<3x128xf32> to vector<1x128xf32>
    %207 = arith.truncf %205 : vector<1x32xf32> to vector<1x32xbf16>
    %cst_50 = arith.constant dense<0.000000e+00> : vector<1x128xf32>
    %208 = tpu.matmul %207, %174, %cst_50 {dimension_numbers = #tpu.dot_dimension_numbers<[1], [0], [0], [1], [0, 0, 1, 1], [], []>} : vector<1x32xbf16>, vector<32x128xbf16>, vector<1x128xf32> -> vector<1x128xf32>
    %209 = arith.addf %206, %208 : vector<1x128xf32>
    %210 = vector.extract_strided_slice %209 {offsets = [0, 0], sizes = [1, 32], strides = [1, 1]} : vector<1x128xf32> to vector<1x32xf32>
    %211 = arith.negf %210 : vector<1x32xf32>
    %212 = math.exp %211 : vector<1x32xf32>
    %cst_51 = arith.constant 1.000000e+00 : f32
    %213 = vector.broadcast %cst_51 : f32 to vector<1x32xf32>
    %214 = arith.addf %213, %212 : vector<1x32xf32>
    %215 = arith.divf %213, %214 : vector<1x32xf32>
    %216 = vector.extract_strided_slice %209 {offsets = [0, 32], sizes = [1, 32], strides = [1, 1]} : vector<1x128xf32> to vector<1x32xf32>
    %217 = arith.negf %216 : vector<1x32xf32>
    %218 = math.exp %217 : vector<1x32xf32>
    %cst_52 = arith.constant 1.000000e+00 : f32
    %219 = vector.broadcast %cst_52 : f32 to vector<1x32xf32>
    %220 = arith.addf %219, %218 : vector<1x32xf32>
    %221 = arith.divf %219, %220 : vector<1x32xf32>
    %222 = vector.extract_strided_slice %209 {offsets = [0, 64], sizes = [1, 32], strides = [1, 1]} : vector<1x128xf32> to vector<1x32xf32>
    %223 = math.tanh %222 : vector<1x32xf32>
    %224 = vector.extract_strided_slice %209 {offsets = [0, 96], sizes = [1, 32], strides = [1, 1]} : vector<1x128xf32> to vector<1x32xf32>
    %225 = arith.negf %224 : vector<1x32xf32>
    %226 = math.exp %225 : vector<1x32xf32>
    %cst_53 = arith.constant 1.000000e+00 : f32
    %227 = vector.broadcast %cst_53 : f32 to vector<1x32xf32>
    %228 = arith.addf %227, %226 : vector<1x32xf32>
    %229 = arith.divf %227, %228 : vector<1x32xf32>
    %230 = arith.mulf %221, %203 : vector<1x32xf32>
    %231 = arith.mulf %215, %223 : vector<1x32xf32>
    %232 = arith.addf %230, %231 : vector<1x32xf32>
    %233 = math.tanh %232 : vector<1x32xf32>
    %234 = arith.mulf %229, %233 : vector<1x32xf32>
    %235 = vector.extract_strided_slice %173 {offsets = [2, 0], sizes = [1, 128], strides = [1, 1]} : vector<3x128xf32> to vector<1x128xf32>
    %236 = arith.truncf %234 : vector<1x32xf32> to vector<1x32xbf16>
    %cst_54 = arith.constant dense<0.000000e+00> : vector<1x128xf32>
    %237 = tpu.matmul %236, %174, %cst_54 {dimension_numbers = #tpu.dot_dimension_numbers<[1], [0], [0], [1], [0, 0, 1, 1], [], []>} : vector<1x32xbf16>, vector<32x128xbf16>, vector<1x128xf32> -> vector<1x128xf32>
    %238 = arith.addf %235, %237 : vector<1x128xf32>
    %239 = vector.extract_strided_slice %238 {offsets = [0, 0], sizes = [1, 32], strides = [1, 1]} : vector<1x128xf32> to vector<1x32xf32>
    %240 = arith.negf %239 : vector<1x32xf32>
    %241 = math.exp %240 : vector<1x32xf32>
    %cst_55 = arith.constant 1.000000e+00 : f32
    %242 = vector.broadcast %cst_55 : f32 to vector<1x32xf32>
    %243 = arith.addf %242, %241 : vector<1x32xf32>
    %244 = arith.divf %242, %243 : vector<1x32xf32>
    %245 = vector.extract_strided_slice %238 {offsets = [0, 32], sizes = [1, 32], strides = [1, 1]} : vector<1x128xf32> to vector<1x32xf32>
    %246 = arith.negf %245 : vector<1x32xf32>
    %247 = math.exp %246 : vector<1x32xf32>
    %cst_56 = arith.constant 1.000000e+00 : f32
    %248 = vector.broadcast %cst_56 : f32 to vector<1x32xf32>
    %249 = arith.addf %248, %247 : vector<1x32xf32>
    %250 = arith.divf %248, %249 : vector<1x32xf32>
    %251 = vector.extract_strided_slice %238 {offsets = [0, 64], sizes = [1, 32], strides = [1, 1]} : vector<1x128xf32> to vector<1x32xf32>
    %252 = math.tanh %251 : vector<1x32xf32>
    %253 = vector.extract_strided_slice %238 {offsets = [0, 96], sizes = [1, 32], strides = [1, 1]} : vector<1x128xf32> to vector<1x32xf32>
    %254 = arith.negf %253 : vector<1x32xf32>
    %255 = math.exp %254 : vector<1x32xf32>
    %cst_57 = arith.constant 1.000000e+00 : f32
    %256 = vector.broadcast %cst_57 : f32 to vector<1x32xf32>
    %257 = arith.addf %256, %255 : vector<1x32xf32>
    %258 = arith.divf %256, %257 : vector<1x32xf32>
    %259 = arith.mulf %250, %232 : vector<1x32xf32>
    %260 = arith.mulf %244, %252 : vector<1x32xf32>
    %261 = arith.addf %259, %260 : vector<1x32xf32>
    %262 = math.tanh %261 : vector<1x32xf32>
    %263 = arith.mulf %258, %262 : vector<1x32xf32>
    %264 = vector.extract_strided_slice %59 {offsets = [0, 512], sizes = [8, 64], strides = [1, 1]} : vector<8x768xf32> to vector<8x64xf32>
    %265 = vector.extract_strided_slice %59 {offsets = [7, 640], sizes = [1, 64], strides = [1, 1]} : vector<8x768xf32> to vector<1x64xf32>
    %266 = vector.extract_strided_slice %59 {offsets = [6, 640], sizes = [1, 64], strides = [1, 1]} : vector<8x768xf32> to vector<1x64xf32>
    %267 = vector.extract_strided_slice %59 {offsets = [5, 640], sizes = [1, 64], strides = [1, 1]} : vector<8x768xf32> to vector<1x64xf32>
    %268 = vector.extract_strided_slice %59 {offsets = [4, 640], sizes = [1, 64], strides = [1, 1]} : vector<8x768xf32> to vector<1x64xf32>
    %269 = vector.extract_strided_slice %59 {offsets = [3, 640], sizes = [1, 64], strides = [1, 1]} : vector<8x768xf32> to vector<1x64xf32>
    %270 = vector.extract_strided_slice %59 {offsets = [2, 640], sizes = [1, 64], strides = [1, 1]} : vector<8x768xf32> to vector<1x64xf32>
    %271 = vector.extract_strided_slice %59 {offsets = [1, 640], sizes = [1, 64], strides = [1, 1]} : vector<8x768xf32> to vector<1x64xf32>
    %272 = vector.extract_strided_slice %59 {offsets = [0, 640], sizes = [1, 64], strides = [1, 1]} : vector<8x768xf32> to vector<1x64xf32>
    %273 = tpu.concatenate %265, %266, %267, %268, %269, %270, %271, %272 in 0 : vector<1x64xf32>, vector<1x64xf32>, vector<1x64xf32>, vector<1x64xf32>, vector<1x64xf32>, vector<1x64xf32>, vector<1x64xf32>, vector<1x64xf32> -> vector<8x64xf32>
    %274 = vector.extract_strided_slice %264 {offsets = [0, 0], sizes = [8, 16], strides = [1, 1]} : vector<8x64xf32> to vector<8x16xf32>
    %275 = vector.extract_strided_slice %273 {offsets = [0, 0], sizes = [8, 16], strides = [1, 1]} : vector<8x64xf32> to vector<8x16xf32>
    %276 = vector.extract_strided_slice %264 {offsets = [0, 16], sizes = [8, 16], strides = [1, 1]} : vector<8x64xf32> to vector<8x16xf32>
    %277 = vector.extract_strided_slice %273 {offsets = [0, 16], sizes = [8, 16], strides = [1, 1]} : vector<8x64xf32> to vector<8x16xf32>
    %278 = vector.extract_strided_slice %264 {offsets = [0, 32], sizes = [8, 16], strides = [1, 1]} : vector<8x64xf32> to vector<8x16xf32>
    %279 = vector.extract_strided_slice %273 {offsets = [0, 32], sizes = [8, 16], strides = [1, 1]} : vector<8x64xf32> to vector<8x16xf32>
    %280 = vector.extract_strided_slice %264 {offsets = [0, 48], sizes = [8, 16], strides = [1, 1]} : vector<8x64xf32> to vector<8x16xf32>
    %281 = vector.extract_strided_slice %273 {offsets = [0, 48], sizes = [8, 16], strides = [1, 1]} : vector<8x64xf32> to vector<8x16xf32>
    %282 = tpu.concatenate %274, %275, %276, %277, %278, %279, %280, %281 in 1 : vector<8x16xf32>, vector<8x16xf32>, vector<8x16xf32>, vector<8x16xf32>, vector<8x16xf32>, vector<8x16xf32>, vector<8x16xf32>, vector<8x16xf32> -> vector<8x128xf32>
    %c0_58 = arith.constant 0 : index
    %c0_59 = arith.constant 0 : index
    %283 = vector.load %arg9[%c0_58, %c0_59] : memref<32x128xbf16, #tpu.memory_space<vmem>>, vector<32x128xbf16>
    %cst_60 = arith.constant 0.000000e+00 : f32
    %284 = vector.broadcast %cst_60 : f32 to vector<1x32xf32>
    %cst_61 = arith.constant 0.000000e+00 : f32
    %285 = vector.broadcast %cst_61 : f32 to vector<1x32xf32>
    %286 = vector.extract_strided_slice %282 {offsets = [0, 0], sizes = [1, 128], strides = [1, 1]} : vector<8x128xf32> to vector<1x128xf32>
    %287 = arith.truncf %284 : vector<1x32xf32> to vector<1x32xbf16>
    %cst_62 = arith.constant dense<0.000000e+00> : vector<1x128xf32>
    %288 = tpu.matmul %287, %283, %cst_62 {dimension_numbers = #tpu.dot_dimension_numbers<[1], [0], [0], [1], [0, 0, 1, 1], [], []>} : vector<1x32xbf16>, vector<32x128xbf16>, vector<1x128xf32> -> vector<1x128xf32>
    %289 = arith.addf %286, %288 : vector<1x128xf32>
    %290 = vector.extract_strided_slice %289 {offsets = [0, 0], sizes = [1, 32], strides = [1, 1]} : vector<1x128xf32> to vector<1x32xf32>
    %291 = arith.negf %290 : vector<1x32xf32>
    %292 = math.exp %291 : vector<1x32xf32>
    %cst_63 = arith.constant 1.000000e+00 : f32
    %293 = vector.broadcast %cst_63 : f32 to vector<1x32xf32>
    %294 = arith.addf %293, %292 : vector<1x32xf32>
    %295 = arith.divf %293, %294 : vector<1x32xf32>
    %296 = vector.extract_strided_slice %289 {offsets = [0, 32], sizes = [1, 32], strides = [1, 1]} : vector<1x128xf32> to vector<1x32xf32>
    %297 = arith.negf %296 : vector<1x32xf32>
    %298 = math.exp %297 : vector<1x32xf32>
    %cst_64 = arith.constant 1.000000e+00 : f32
    %299 = vector.broadcast %cst_64 : f32 to vector<1x32xf32>
    %300 = arith.addf %299, %298 : vector<1x32xf32>
    %301 = arith.divf %299, %300 : vector<1x32xf32>
    %302 = vector.extract_strided_slice %289 {offsets = [0, 64], sizes = [1, 32], strides = [1, 1]} : vector<1x128xf32> to vector<1x32xf32>
    %303 = math.tanh %302 : vector<1x32xf32>
    %304 = vector.extract_strided_slice %289 {offsets = [0, 96], sizes = [1, 32], strides = [1, 1]} : vector<1x128xf32> to vector<1x32xf32>
    %305 = arith.negf %304 : vector<1x32xf32>
    %306 = math.exp %305 : vector<1x32xf32>
    %cst_65 = arith.constant 1.000000e+00 : f32
    %307 = vector.broadcast %cst_65 : f32 to vector<1x32xf32>
    %308 = arith.addf %307, %306 : vector<1x32xf32>
    %309 = arith.divf %307, %308 : vector<1x32xf32>
    %310 = arith.mulf %301, %285 : vector<1x32xf32>
    %311 = arith.mulf %295, %303 : vector<1x32xf32>
    %312 = arith.addf %310, %311 : vector<1x32xf32>
    %313 = math.tanh %312 : vector<1x32xf32>
    %314 = arith.mulf %309, %313 : vector<1x32xf32>
    %315 = vector.extract_strided_slice %282 {offsets = [1, 0], sizes = [1, 128], strides = [1, 1]} : vector<8x128xf32> to vector<1x128xf32>
    %316 = arith.truncf %314 : vector<1x32xf32> to vector<1x32xbf16>
    %cst_66 = arith.constant dense<0.000000e+00> : vector<1x128xf32>
    %317 = tpu.matmul %316, %283, %cst_66 {dimension_numbers = #tpu.dot_dimension_numbers<[1], [0], [0], [1], [0, 0, 1, 1], [], []>} : vector<1x32xbf16>, vector<32x128xbf16>, vector<1x128xf32> -> vector<1x128xf32>
    %318 = arith.addf %315, %317 : vector<1x128xf32>
    %319 = vector.extract_strided_slice %318 {offsets = [0, 0], sizes = [1, 32], strides = [1, 1]} : vector<1x128xf32> to vector<1x32xf32>
    %320 = arith.negf %319 : vector<1x32xf32>
    %321 = math.exp %320 : vector<1x32xf32>
    %cst_67 = arith.constant 1.000000e+00 : f32
    %322 = vector.broadcast %cst_67 : f32 to vector<1x32xf32>
    %323 = arith.addf %322, %321 : vector<1x32xf32>
    %324 = arith.divf %322, %323 : vector<1x32xf32>
    %325 = vector.extract_strided_slice %318 {offsets = [0, 32], sizes = [1, 32], strides = [1, 1]} : vector<1x128xf32> to vector<1x32xf32>
    %326 = arith.negf %325 : vector<1x32xf32>
    %327 = math.exp %326 : vector<1x32xf32>
    %cst_68 = arith.constant 1.000000e+00 : f32
    %328 = vector.broadcast %cst_68 : f32 to vector<1x32xf32>
    %329 = arith.addf %328, %327 : vector<1x32xf32>
    %330 = arith.divf %328, %329 : vector<1x32xf32>
    %331 = vector.extract_strided_slice %318 {offsets = [0, 64], sizes = [1, 32], strides = [1, 1]} : vector<1x128xf32> to vector<1x32xf32>
    %332 = math.tanh %331 : vector<1x32xf32>
    %333 = vector.extract_strided_slice %318 {offsets = [0, 96], sizes = [1, 32], strides = [1, 1]} : vector<1x128xf32> to vector<1x32xf32>
    %334 = arith.negf %333 : vector<1x32xf32>
    %335 = math.exp %334 : vector<1x32xf32>
    %cst_69 = arith.constant 1.000000e+00 : f32
    %336 = vector.broadcast %cst_69 : f32 to vector<1x32xf32>
    %337 = arith.addf %336, %335 : vector<1x32xf32>
    %338 = arith.divf %336, %337 : vector<1x32xf32>
    %339 = arith.mulf %330, %312 : vector<1x32xf32>
    %340 = arith.mulf %324, %332 : vector<1x32xf32>
    %341 = arith.addf %339, %340 : vector<1x32xf32>
    %342 = math.tanh %341 : vector<1x32xf32>
    %343 = arith.mulf %338, %342 : vector<1x32xf32>
    %344 = vector.extract_strided_slice %282 {offsets = [2, 0], sizes = [1, 128], strides = [1, 1]} : vector<8x128xf32> to vector<1x128xf32>
    %345 = arith.truncf %343 : vector<1x32xf32> to vector<1x32xbf16>
    %cst_70 = arith.constant dense<0.000000e+00> : vector<1x128xf32>
    %346 = tpu.matmul %345, %283, %cst_70 {dimension_numbers = #tpu.dot_dimension_numbers<[1], [0], [0], [1], [0, 0, 1, 1], [], []>} : vector<1x32xbf16>, vector<32x128xbf16>, vector<1x128xf32> -> vector<1x128xf32>
    %347 = arith.addf %344, %346 : vector<1x128xf32>
    %348 = vector.extract_strided_slice %347 {offsets = [0, 0], sizes = [1, 32], strides = [1, 1]} : vector<1x128xf32> to vector<1x32xf32>
    %349 = arith.negf %348 : vector<1x32xf32>
    %350 = math.exp %349 : vector<1x32xf32>
    %cst_71 = arith.constant 1.000000e+00 : f32
    %351 = vector.broadcast %cst_71 : f32 to vector<1x32xf32>
    %352 = arith.addf %351, %350 : vector<1x32xf32>
    %353 = arith.divf %351, %352 : vector<1x32xf32>
    %354 = vector.extract_strided_slice %347 {offsets = [0, 32], sizes = [1, 32], strides = [1, 1]} : vector<1x128xf32> to vector<1x32xf32>
    %355 = arith.negf %354 : vector<1x32xf32>
    %356 = math.exp %355 : vector<1x32xf32>
    %cst_72 = arith.constant 1.000000e+00 : f32
    %357 = vector.broadcast %cst_72 : f32 to vector<1x32xf32>
    %358 = arith.addf %357, %356 : vector<1x32xf32>
    %359 = arith.divf %357, %358 : vector<1x32xf32>
    %360 = vector.extract_strided_slice %347 {offsets = [0, 64], sizes = [1, 32], strides = [1, 1]} : vector<1x128xf32> to vector<1x32xf32>
    %361 = math.tanh %360 : vector<1x32xf32>
    %362 = vector.extract_strided_slice %347 {offsets = [0, 96], sizes = [1, 32], strides = [1, 1]} : vector<1x128xf32> to vector<1x32xf32>
    %363 = arith.negf %362 : vector<1x32xf32>
    %364 = math.exp %363 : vector<1x32xf32>
    %cst_73 = arith.constant 1.000000e+00 : f32
    %365 = vector.broadcast %cst_73 : f32 to vector<1x32xf32>
    %366 = arith.addf %365, %364 : vector<1x32xf32>
    %367 = arith.divf %365, %366 : vector<1x32xf32>
    %368 = arith.mulf %359, %341 : vector<1x32xf32>
    %369 = arith.mulf %353, %361 : vector<1x32xf32>
    %370 = arith.addf %368, %369 : vector<1x32xf32>
    %371 = math.tanh %370 : vector<1x32xf32>
    %372 = arith.mulf %367, %371 : vector<1x32xf32>
    %373 = vector.extract_strided_slice %282 {offsets = [3, 0], sizes = [1, 128], strides = [1, 1]} : vector<8x128xf32> to vector<1x128xf32>
    %374 = arith.truncf %372 : vector<1x32xf32> to vector<1x32xbf16>
    %cst_74 = arith.constant dense<0.000000e+00> : vector<1x128xf32>
    %375 = tpu.matmul %374, %283, %cst_74 {dimension_numbers = #tpu.dot_dimension_numbers<[1], [0], [0], [1], [0, 0, 1, 1], [], []>} : vector<1x32xbf16>, vector<32x128xbf16>, vector<1x128xf32> -> vector<1x128xf32>
    %376 = arith.addf %373, %375 : vector<1x128xf32>
    %377 = vector.extract_strided_slice %376 {offsets = [0, 0], sizes = [1, 32], strides = [1, 1]} : vector<1x128xf32> to vector<1x32xf32>
    %378 = arith.negf %377 : vector<1x32xf32>
    %379 = math.exp %378 : vector<1x32xf32>
    %cst_75 = arith.constant 1.000000e+00 : f32
    %380 = vector.broadcast %cst_75 : f32 to vector<1x32xf32>
    %381 = arith.addf %380, %379 : vector<1x32xf32>
    %382 = arith.divf %380, %381 : vector<1x32xf32>
    %383 = vector.extract_strided_slice %376 {offsets = [0, 32], sizes = [1, 32], strides = [1, 1]} : vector<1x128xf32> to vector<1x32xf32>
    %384 = arith.negf %383 : vector<1x32xf32>
    %385 = math.exp %384 : vector<1x32xf32>
    %cst_76 = arith.constant 1.000000e+00 : f32
    %386 = vector.broadcast %cst_76 : f32 to vector<1x32xf32>
    %387 = arith.addf %386, %385 : vector<1x32xf32>
    %388 = arith.divf %386, %387 : vector<1x32xf32>
    %389 = vector.extract_strided_slice %376 {offsets = [0, 64], sizes = [1, 32], strides = [1, 1]} : vector<1x128xf32> to vector<1x32xf32>
    %390 = math.tanh %389 : vector<1x32xf32>
    %391 = vector.extract_strided_slice %376 {offsets = [0, 96], sizes = [1, 32], strides = [1, 1]} : vector<1x128xf32> to vector<1x32xf32>
    %392 = arith.negf %391 : vector<1x32xf32>
    %393 = math.exp %392 : vector<1x32xf32>
    %cst_77 = arith.constant 1.000000e+00 : f32
    %394 = vector.broadcast %cst_77 : f32 to vector<1x32xf32>
    %395 = arith.addf %394, %393 : vector<1x32xf32>
    %396 = arith.divf %394, %395 : vector<1x32xf32>
    %397 = arith.mulf %388, %370 : vector<1x32xf32>
    %398 = arith.mulf %382, %390 : vector<1x32xf32>
    %399 = arith.addf %397, %398 : vector<1x32xf32>
    %400 = math.tanh %399 : vector<1x32xf32>
    %401 = arith.mulf %396, %400 : vector<1x32xf32>
    %402 = vector.extract_strided_slice %282 {offsets = [4, 0], sizes = [1, 128], strides = [1, 1]} : vector<8x128xf32> to vector<1x128xf32>
    %403 = arith.truncf %401 : vector<1x32xf32> to vector<1x32xbf16>
    %cst_78 = arith.constant dense<0.000000e+00> : vector<1x128xf32>
    %404 = tpu.matmul %403, %283, %cst_78 {dimension_numbers = #tpu.dot_dimension_numbers<[1], [0], [0], [1], [0, 0, 1, 1], [], []>} : vector<1x32xbf16>, vector<32x128xbf16>, vector<1x128xf32> -> vector<1x128xf32>
    %405 = arith.addf %402, %404 : vector<1x128xf32>
    %406 = vector.extract_strided_slice %405 {offsets = [0, 0], sizes = [1, 32], strides = [1, 1]} : vector<1x128xf32> to vector<1x32xf32>
    %407 = arith.negf %406 : vector<1x32xf32>
    %408 = math.exp %407 : vector<1x32xf32>
    %cst_79 = arith.constant 1.000000e+00 : f32
    %409 = vector.broadcast %cst_79 : f32 to vector<1x32xf32>
    %410 = arith.addf %409, %408 : vector<1x32xf32>
    %411 = arith.divf %409, %410 : vector<1x32xf32>
    %412 = vector.extract_strided_slice %405 {offsets = [0, 32], sizes = [1, 32], strides = [1, 1]} : vector<1x128xf32> to vector<1x32xf32>
    %413 = arith.negf %412 : vector<1x32xf32>
    %414 = math.exp %413 : vector<1x32xf32>
    %cst_80 = arith.constant 1.000000e+00 : f32
    %415 = vector.broadcast %cst_80 : f32 to vector<1x32xf32>
    %416 = arith.addf %415, %414 : vector<1x32xf32>
    %417 = arith.divf %415, %416 : vector<1x32xf32>
    %418 = vector.extract_strided_slice %405 {offsets = [0, 64], sizes = [1, 32], strides = [1, 1]} : vector<1x128xf32> to vector<1x32xf32>
    %419 = math.tanh %418 : vector<1x32xf32>
    %420 = vector.extract_strided_slice %405 {offsets = [0, 96], sizes = [1, 32], strides = [1, 1]} : vector<1x128xf32> to vector<1x32xf32>
    %421 = arith.negf %420 : vector<1x32xf32>
    %422 = math.exp %421 : vector<1x32xf32>
    %cst_81 = arith.constant 1.000000e+00 : f32
    %423 = vector.broadcast %cst_81 : f32 to vector<1x32xf32>
    %424 = arith.addf %423, %422 : vector<1x32xf32>
    %425 = arith.divf %423, %424 : vector<1x32xf32>
    %426 = arith.mulf %417, %399 : vector<1x32xf32>
    %427 = arith.mulf %411, %419 : vector<1x32xf32>
    %428 = arith.addf %426, %427 : vector<1x32xf32>
    %429 = math.tanh %428 : vector<1x32xf32>
    %430 = arith.mulf %425, %429 : vector<1x32xf32>
    %431 = vector.extract_strided_slice %282 {offsets = [5, 0], sizes = [1, 128], strides = [1, 1]} : vector<8x128xf32> to vector<1x128xf32>
    %432 = arith.truncf %430 : vector<1x32xf32> to vector<1x32xbf16>
    %cst_82 = arith.constant dense<0.000000e+00> : vector<1x128xf32>
    %433 = tpu.matmul %432, %283, %cst_82 {dimension_numbers = #tpu.dot_dimension_numbers<[1], [0], [0], [1], [0, 0, 1, 1], [], []>} : vector<1x32xbf16>, vector<32x128xbf16>, vector<1x128xf32> -> vector<1x128xf32>
    %434 = arith.addf %431, %433 : vector<1x128xf32>
    %435 = vector.extract_strided_slice %434 {offsets = [0, 0], sizes = [1, 32], strides = [1, 1]} : vector<1x128xf32> to vector<1x32xf32>
    %436 = arith.negf %435 : vector<1x32xf32>
    %437 = math.exp %436 : vector<1x32xf32>
    %cst_83 = arith.constant 1.000000e+00 : f32
    %438 = vector.broadcast %cst_83 : f32 to vector<1x32xf32>
    %439 = arith.addf %438, %437 : vector<1x32xf32>
    %440 = arith.divf %438, %439 : vector<1x32xf32>
    %441 = vector.extract_strided_slice %434 {offsets = [0, 32], sizes = [1, 32], strides = [1, 1]} : vector<1x128xf32> to vector<1x32xf32>
    %442 = arith.negf %441 : vector<1x32xf32>
    %443 = math.exp %442 : vector<1x32xf32>
    %cst_84 = arith.constant 1.000000e+00 : f32
    %444 = vector.broadcast %cst_84 : f32 to vector<1x32xf32>
    %445 = arith.addf %444, %443 : vector<1x32xf32>
    %446 = arith.divf %444, %445 : vector<1x32xf32>
    %447 = vector.extract_strided_slice %434 {offsets = [0, 64], sizes = [1, 32], strides = [1, 1]} : vector<1x128xf32> to vector<1x32xf32>
    %448 = math.tanh %447 : vector<1x32xf32>
    %449 = vector.extract_strided_slice %434 {offsets = [0, 96], sizes = [1, 32], strides = [1, 1]} : vector<1x128xf32> to vector<1x32xf32>
    %450 = arith.negf %449 : vector<1x32xf32>
    %451 = math.exp %450 : vector<1x32xf32>
    %cst_85 = arith.constant 1.000000e+00 : f32
    %452 = vector.broadcast %cst_85 : f32 to vector<1x32xf32>
    %453 = arith.addf %452, %451 : vector<1x32xf32>
    %454 = arith.divf %452, %453 : vector<1x32xf32>
    %455 = arith.mulf %446, %428 : vector<1x32xf32>
    %456 = arith.mulf %440, %448 : vector<1x32xf32>
    %457 = arith.addf %455, %456 : vector<1x32xf32>
    %458 = math.tanh %457 : vector<1x32xf32>
    %459 = arith.mulf %454, %458 : vector<1x32xf32>
    %460 = vector.extract_strided_slice %282 {offsets = [6, 0], sizes = [1, 128], strides = [1, 1]} : vector<8x128xf32> to vector<1x128xf32>
    %461 = arith.truncf %459 : vector<1x32xf32> to vector<1x32xbf16>
    %cst_86 = arith.constant dense<0.000000e+00> : vector<1x128xf32>
    %462 = tpu.matmul %461, %283, %cst_86 {dimension_numbers = #tpu.dot_dimension_numbers<[1], [0], [0], [1], [0, 0, 1, 1], [], []>} : vector<1x32xbf16>, vector<32x128xbf16>, vector<1x128xf32> -> vector<1x128xf32>
    %463 = arith.addf %460, %462 : vector<1x128xf32>
    %464 = vector.extract_strided_slice %463 {offsets = [0, 0], sizes = [1, 32], strides = [1, 1]} : vector<1x128xf32> to vector<1x32xf32>
    %465 = arith.negf %464 : vector<1x32xf32>
    %466 = math.exp %465 : vector<1x32xf32>
    %cst_87 = arith.constant 1.000000e+00 : f32
    %467 = vector.broadcast %cst_87 : f32 to vector<1x32xf32>
    %468 = arith.addf %467, %466 : vector<1x32xf32>
    %469 = arith.divf %467, %468 : vector<1x32xf32>
    %470 = vector.extract_strided_slice %463 {offsets = [0, 32], sizes = [1, 32], strides = [1, 1]} : vector<1x128xf32> to vector<1x32xf32>
    %471 = arith.negf %470 : vector<1x32xf32>
    %472 = math.exp %471 : vector<1x32xf32>
    %cst_88 = arith.constant 1.000000e+00 : f32
    %473 = vector.broadcast %cst_88 : f32 to vector<1x32xf32>
    %474 = arith.addf %473, %472 : vector<1x32xf32>
    %475 = arith.divf %473, %474 : vector<1x32xf32>
    %476 = vector.extract_strided_slice %463 {offsets = [0, 64], sizes = [1, 32], strides = [1, 1]} : vector<1x128xf32> to vector<1x32xf32>
    %477 = math.tanh %476 : vector<1x32xf32>
    %478 = vector.extract_strided_slice %463 {offsets = [0, 96], sizes = [1, 32], strides = [1, 1]} : vector<1x128xf32> to vector<1x32xf32>
    %479 = arith.negf %478 : vector<1x32xf32>
    %480 = math.exp %479 : vector<1x32xf32>
    %cst_89 = arith.constant 1.000000e+00 : f32
    %481 = vector.broadcast %cst_89 : f32 to vector<1x32xf32>
    %482 = arith.addf %481, %480 : vector<1x32xf32>
    %483 = arith.divf %481, %482 : vector<1x32xf32>
    %484 = arith.mulf %475, %457 : vector<1x32xf32>
    %485 = arith.mulf %469, %477 : vector<1x32xf32>
    %486 = arith.addf %484, %485 : vector<1x32xf32>
    %487 = math.tanh %486 : vector<1x32xf32>
    %488 = arith.mulf %483, %487 : vector<1x32xf32>
    %489 = vector.extract_strided_slice %282 {offsets = [7, 0], sizes = [1, 128], strides = [1, 1]} : vector<8x128xf32> to vector<1x128xf32>
    %490 = arith.truncf %488 : vector<1x32xf32> to vector<1x32xbf16>
    %cst_90 = arith.constant dense<0.000000e+00> : vector<1x128xf32>
    %491 = tpu.matmul %490, %283, %cst_90 {dimension_numbers = #tpu.dot_dimension_numbers<[1], [0], [0], [1], [0, 0, 1, 1], [], []>} : vector<1x32xbf16>, vector<32x128xbf16>, vector<1x128xf32> -> vector<1x128xf32>
    %492 = arith.addf %489, %491 : vector<1x128xf32>
    %493 = vector.extract_strided_slice %492 {offsets = [0, 0], sizes = [1, 32], strides = [1, 1]} : vector<1x128xf32> to vector<1x32xf32>
    %494 = arith.negf %493 : vector<1x32xf32>
    %495 = math.exp %494 : vector<1x32xf32>
    %cst_91 = arith.constant 1.000000e+00 : f32
    %496 = vector.broadcast %cst_91 : f32 to vector<1x32xf32>
    %497 = arith.addf %496, %495 : vector<1x32xf32>
    %498 = arith.divf %496, %497 : vector<1x32xf32>
    %499 = vector.extract_strided_slice %492 {offsets = [0, 32], sizes = [1, 32], strides = [1, 1]} : vector<1x128xf32> to vector<1x32xf32>
    %500 = arith.negf %499 : vector<1x32xf32>
    %501 = math.exp %500 : vector<1x32xf32>
    %cst_92 = arith.constant 1.000000e+00 : f32
    %502 = vector.broadcast %cst_92 : f32 to vector<1x32xf32>
    %503 = arith.addf %502, %501 : vector<1x32xf32>
    %504 = arith.divf %502, %503 : vector<1x32xf32>
    %505 = vector.extract_strided_slice %492 {offsets = [0, 64], sizes = [1, 32], strides = [1, 1]} : vector<1x128xf32> to vector<1x32xf32>
    %506 = math.tanh %505 : vector<1x32xf32>
    %507 = vector.extract_strided_slice %492 {offsets = [0, 96], sizes = [1, 32], strides = [1, 1]} : vector<1x128xf32> to vector<1x32xf32>
    %508 = arith.negf %507 : vector<1x32xf32>
    %509 = math.exp %508 : vector<1x32xf32>
    %cst_93 = arith.constant 1.000000e+00 : f32
    %510 = vector.broadcast %cst_93 : f32 to vector<1x32xf32>
    %511 = arith.addf %510, %509 : vector<1x32xf32>
    %512 = arith.divf %510, %511 : vector<1x32xf32>
    %513 = arith.mulf %504, %486 : vector<1x32xf32>
    %514 = arith.mulf %498, %506 : vector<1x32xf32>
    %515 = arith.addf %513, %514 : vector<1x32xf32>
    %516 = math.tanh %515 : vector<1x32xf32>
    %517 = arith.mulf %512, %516 : vector<1x32xf32>
    %518 = vector.extract_strided_slice %314 {offsets = [0, 0], sizes = [1, 16], strides = [1, 1]} : vector<1x32xf32> to vector<1x16xf32>
    %519 = vector.extract_strided_slice %517 {offsets = [0, 16], sizes = [1, 16], strides = [1, 1]} : vector<1x32xf32> to vector<1x16xf32>
    %520 = tpu.concatenate %518, %519 in 1 : vector<1x16xf32>, vector<1x16xf32> -> vector<1x32xf32>
    %521 = vector.extract_strided_slice %343 {offsets = [0, 0], sizes = [1, 16], strides = [1, 1]} : vector<1x32xf32> to vector<1x16xf32>
    %522 = vector.extract_strided_slice %488 {offsets = [0, 16], sizes = [1, 16], strides = [1, 1]} : vector<1x32xf32> to vector<1x16xf32>
    %523 = tpu.concatenate %521, %522 in 1 : vector<1x16xf32>, vector<1x16xf32> -> vector<1x32xf32>
    %524 = vector.extract_strided_slice %372 {offsets = [0, 0], sizes = [1, 16], strides = [1, 1]} : vector<1x32xf32> to vector<1x16xf32>
    %525 = vector.extract_strided_slice %459 {offsets = [0, 16], sizes = [1, 16], strides = [1, 1]} : vector<1x32xf32> to vector<1x16xf32>
    %526 = tpu.concatenate %524, %525 in 1 : vector<1x16xf32>, vector<1x16xf32> -> vector<1x32xf32>
    %527 = vector.extract_strided_slice %401 {offsets = [0, 0], sizes = [1, 16], strides = [1, 1]} : vector<1x32xf32> to vector<1x16xf32>
    %528 = vector.extract_strided_slice %430 {offsets = [0, 16], sizes = [1, 16], strides = [1, 1]} : vector<1x32xf32> to vector<1x16xf32>
    %529 = tpu.concatenate %527, %528 in 1 : vector<1x16xf32>, vector<1x16xf32> -> vector<1x32xf32>
    %530 = vector.extract_strided_slice %430 {offsets = [0, 0], sizes = [1, 16], strides = [1, 1]} : vector<1x32xf32> to vector<1x16xf32>
    %531 = vector.extract_strided_slice %401 {offsets = [0, 16], sizes = [1, 16], strides = [1, 1]} : vector<1x32xf32> to vector<1x16xf32>
    %532 = tpu.concatenate %530, %531 in 1 : vector<1x16xf32>, vector<1x16xf32> -> vector<1x32xf32>
    %533 = vector.extract_strided_slice %459 {offsets = [0, 0], sizes = [1, 16], strides = [1, 1]} : vector<1x32xf32> to vector<1x16xf32>
    %534 = vector.extract_strided_slice %372 {offsets = [0, 16], sizes = [1, 16], strides = [1, 1]} : vector<1x32xf32> to vector<1x16xf32>
    %535 = tpu.concatenate %533, %534 in 1 : vector<1x16xf32>, vector<1x16xf32> -> vector<1x32xf32>
    %536 = vector.extract_strided_slice %488 {offsets = [0, 0], sizes = [1, 16], strides = [1, 1]} : vector<1x32xf32> to vector<1x16xf32>
    %537 = vector.extract_strided_slice %343 {offsets = [0, 16], sizes = [1, 16], strides = [1, 1]} : vector<1x32xf32> to vector<1x16xf32>
    %538 = tpu.concatenate %536, %537 in 1 : vector<1x16xf32>, vector<1x16xf32> -> vector<1x32xf32>
    %539 = vector.extract_strided_slice %517 {offsets = [0, 0], sizes = [1, 16], strides = [1, 1]} : vector<1x32xf32> to vector<1x16xf32>
    %540 = vector.extract_strided_slice %314 {offsets = [0, 16], sizes = [1, 16], strides = [1, 1]} : vector<1x32xf32> to vector<1x16xf32>
    %541 = tpu.concatenate %539, %540 in 1 : vector<1x16xf32>, vector<1x16xf32> -> vector<1x32xf32>
    %542 = tpu.concatenate %520, %523, %526, %529, %532, %535, %538, %541 in 0 : vector<1x32xf32>, vector<1x32xf32>, vector<1x32xf32>, vector<1x32xf32>, vector<1x32xf32>, vector<1x32xf32>, vector<1x32xf32>, vector<1x32xf32> -> vector<8x32xf32>
    %543 = arith.truncf %542 : vector<8x32xf32> to vector<8x32xbf16>
    %c0_94 = arith.constant 0 : index
    %c0_95 = arith.constant 0 : index
    %544 = vector.load %arg10[%c0_94, %c0_95] : memref<32x128xbf16, #tpu.memory_space<vmem>>, vector<32x128xbf16>
    %cst_96 = arith.constant dense<0.000000e+00> : vector<8x128xf32>
    %545 = tpu.matmul %543, %544, %cst_96 {dimension_numbers = #tpu.dot_dimension_numbers<[1], [0], [0], [1], [0, 0, 1, 1], [], []>} : vector<8x32xbf16>, vector<32x128xbf16>, vector<8x128xf32> -> vector<8x128xf32>
    %c0_97 = arith.constant 0 : index
    %c0_98 = arith.constant 0 : index
    %546 = vector.load %arg12[%c0_97, %c0_98] : memref<1x128xf32, #tpu.memory_space<vmem>>, vector<1x128xf32>
    %547 = vector.broadcast %546 : vector<1x128xf32> to vector<8x128xf32>
    %548 = arith.addf %545, %547 : vector<8x128xf32>
    %c0_99 = arith.constant 0 : index
    %c0_100 = arith.constant 0 : index
    %549 = vector.load %arg11[%c0_99, %c0_100] : memref<32x128xbf16, #tpu.memory_space<vmem>>, vector<32x128xbf16>
    %cst_101 = arith.constant 0.000000e+00 : f32
    %550 = vector.broadcast %cst_101 : f32 to vector<1x32xf32>
    %cst_102 = arith.constant 0.000000e+00 : f32
    %551 = vector.broadcast %cst_102 : f32 to vector<1x32xf32>
    %552 = vector.extract_strided_slice %548 {offsets = [0, 0], sizes = [1, 128], strides = [1, 1]} : vector<8x128xf32> to vector<1x128xf32>
    %553 = arith.truncf %550 : vector<1x32xf32> to vector<1x32xbf16>
    %cst_103 = arith.constant dense<0.000000e+00> : vector<1x128xf32>
    %554 = tpu.matmul %553, %549, %cst_103 {dimension_numbers = #tpu.dot_dimension_numbers<[1], [0], [0], [1], [0, 0, 1, 1], [], []>} : vector<1x32xbf16>, vector<32x128xbf16>, vector<1x128xf32> -> vector<1x128xf32>
    %555 = arith.addf %552, %554 : vector<1x128xf32>
    %556 = vector.extract_strided_slice %555 {offsets = [0, 0], sizes = [1, 32], strides = [1, 1]} : vector<1x128xf32> to vector<1x32xf32>
    %557 = arith.negf %556 : vector<1x32xf32>
    %558 = math.exp %557 : vector<1x32xf32>
    %cst_104 = arith.constant 1.000000e+00 : f32
    %559 = vector.broadcast %cst_104 : f32 to vector<1x32xf32>
    %560 = arith.addf %559, %558 : vector<1x32xf32>
    %561 = arith.divf %559, %560 : vector<1x32xf32>
    %562 = vector.extract_strided_slice %555 {offsets = [0, 32], sizes = [1, 32], strides = [1, 1]} : vector<1x128xf32> to vector<1x32xf32>
    %563 = arith.negf %562 : vector<1x32xf32>
    %564 = math.exp %563 : vector<1x32xf32>
    %cst_105 = arith.constant 1.000000e+00 : f32
    %565 = vector.broadcast %cst_105 : f32 to vector<1x32xf32>
    %566 = arith.addf %565, %564 : vector<1x32xf32>
    %567 = arith.divf %565, %566 : vector<1x32xf32>
    %568 = vector.extract_strided_slice %555 {offsets = [0, 64], sizes = [1, 32], strides = [1, 1]} : vector<1x128xf32> to vector<1x32xf32>
    %569 = math.tanh %568 : vector<1x32xf32>
    %570 = vector.extract_strided_slice %555 {offsets = [0, 96], sizes = [1, 32], strides = [1, 1]} : vector<1x128xf32> to vector<1x32xf32>
    %571 = arith.negf %570 : vector<1x32xf32>
    %572 = math.exp %571 : vector<1x32xf32>
    %cst_106 = arith.constant 1.000000e+00 : f32
    %573 = vector.broadcast %cst_106 : f32 to vector<1x32xf32>
    %574 = arith.addf %573, %572 : vector<1x32xf32>
    %575 = arith.divf %573, %574 : vector<1x32xf32>
    %576 = arith.mulf %567, %551 : vector<1x32xf32>
    %577 = arith.mulf %561, %569 : vector<1x32xf32>
    %578 = arith.addf %576, %577 : vector<1x32xf32>
    %579 = math.tanh %578 : vector<1x32xf32>
    %580 = arith.mulf %575, %579 : vector<1x32xf32>
    %581 = vector.extract_strided_slice %548 {offsets = [1, 0], sizes = [1, 128], strides = [1, 1]} : vector<8x128xf32> to vector<1x128xf32>
    %582 = arith.truncf %580 : vector<1x32xf32> to vector<1x32xbf16>
    %cst_107 = arith.constant dense<0.000000e+00> : vector<1x128xf32>
    %583 = tpu.matmul %582, %549, %cst_107 {dimension_numbers = #tpu.dot_dimension_numbers<[1], [0], [0], [1], [0, 0, 1, 1], [], []>} : vector<1x32xbf16>, vector<32x128xbf16>, vector<1x128xf32> -> vector<1x128xf32>
    %584 = arith.addf %581, %583 : vector<1x128xf32>
    %585 = vector.extract_strided_slice %584 {offsets = [0, 0], sizes = [1, 32], strides = [1, 1]} : vector<1x128xf32> to vector<1x32xf32>
    %586 = arith.negf %585 : vector<1x32xf32>
    %587 = math.exp %586 : vector<1x32xf32>
    %cst_108 = arith.constant 1.000000e+00 : f32
    %588 = vector.broadcast %cst_108 : f32 to vector<1x32xf32>
    %589 = arith.addf %588, %587 : vector<1x32xf32>
    %590 = arith.divf %588, %589 : vector<1x32xf32>
    %591 = vector.extract_strided_slice %584 {offsets = [0, 32], sizes = [1, 32], strides = [1, 1]} : vector<1x128xf32> to vector<1x32xf32>
    %592 = arith.negf %591 : vector<1x32xf32>
    %593 = math.exp %592 : vector<1x32xf32>
    %cst_109 = arith.constant 1.000000e+00 : f32
    %594 = vector.broadcast %cst_109 : f32 to vector<1x32xf32>
    %595 = arith.addf %594, %593 : vector<1x32xf32>
    %596 = arith.divf %594, %595 : vector<1x32xf32>
    %597 = vector.extract_strided_slice %584 {offsets = [0, 64], sizes = [1, 32], strides = [1, 1]} : vector<1x128xf32> to vector<1x32xf32>
    %598 = math.tanh %597 : vector<1x32xf32>
    %599 = vector.extract_strided_slice %584 {offsets = [0, 96], sizes = [1, 32], strides = [1, 1]} : vector<1x128xf32> to vector<1x32xf32>
    %600 = arith.negf %599 : vector<1x32xf32>
    %601 = math.exp %600 : vector<1x32xf32>
    %cst_110 = arith.constant 1.000000e+00 : f32
    %602 = vector.broadcast %cst_110 : f32 to vector<1x32xf32>
    %603 = arith.addf %602, %601 : vector<1x32xf32>
    %604 = arith.divf %602, %603 : vector<1x32xf32>
    %605 = arith.mulf %596, %578 : vector<1x32xf32>
    %606 = arith.mulf %590, %598 : vector<1x32xf32>
    %607 = arith.addf %605, %606 : vector<1x32xf32>
    %608 = math.tanh %607 : vector<1x32xf32>
    %609 = arith.mulf %604, %608 : vector<1x32xf32>
    %610 = vector.extract_strided_slice %548 {offsets = [2, 0], sizes = [1, 128], strides = [1, 1]} : vector<8x128xf32> to vector<1x128xf32>
    %611 = arith.truncf %609 : vector<1x32xf32> to vector<1x32xbf16>
    %cst_111 = arith.constant dense<0.000000e+00> : vector<1x128xf32>
    %612 = tpu.matmul %611, %549, %cst_111 {dimension_numbers = #tpu.dot_dimension_numbers<[1], [0], [0], [1], [0, 0, 1, 1], [], []>} : vector<1x32xbf16>, vector<32x128xbf16>, vector<1x128xf32> -> vector<1x128xf32>
    %613 = arith.addf %610, %612 : vector<1x128xf32>
    %614 = vector.extract_strided_slice %613 {offsets = [0, 0], sizes = [1, 32], strides = [1, 1]} : vector<1x128xf32> to vector<1x32xf32>
    %615 = arith.negf %614 : vector<1x32xf32>
    %616 = math.exp %615 : vector<1x32xf32>
    %cst_112 = arith.constant 1.000000e+00 : f32
    %617 = vector.broadcast %cst_112 : f32 to vector<1x32xf32>
    %618 = arith.addf %617, %616 : vector<1x32xf32>
    %619 = arith.divf %617, %618 : vector<1x32xf32>
    %620 = vector.extract_strided_slice %613 {offsets = [0, 32], sizes = [1, 32], strides = [1, 1]} : vector<1x128xf32> to vector<1x32xf32>
    %621 = arith.negf %620 : vector<1x32xf32>
    %622 = math.exp %621 : vector<1x32xf32>
    %cst_113 = arith.constant 1.000000e+00 : f32
    %623 = vector.broadcast %cst_113 : f32 to vector<1x32xf32>
    %624 = arith.addf %623, %622 : vector<1x32xf32>
    %625 = arith.divf %623, %624 : vector<1x32xf32>
    %626 = vector.extract_strided_slice %613 {offsets = [0, 64], sizes = [1, 32], strides = [1, 1]} : vector<1x128xf32> to vector<1x32xf32>
    %627 = math.tanh %626 : vector<1x32xf32>
    %628 = vector.extract_strided_slice %613 {offsets = [0, 96], sizes = [1, 32], strides = [1, 1]} : vector<1x128xf32> to vector<1x32xf32>
    %629 = arith.negf %628 : vector<1x32xf32>
    %630 = math.exp %629 : vector<1x32xf32>
    %cst_114 = arith.constant 1.000000e+00 : f32
    %631 = vector.broadcast %cst_114 : f32 to vector<1x32xf32>
    %632 = arith.addf %631, %630 : vector<1x32xf32>
    %633 = arith.divf %631, %632 : vector<1x32xf32>
    %634 = arith.mulf %625, %607 : vector<1x32xf32>
    %635 = arith.mulf %619, %627 : vector<1x32xf32>
    %636 = arith.addf %634, %635 : vector<1x32xf32>
    %637 = math.tanh %636 : vector<1x32xf32>
    %638 = arith.mulf %633, %637 : vector<1x32xf32>
    %639 = vector.extract_strided_slice %548 {offsets = [3, 0], sizes = [1, 128], strides = [1, 1]} : vector<8x128xf32> to vector<1x128xf32>
    %640 = arith.truncf %638 : vector<1x32xf32> to vector<1x32xbf16>
    %cst_115 = arith.constant dense<0.000000e+00> : vector<1x128xf32>
    %641 = tpu.matmul %640, %549, %cst_115 {dimension_numbers = #tpu.dot_dimension_numbers<[1], [0], [0], [1], [0, 0, 1, 1], [], []>} : vector<1x32xbf16>, vector<32x128xbf16>, vector<1x128xf32> -> vector<1x128xf32>
    %642 = arith.addf %639, %641 : vector<1x128xf32>
    %643 = vector.extract_strided_slice %642 {offsets = [0, 0], sizes = [1, 32], strides = [1, 1]} : vector<1x128xf32> to vector<1x32xf32>
    %644 = arith.negf %643 : vector<1x32xf32>
    %645 = math.exp %644 : vector<1x32xf32>
    %cst_116 = arith.constant 1.000000e+00 : f32
    %646 = vector.broadcast %cst_116 : f32 to vector<1x32xf32>
    %647 = arith.addf %646, %645 : vector<1x32xf32>
    %648 = arith.divf %646, %647 : vector<1x32xf32>
    %649 = vector.extract_strided_slice %642 {offsets = [0, 32], sizes = [1, 32], strides = [1, 1]} : vector<1x128xf32> to vector<1x32xf32>
    %650 = arith.negf %649 : vector<1x32xf32>
    %651 = math.exp %650 : vector<1x32xf32>
    %cst_117 = arith.constant 1.000000e+00 : f32
    %652 = vector.broadcast %cst_117 : f32 to vector<1x32xf32>
    %653 = arith.addf %652, %651 : vector<1x32xf32>
    %654 = arith.divf %652, %653 : vector<1x32xf32>
    %655 = vector.extract_strided_slice %642 {offsets = [0, 64], sizes = [1, 32], strides = [1, 1]} : vector<1x128xf32> to vector<1x32xf32>
    %656 = math.tanh %655 : vector<1x32xf32>
    %657 = vector.extract_strided_slice %642 {offsets = [0, 96], sizes = [1, 32], strides = [1, 1]} : vector<1x128xf32> to vector<1x32xf32>
    %658 = arith.negf %657 : vector<1x32xf32>
    %659 = math.exp %658 : vector<1x32xf32>
    %cst_118 = arith.constant 1.000000e+00 : f32
    %660 = vector.broadcast %cst_118 : f32 to vector<1x32xf32>
    %661 = arith.addf %660, %659 : vector<1x32xf32>
    %662 = arith.divf %660, %661 : vector<1x32xf32>
    %663 = arith.mulf %654, %636 : vector<1x32xf32>
    %664 = arith.mulf %648, %656 : vector<1x32xf32>
    %665 = arith.addf %663, %664 : vector<1x32xf32>
    %666 = math.tanh %665 : vector<1x32xf32>
    %667 = arith.mulf %662, %666 : vector<1x32xf32>
    %668 = vector.extract_strided_slice %548 {offsets = [4, 0], sizes = [1, 128], strides = [1, 1]} : vector<8x128xf32> to vector<1x128xf32>
    %669 = arith.truncf %667 : vector<1x32xf32> to vector<1x32xbf16>
    %cst_119 = arith.constant dense<0.000000e+00> : vector<1x128xf32>
    %670 = tpu.matmul %669, %549, %cst_119 {dimension_numbers = #tpu.dot_dimension_numbers<[1], [0], [0], [1], [0, 0, 1, 1], [], []>} : vector<1x32xbf16>, vector<32x128xbf16>, vector<1x128xf32> -> vector<1x128xf32>
    %671 = arith.addf %668, %670 : vector<1x128xf32>
    %672 = vector.extract_strided_slice %671 {offsets = [0, 0], sizes = [1, 32], strides = [1, 1]} : vector<1x128xf32> to vector<1x32xf32>
    %673 = arith.negf %672 : vector<1x32xf32>
    %674 = math.exp %673 : vector<1x32xf32>
    %cst_120 = arith.constant 1.000000e+00 : f32
    %675 = vector.broadcast %cst_120 : f32 to vector<1x32xf32>
    %676 = arith.addf %675, %674 : vector<1x32xf32>
    %677 = arith.divf %675, %676 : vector<1x32xf32>
    %678 = vector.extract_strided_slice %671 {offsets = [0, 32], sizes = [1, 32], strides = [1, 1]} : vector<1x128xf32> to vector<1x32xf32>
    %679 = arith.negf %678 : vector<1x32xf32>
    %680 = math.exp %679 : vector<1x32xf32>
    %cst_121 = arith.constant 1.000000e+00 : f32
    %681 = vector.broadcast %cst_121 : f32 to vector<1x32xf32>
    %682 = arith.addf %681, %680 : vector<1x32xf32>
    %683 = arith.divf %681, %682 : vector<1x32xf32>
    %684 = vector.extract_strided_slice %671 {offsets = [0, 64], sizes = [1, 32], strides = [1, 1]} : vector<1x128xf32> to vector<1x32xf32>
    %685 = math.tanh %684 : vector<1x32xf32>
    %686 = vector.extract_strided_slice %671 {offsets = [0, 96], sizes = [1, 32], strides = [1, 1]} : vector<1x128xf32> to vector<1x32xf32>
    %687 = arith.negf %686 : vector<1x32xf32>
    %688 = math.exp %687 : vector<1x32xf32>
    %cst_122 = arith.constant 1.000000e+00 : f32
    %689 = vector.broadcast %cst_122 : f32 to vector<1x32xf32>
    %690 = arith.addf %689, %688 : vector<1x32xf32>
    %691 = arith.divf %689, %690 : vector<1x32xf32>
    %692 = arith.mulf %683, %665 : vector<1x32xf32>
    %693 = arith.mulf %677, %685 : vector<1x32xf32>
    %694 = arith.addf %692, %693 : vector<1x32xf32>
    %695 = math.tanh %694 : vector<1x32xf32>
    %696 = arith.mulf %691, %695 : vector<1x32xf32>
    %697 = vector.extract_strided_slice %548 {offsets = [5, 0], sizes = [1, 128], strides = [1, 1]} : vector<8x128xf32> to vector<1x128xf32>
    %698 = arith.truncf %696 : vector<1x32xf32> to vector<1x32xbf16>
    %cst_123 = arith.constant dense<0.000000e+00> : vector<1x128xf32>
    %699 = tpu.matmul %698, %549, %cst_123 {dimension_numbers = #tpu.dot_dimension_numbers<[1], [0], [0], [1], [0, 0, 1, 1], [], []>} : vector<1x32xbf16>, vector<32x128xbf16>, vector<1x128xf32> -> vector<1x128xf32>
    %700 = arith.addf %697, %699 : vector<1x128xf32>
    %701 = vector.extract_strided_slice %700 {offsets = [0, 0], sizes = [1, 32], strides = [1, 1]} : vector<1x128xf32> to vector<1x32xf32>
    %702 = arith.negf %701 : vector<1x32xf32>
    %703 = math.exp %702 : vector<1x32xf32>
    %cst_124 = arith.constant 1.000000e+00 : f32
    %704 = vector.broadcast %cst_124 : f32 to vector<1x32xf32>
    %705 = arith.addf %704, %703 : vector<1x32xf32>
    %706 = arith.divf %704, %705 : vector<1x32xf32>
    %707 = vector.extract_strided_slice %700 {offsets = [0, 32], sizes = [1, 32], strides = [1, 1]} : vector<1x128xf32> to vector<1x32xf32>
    %708 = arith.negf %707 : vector<1x32xf32>
    %709 = math.exp %708 : vector<1x32xf32>
    %cst_125 = arith.constant 1.000000e+00 : f32
    %710 = vector.broadcast %cst_125 : f32 to vector<1x32xf32>
    %711 = arith.addf %710, %709 : vector<1x32xf32>
    %712 = arith.divf %710, %711 : vector<1x32xf32>
    %713 = vector.extract_strided_slice %700 {offsets = [0, 64], sizes = [1, 32], strides = [1, 1]} : vector<1x128xf32> to vector<1x32xf32>
    %714 = math.tanh %713 : vector<1x32xf32>
    %715 = vector.extract_strided_slice %700 {offsets = [0, 96], sizes = [1, 32], strides = [1, 1]} : vector<1x128xf32> to vector<1x32xf32>
    %716 = arith.negf %715 : vector<1x32xf32>
    %717 = math.exp %716 : vector<1x32xf32>
    %cst_126 = arith.constant 1.000000e+00 : f32
    %718 = vector.broadcast %cst_126 : f32 to vector<1x32xf32>
    %719 = arith.addf %718, %717 : vector<1x32xf32>
    %720 = arith.divf %718, %719 : vector<1x32xf32>
    %721 = arith.mulf %712, %694 : vector<1x32xf32>
    %722 = arith.mulf %706, %714 : vector<1x32xf32>
    %723 = arith.addf %721, %722 : vector<1x32xf32>
    %724 = math.tanh %723 : vector<1x32xf32>
    %725 = arith.mulf %720, %724 : vector<1x32xf32>
    %726 = vector.extract_strided_slice %548 {offsets = [6, 0], sizes = [1, 128], strides = [1, 1]} : vector<8x128xf32> to vector<1x128xf32>
    %727 = arith.truncf %725 : vector<1x32xf32> to vector<1x32xbf16>
    %cst_127 = arith.constant dense<0.000000e+00> : vector<1x128xf32>
    %728 = tpu.matmul %727, %549, %cst_127 {dimension_numbers = #tpu.dot_dimension_numbers<[1], [0], [0], [1], [0, 0, 1, 1], [], []>} : vector<1x32xbf16>, vector<32x128xbf16>, vector<1x128xf32> -> vector<1x128xf32>
    %729 = arith.addf %726, %728 : vector<1x128xf32>
    %730 = vector.extract_strided_slice %729 {offsets = [0, 0], sizes = [1, 32], strides = [1, 1]} : vector<1x128xf32> to vector<1x32xf32>
    %731 = arith.negf %730 : vector<1x32xf32>
    %732 = math.exp %731 : vector<1x32xf32>
    %cst_128 = arith.constant 1.000000e+00 : f32
    %733 = vector.broadcast %cst_128 : f32 to vector<1x32xf32>
    %734 = arith.addf %733, %732 : vector<1x32xf32>
    %735 = arith.divf %733, %734 : vector<1x32xf32>
    %736 = vector.extract_strided_slice %729 {offsets = [0, 32], sizes = [1, 32], strides = [1, 1]} : vector<1x128xf32> to vector<1x32xf32>
    %737 = arith.negf %736 : vector<1x32xf32>
    %738 = math.exp %737 : vector<1x32xf32>
    %cst_129 = arith.constant 1.000000e+00 : f32
    %739 = vector.broadcast %cst_129 : f32 to vector<1x32xf32>
    %740 = arith.addf %739, %738 : vector<1x32xf32>
    %741 = arith.divf %739, %740 : vector<1x32xf32>
    %742 = vector.extract_strided_slice %729 {offsets = [0, 64], sizes = [1, 32], strides = [1, 1]} : vector<1x128xf32> to vector<1x32xf32>
    %743 = math.tanh %742 : vector<1x32xf32>
    %744 = vector.extract_strided_slice %729 {offsets = [0, 96], sizes = [1, 32], strides = [1, 1]} : vector<1x128xf32> to vector<1x32xf32>
    %745 = arith.negf %744 : vector<1x32xf32>
    %746 = math.exp %745 : vector<1x32xf32>
    %cst_130 = arith.constant 1.000000e+00 : f32
    %747 = vector.broadcast %cst_130 : f32 to vector<1x32xf32>
    %748 = arith.addf %747, %746 : vector<1x32xf32>
    %749 = arith.divf %747, %748 : vector<1x32xf32>
    %750 = arith.mulf %741, %723 : vector<1x32xf32>
    %751 = arith.mulf %735, %743 : vector<1x32xf32>
    %752 = arith.addf %750, %751 : vector<1x32xf32>
    %753 = math.tanh %752 : vector<1x32xf32>
    %754 = arith.mulf %749, %753 : vector<1x32xf32>
    %755 = vector.extract_strided_slice %548 {offsets = [7, 0], sizes = [1, 128], strides = [1, 1]} : vector<8x128xf32> to vector<1x128xf32>
    %756 = arith.truncf %754 : vector<1x32xf32> to vector<1x32xbf16>
    %cst_131 = arith.constant dense<0.000000e+00> : vector<1x128xf32>
    %757 = tpu.matmul %756, %549, %cst_131 {dimension_numbers = #tpu.dot_dimension_numbers<[1], [0], [0], [1], [0, 0, 1, 1], [], []>} : vector<1x32xbf16>, vector<32x128xbf16>, vector<1x128xf32> -> vector<1x128xf32>
    %758 = arith.addf %755, %757 : vector<1x128xf32>
    %759 = vector.extract_strided_slice %758 {offsets = [0, 0], sizes = [1, 32], strides = [1, 1]} : vector<1x128xf32> to vector<1x32xf32>
    %760 = arith.negf %759 : vector<1x32xf32>
    %761 = math.exp %760 : vector<1x32xf32>
    %cst_132 = arith.constant 1.000000e+00 : f32
    %762 = vector.broadcast %cst_132 : f32 to vector<1x32xf32>
    %763 = arith.addf %762, %761 : vector<1x32xf32>
    %764 = arith.divf %762, %763 : vector<1x32xf32>
    %765 = vector.extract_strided_slice %758 {offsets = [0, 32], sizes = [1, 32], strides = [1, 1]} : vector<1x128xf32> to vector<1x32xf32>
    %766 = arith.negf %765 : vector<1x32xf32>
    %767 = math.exp %766 : vector<1x32xf32>
    %cst_133 = arith.constant 1.000000e+00 : f32
    %768 = vector.broadcast %cst_133 : f32 to vector<1x32xf32>
    %769 = arith.addf %768, %767 : vector<1x32xf32>
    %770 = arith.divf %768, %769 : vector<1x32xf32>
    %771 = vector.extract_strided_slice %758 {offsets = [0, 64], sizes = [1, 32], strides = [1, 1]} : vector<1x128xf32> to vector<1x32xf32>
    %772 = math.tanh %771 : vector<1x32xf32>
    %773 = vector.extract_strided_slice %758 {offsets = [0, 96], sizes = [1, 32], strides = [1, 1]} : vector<1x128xf32> to vector<1x32xf32>
    %774 = arith.negf %773 : vector<1x32xf32>
    %775 = math.exp %774 : vector<1x32xf32>
    %cst_134 = arith.constant 1.000000e+00 : f32
    %776 = vector.broadcast %cst_134 : f32 to vector<1x32xf32>
    %777 = arith.addf %776, %775 : vector<1x32xf32>
    %778 = arith.divf %776, %777 : vector<1x32xf32>
    %779 = arith.mulf %770, %752 : vector<1x32xf32>
    %780 = arith.mulf %764, %772 : vector<1x32xf32>
    %781 = arith.addf %779, %780 : vector<1x32xf32>
    %782 = math.tanh %781 : vector<1x32xf32>
    %783 = arith.mulf %778, %782 : vector<1x32xf32>
    %784 = tpu.concatenate %144, %263, %783 in 1 : vector<1x32xf32>, vector<1x32xf32>, vector<1x32xf32> -> vector<1x96xf32>
    %c0_135 = arith.constant 0 : index
    %c0_136 = arith.constant 0 : index
    %785 = vector.load %arg15[%c0_135, %c0_136] : memref<96x128xf32, #tpu.memory_space<vmem>>, vector<96x128xf32>
    %cst_137 = arith.constant dense<0.000000e+00> : vector<1x128xf32>
    %786 = tpu.matmul %784, %785, %cst_137 {dimension_numbers = #tpu.dot_dimension_numbers<[1], [0], [0], [1], [0, 0, 1, 1], [], []>} : vector<1x96xf32>, vector<96x128xf32>, vector<1x128xf32> -> vector<1x128xf32>
    %c0_138 = arith.constant 0 : index
    %c0_139 = arith.constant 0 : index
    %787 = vector.load %arg16[%c0_138, %c0_139] : memref<1x128xf32, #tpu.memory_space<vmem>>, vector<1x128xf32>
    %788 = arith.addf %786, %787 : vector<1x128xf32>
    %789 = arith.negf %788 : vector<1x128xf32>
    %790 = math.exp %789 : vector<1x128xf32>
    %cst_140 = arith.constant 1.000000e+00 : f32
    %791 = vector.broadcast %cst_140 : f32 to vector<1x128xf32>
    %792 = arith.addf %791, %790 : vector<1x128xf32>
    %793 = arith.divf %791, %792 : vector<1x128xf32>
    %c0_141 = arith.constant 0 : index
    %c0_142 = arith.constant 0 : index
    %c0_143 = arith.constant 0 : index
    %794 = vector.load %arg17[%c0_141, %c0_142, %c0_143] : memref<1x1x128xf32, #tpu.memory_space<vmem>>, vector<1x1x128xf32>
    %795 = vector.shape_cast %794 : vector<1x1x128xf32> to vector<1x128xf32>
    %796 = vector.shape_cast %793 : vector<1x128xf32> to vector<1x1x128xf32>
    tpu.vector_store %arg17[%c0_141, %c0_142, %c0_143], %796 {strides = array<i32>} : memref<1x1x128xf32, #tpu.memory_space<vmem>>, vector<1x1x128xf32>,
    return
  }
  func.func @transform_0(%arg0: i32, %arg1: memref<4x2xi32, #tpu.memory_space<smem>>, %arg2: memref<4x3xi32, #tpu.memory_space<smem>>) -> (i32, i32) {
    %c0_i32 = arith.constant 0 : i32
    %c0_i32_0 = arith.constant 0 : i32
    %c0_i32_1 = arith.constant 0 : i32
    return %c0_i32, %c0_i32_0 : i32, i32
  }
  func.func @transform_1(%arg0: i32, %arg1: memref<4x2xi32, #tpu.memory_space<smem>>, %arg2: memref<4x3xi32, #tpu.memory_space<smem>>) -> (i32, i32) {
    %c0_i32 = arith.constant 0 : i32
    %c0_i32_0 = arith.constant 0 : i32
    %c0_i32_1 = arith.constant 0 : i32
    return %c0_i32, %c0_i32_0 : i32, i32
  }
  func.func @transform_2(%arg0: i32, %arg1: memref<4x2xi32, #tpu.memory_space<smem>>, %arg2: memref<4x3xi32, #tpu.memory_space<smem>>) -> (i32, i32) {
    %c0_i32 = arith.constant 0 : i32
    %c0_i32_0 = arith.constant 0 : i32
    %c0_i32_1 = arith.constant 0 : i32
    return %c0_i32, %c0_i32_0 : i32, i32
  }
  func.func @transform_3(%arg0: i32, %arg1: memref<4x2xi32, #tpu.memory_space<smem>>, %arg2: memref<4x3xi32, #tpu.memory_space<smem>>) -> (i32, i32) {
    %c0_i32 = arith.constant 0 : i32
    %c0_i32_0 = arith.constant 0 : i32
    %c0_i32_1 = arith.constant 0 : i32
    return %c0_i32, %c0_i32_0 : i32, i32
  }
  func.func @transform_4(%arg0: i32, %arg1: memref<4x2xi32, #tpu.memory_space<smem>>, %arg2: memref<4x3xi32, #tpu.memory_space<smem>>) -> (i32, i32) {
    %c0_i32 = arith.constant 0 : i32
    %c0_i32_0 = arith.constant 0 : i32
    %c0_i32_1 = arith.constant 0 : i32
    return %c0_i32, %c0_i32_0 : i32, i32
  }
  func.func @transform_5(%arg0: i32, %arg1: memref<4x2xi32, #tpu.memory_space<smem>>, %arg2: memref<4x3xi32, #tpu.memory_space<smem>>) -> (i32, i32) {
    %c0_i32 = arith.constant 0 : i32
    %c0_i32_0 = arith.constant 0 : i32
    %c0_i32_1 = arith.constant 0 : i32
    return %c0_i32, %c0_i32_0 : i32, i32
  }
  func.func @transform_6(%arg0: i32, %arg1: memref<4x2xi32, #tpu.memory_space<smem>>, %arg2: memref<4x3xi32, #tpu.memory_space<smem>>) -> (i32, i32) {
    %c0_i32 = arith.constant 0 : i32
    %c0_i32_0 = arith.constant 0 : i32
    %c0_i32_1 = arith.constant 0 : i32
    return %c0_i32, %c0_i32_0 : i32, i32
  }
  func.func @transform_7(%arg0: i32, %arg1: memref<4x2xi32, #tpu.memory_space<smem>>, %arg2: memref<4x3xi32, #tpu.memory_space<smem>>) -> (i32, i32) {
    %c0_i32 = arith.constant 0 : i32
    %c0_i32_0 = arith.constant 0 : i32
    %c0_i32_1 = arith.constant 0 : i32
    return %c0_i32, %c0_i32_0 : i32, i32
  }
  func.func @transform_8(%arg0: i32, %arg1: memref<4x2xi32, #tpu.memory_space<smem>>, %arg2: memref<4x3xi32, #tpu.memory_space<smem>>) -> (i32, i32) {
    %c0_i32 = arith.constant 0 : i32
    %c0_i32_0 = arith.constant 0 : i32
    %c0_i32_1 = arith.constant 0 : i32
    return %c0_i32, %c0_i32_0 : i32, i32
  }
  func.func @transform_9(%arg0: i32, %arg1: memref<4x2xi32, #tpu.memory_space<smem>>, %arg2: memref<4x3xi32, #tpu.memory_space<smem>>) -> (i32, i32) {
    %c0_i32 = arith.constant 0 : i32
    %c0_i32_0 = arith.constant 0 : i32
    %c0_i32_1 = arith.constant 0 : i32
    return %c0_i32, %c0_i32_0 : i32, i32
  }
  func.func @transform_10(%arg0: i32, %arg1: memref<4x2xi32, #tpu.memory_space<smem>>, %arg2: memref<4x3xi32, #tpu.memory_space<smem>>) -> (i32, i32) {
    %c0_i32 = arith.constant 0 : i32
    %c0_i32_0 = arith.constant 0 : i32
    %c0_i32_1 = arith.constant 0 : i32
    return %c0_i32, %c0_i32_0 : i32, i32
  }
  func.func @transform_11(%arg0: i32, %arg1: memref<4x2xi32, #tpu.memory_space<smem>>, %arg2: memref<4x3xi32, #tpu.memory_space<smem>>) -> (i32, i32) {
    %c0_i32 = arith.constant 0 : i32
    %c0_i32_0 = arith.constant 0 : i32
    %c0_i32_1 = arith.constant 0 : i32
    return %c0_i32, %c0_i32_0 : i32, i32
  }
  func.func @transform_12(%arg0: i32, %arg1: memref<4x2xi32, #tpu.memory_space<smem>>, %arg2: memref<4x3xi32, #tpu.memory_space<smem>>) -> (i32, i32) {
    %c0_i32 = arith.constant 0 : i32
    %c0_i32_0 = arith.constant 0 : i32
    %c0_i32_1 = arith.constant 0 : i32
    return %c0_i32, %c0_i32_0 : i32, i32
  }
  func.func @transform_13(%arg0: i32, %arg1: memref<4x2xi32, #tpu.memory_space<smem>>, %arg2: memref<4x3xi32, #tpu.memory_space<smem>>) -> (i32, i32) {
    %c0_i32 = arith.constant 0 : i32
    %c0_i32_0 = arith.constant 0 : i32
    %c0_i32_1 = arith.constant 0 : i32
    return %c0_i32, %c0_i32_0 : i32, i32
  }
  func.func @transform_14(%arg0: i32, %arg1: memref<4x2xi32, #tpu.memory_space<smem>>, %arg2: memref<4x3xi32, #tpu.memory_space<smem>>) -> (i32, i32, i32) {
    %c0_i32 = arith.constant 0 : i32
    %c0_i32_0 = arith.constant 0 : i32
    %c0_i32_1 = arith.constant 0 : i32
    return %arg0, %c0_i32, %c0_i32_0 : i32, i32, i32
  }
}

</mosaic_0001>

<bundles_post_ra>
// kernel: _lambda_.1
= control target key start
LH: loop header
LB: loop body
LE: loop exit
PB: predicated region body
PF: predicated region fallthrough
CT: control target
= control target key end

     0   :  { %s5055_s0 = inlined_call_operand.vmem [shape: s32[4,2], index: 0, kind: input, shape index: {}]   ;;  %s5056_s2 = inlined_call_operand.vmem [shape: f32[8,80], index: 2, kind: input, shape index: {}]   ;;  %s5057_s3 = inlined_call_operand.vmem [shape: f32[8,80], index: 3, kind: input, shape index: {}]   ;;  %s5058_s4 = inlined_call_operand.vmem [shape: bf16[88,768], index: 4, kind: input, shape index: {}]   ;;  %s5059_s5 = inlined_call_operand.vmem [shape: f32[1,768], index: 5, kind: input, shape index: {}]   ;;  %s5060_s6 = inlined_call_operand.vmem [shape: bf16[32,128], index: 6, kind: input, shape index: {}]   ;;  %s5061_s7 = inlined_call_operand.vmem [shape: bf16[32,128], index: 7, kind: input, shape index: {}]   ;;  %s5062_s8 = inlined_call_operand.vmem [shape: bf16[32,128], index: 8, kind: input, shape index: {}]   ;;  %s5063_s9 = inlined_call_operand.vmem [shape: bf16[32,128], index: 9, kind: input, shape index: {}]   ;;  %s5064_s10 = inlined_call_operand.vmem [shape: bf16[32,128], index: 10, kind: input, shape index: {}]   ;;  %s5065_s11 = inlined_call_operand.vmem [shape: f32[1,128], index: 11, kind: input, shape index: {}]   ;;  %s5066_s12 = inlined_call_operand.vmem [shape: bf16[80,64], index: 12, kind: input, shape index: {}]   ;;  %s5067_s13 = inlined_call_operand.vmem [shape: f32[1,8], index: 13, kind: input, shape index: {}]   ;;  %s5068_s14 = inlined_call_operand.vmem [shape: f32[96,128], index: 14, kind: input, shape index: {}]   ;;  %s5069_s15 = inlined_call_operand.vmem [shape: f32[1,128], index: 15, kind: input, shape index: {}]   ;;  %s5070_s16 = inlined_call_operand.hbm [shape: f32[4,1,128], index: 16, kind: output, shape index: {}]   ;;  %s5071_s1 = inlined_call_operand.vmem [shape: s32[4,3], index: 1, kind: input, shape index: {}]  }
   0x1   :  { %5087 = sst [smem:[#allocation16_spill]] %s5055_s0  ;;  %s25_s26 = sshll.u32 %s5071_s1, 4  ;;  %s26_s26 = int_to_ptr.vmem [resolvable:$true] %s25_s26 }
   0x2   :  { %5088 = sst [smem:[#allocation17_spill]] %s5056_s2  ;;  %s5098_s23 = sld [smem:[#allocation16_spill]] }
   0x3   :  { %5089 = sst [smem:[#allocation18_spill]] %s5057_s3 }
   0x4   :  { %5090 = sst [smem:[#allocation19_spill]] %s5058_s4 }
   0x5   :  { %5091 = sst [smem:[#allocation20_spill]] %s5059_s5 }
   0x6   :  { %5092 = sst [smem:[#allocation21_spill]] %s5060_s6 }
   0x7   :  { %5093 = sst [smem:[#allocation22_spill]] %s5061_s7 }
   0x8   :  { %5094 = sst [smem:[#allocation23_spill]] %s5065_s11  ;;  %s21_s11 = sshll.u32 %s5098_s23, 4  ;;  %s22_s11 = int_to_ptr.vmem [resolvable:$true] %s21_s11 }
   0x9   :  { %5095 = sst [smem:[#allocation24_spill]] %s5066_s12  ;;  %s4024_s27 = scalar_lea.vmem %s22_s11, 64 }
   0xa   :  { %5096 = sst [smem:[#allocation25_spill]] %s5067_s13  ;;  %p4025_p0 = scmp.ne.s32.totalorder %s22_s11, %s4024_s27 }
   0xb   :  { %5097 = sst [smem:[#allocation26_spill]] %s5070_s16  ;;  %p4029_p1 = scmp.lt.s32.totalorder %s22_s11, %s22_s11 }
   0xc   :  { %p4030_p2 = scmp.lt.s32.totalorder %s4024_s27, %s4024_s27 }
   0xe   :  { %p4031_p3 = por %p4030_p2, %p4029_p1 }
  0x10   :  { %p4032_p4 = pnand %p4031_p3, %p4025_p0 }
  0x12   :  { %4035 = shalt.err (!%p4032_p4)  }
  0x13   :  { %s4114_s28 = smov [#allocation4]   ;;  %s4036_s29 = scalar_lea.vmem %s26_s26, 64 }
  0x14   :  { %24 = dma.vmem_to_smem %s22_s11, 64, %s4114_s28, [#allocation3] }
  0x15   :  { %p4037_p5 = scmp.ne.s32.totalorder %s26_s26, %s4036_s29  ;;  %p4041_p6 = scmp.lt.s32.totalorder %s26_s26, %s26_s26 }
  0x16   :  { %p4042_p7 = scmp.lt.s32.totalorder %s4036_s29, %s4036_s29 }
  0x18   :  { %p4043_p8 = por %p4042_p7, %p4041_p6 }
  0x1a   :  { %p4044_p9 = pnand %p4043_p8, %p4037_p5 }
  0x1c   :  { %4047 = shalt.err (!%p4044_p9)  }
  0x1d   :  { %s4115_s30 = smov [#allocation5]  }
  0x1e   :  { %28 = dma.vmem_to_smem %s26_s26, 64, %s4115_s30, [#allocation3] }
  0x1f   :  { %4092 = dma.done.wait [#allocation3], 128 }
  0x20   :  { %4093 = vsyncadd [#allocation3], 4294967168 }
  0x21   :  { %30 = sfence }
  0x22   :  { %31 = vsyncpa [#allocation7], 0 }
  0x23   :  { %33 = vsyncpa [#allocation7 + $0x1], 0  ;;  %s4227_s1 = smov 0   ;;  %s4229_s0 = smov 0  }
  0x24   :  { %s4231_s17 = smov 0   ;;  %s4233_s11 = smov 0  }
  0x25 LB: > { %5099 = sst [smem:[#allocation10_spill]] %s4100_s1  ;;  %s4248_s18 = sadd.s32 4294967295, %s4112_s11   ;;  %s4112_s11 = sphi %s4233_s11, %s5125_s11   ;;  %s4108_s17 = sphi %s4231_s17, %s5127_s17   ;;  %s4104_s0 = sphi %s4229_s0, %s5129_s0   ;;  %s4100_s1 = sphi %s4227_s1, %s5128_s1  }
  0x26   : > { %5100 = sst [smem:[#allocation11_spill]] %s4108_s17  ;;  %s3253_s19 = sadd.s32 4294967294, %s4112_s11  }
  0x27   : > { %5101 = sst [smem:[#allocation12_spill]] %s4112_s11  ;;  %s4252_s20 = sadd.s32 1, %s4112_s11  }
  0x28   : > { %5102 = sst [smem:[#allocation13_spill]] %s4252_s20  ;;  %s340_s21 = sadd.s32 1, %s4108_s17 }
  0x29   : > { %s337_s22 = ssub.s32 %s4112_s11, %s4252_s20  ;;  %p350_p10 = scmp.ne.s32.totalorder %s4108_s17, %s4104_s0 }
  0x2a   : > { %p338_p11 = scmp.eq.s32.totalorder %s337_s22, 0  ;;  %p351_p12 = scmp.eq.s32.totalorder %s4248_s18, 3 }
  0x2b   : > { %p356_p13 = scmp.ne.s32.totalorder %s4104_s0, %s4100_s1  ;;  %p357_p0 = scmp.eq.s32.totalorder %s3253_s19, 3 }
  0x2c   : > { %s4263_s23 = scalar_select %p338_p11, %s4108_s17, %s340_s21  }
  0x2d   : > { %p4265_p1 = por %p351_p12, %p350_p10  ;;  %p4269_p2 = por %p357_p0, %p356_p13 }
  0x2e   : > { %5103 = sst [smem:[#allocation14_spill]] %s4263_s23  ;;  %p3255_p3 = scmp.ge.s32.totalorder %s4112_s11, 1 }
  0x2f   : > { %s5105_s25 = scalar_select %p4269_p2, 1, 0 }
  0x30   : > { %p417_p4 = scmp.lt.s32.totalorder %s4112_s11, 5 }
  0x31   : > { %5106 = sst [smem:[#allocation15_spill]] %s5105_s25 }
  0x32   : > { %p418_p5 = pnand %p3255_p3, %p417_p4 }
  0x33   : > { %s5107_s12 = sld [smem:[#allocation24_spill]] (!%p418_p5)  ;;  %v4116_v1 = vmov (!%p418_p5), 0.0   ;;  %vm4117_vm0 = vmmov (!%p418_p5), 0   ;;  %s5108_s13 = sld [smem:[#allocation25_spill]] (!%p418_p5)  ;;  %vm500_vm1 = vcmask (!%p418_p5), 654336   ;;  %vm864_vm2 = vcmask (!%p418_p5), 1043456  }
  0x34   : > { %421 = sbr.rel (%p418_p5) target bundleno = 13040 (0x32f0), region = 76  ;;  %3451 = vmatprep.subr.bf16.mxu0 (!%p418_p5), %v4116_v1  ;;  %3461 = vmatprep.mubr.msk.bf16.mxu0 (!%p418_p5), %vm4117_vm0, %v4116_v1  ;;  %s4118_s26 = smov (!%p418_p5), 8   ;;  %vm860_vm3 = vcmask (!%p418_p5), 719872   ;;  %vm1044_vm4 = vcmask (!%p418_p5), 1040384   ;;  %vm1312_vm5 = vcmask (!%p418_p5), 1041408   ;;  %vm1081_vm6 = vcmask (!%p418_p5), 130048  }
  0x35   : > { %s4119_s27 = smov (!%p418_p5), 24   ;;  %s5076_s30 = smov (!%p418_p5), 16   ;;  %vm1083_vm7 = vcmask (!%p418_p5), 261120   ;;  %vm1085_vm8 = vcmask (!%p418_p5), 392192   ;;  %vm1087_vm9 = vcmask (!%p418_p5), 523264   ;;  %vm1090_vm10 = vcmask (!%p418_p5), 785408  }
  0x36   : > { %s5072_s19 = smov (!%p418_p5), 32   ;;  %s5109_s3 = sld [smem:[#allocation18_spill]] (!%p418_p5)  ;;  %vm1092_vm11 = vcmask (!%p418_p5), 916480   ;;  %vm1611_vm12 = vcmask (!%p418_p5), 1042432   ;;  %vm1614_vm13 = vcmask (!%p418_p5), 1044480   ;;  %vm1616_vm14 = vcmask (!%p418_p5), 1045504  }
  0x37   : > { %s4122_s28 = smov (!%p418_p5), 40   ;;  %s5074_s29 = smov (!%p418_p5), 48   ;;  %vm1618_vm15 = vcmask (!%p418_p5), 1046528  }
  0x38   : > { %s4126_s21 = smov (!%p418_p5), 120   ;;  %s5110_s4 = sld [smem:[#allocation19_spill]] (!%p418_p5) }
  0x39   : > { %v3786_v0 = vld [vmem:[%s5107_s12] sm:$0xff] (!%p418_p5)   ;;  %v3787_v2 = vld [vmem:[%s5107_s12 + $0x8] sm:$0xff] (!%p418_p5)   ;;  %v3788_v3 = vld [vmem:[%s5107_s12 + $0x10] sm:$0xff] (!%p418_p5)   ;;  %s5112_s2 = sld [smem:[#allocation17_spill]] (!%p418_p5)  ;;  %s5113_s7 = sld [smem:[#allocation22_spill]] (!%p418_p5) }
  0x3a   : > { %3452 = vmatpush3.bf16.msra.mxu0 (!%p418_p5), %v3786_v0  ;;  %v4291_v4 = vld [vmem:[%s5108_s13] ss:$0 sm:$0xff] (!%p418_p5)  ;;  %v3789_v5 = vld [vmem:[%s5107_s12 + $0x18] sm:$0xff] (!%p418_p5)   ;;  %s5114_s6 = sld [smem:[#allocation21_spill]] (!%p418_p5)  ;;  %s5115_s5 = sld [smem:[#allocation20_spill]] (!%p418_p5) }
  0x3b   : > { %3453 = vmatprep.subr.bf16.mxu0 %v4116_v1  ;;  %553 = vrot.lane.b32.xlu0 %v4291_v4, %s4118_s26  ;;  %v3790_v6 = vld [vmem:[%s5107_s12 + $0x20] sm:$0xff]   ;;  %s5111_s26 = smov 80  }
  0x3c   : > { %573 = vrot.lane.b32.xlu1 %v4291_v4, %s4119_s27  ;;  %v458_v7 = vld [vmem:[%s5109_s3] sm:$0xff]  ;;  %s5078_s27 = smov 96  }
  0x3d   : > { %v459_v8 = vpack.c.bf16 %v458_v7, %v458_v7 }
  0x3e   : > { %3454 = vmatpush3.bf16.msra.mxu0 %v3787_v2  ;;  %v3791_v27 = vld [vmem:[%s5110_s4 + $0x4] ss:$24 sps:$4 sm:$0xff]   ;;  %v3793_v28 = vld [vmem:[%s5110_s4] ss:$24 sps:$4 sm:$0xff]   ;;  %v3797_v33 = vld [vmem:[%s5110_s4 + $0x34] ss:$24 sps:$4 sm:$0xff]  }
  0x3f   : > { %3455 = vmatprep.subr.bf16.mxu0 %v4116_v1  ;;  %563 = vrot.lane.b32.xlu0 %v4291_v4, %s5076_s30  ;;  %v3794_v31 = vld [vmem:[%s5110_s4 + $0x8] ss:$24 sps:$4 sm:$0xff]   ;;  %v3796_v32 = vld [vmem:[%s5110_s4 + $0xc] ss:$24 sps:$4 sm:$0xff]   ;;  %v3802_v35 = vld [vmem:[%s5110_s4 + $0x3c] ss:$24 sps:$4 sm:$0xff]  }
  0x40   : > { %583 = vrot.lane.b32.xlu1 %v4291_v4, %s5072_s19  ;;  %s4124_s19 = smov 56   ;;  %883 = vmatprep.subr.bf16.mxu1 %v3791_v27  ;;  %v3799_v36 = vld [vmem:[%s5110_s4 + $0x30] ss:$24 sps:$4 sm:$0xff]   ;;  %v3803_v41 = vld [vmem:[%s5110_s4 + $0x64] ss:$24 sps:$4 sm:$0xff]   ;;  %s4130_s30 = smov 88  }
  0x41   : > { %884 = vmatpush1.bf16.msra.mxu1 %v3793_v28  ;;  %v3800_v40 = vld [vmem:[%s5110_s4 + $0x38] ss:$24 sps:$4 sm:$0xff]   ;;  %v3808_v42 = vld [vmem:[%s5110_s4 + $0x6c] ss:$24 sps:$4 sm:$0xff]   ;;  %v3806_v45 = vld [vmem:[%s5110_s4 + $0x68] ss:$24 sps:$4 sm:$0xff]  }
  0x42   : > { %3456 = vmatpush3.bf16.msra.mxu0 %v3788_v3  ;;  %885 = vmatprep.subr.bf16.mxu1 %v3797_v33  ;;  %v3805_v43 = vld [vmem:[%s5110_s4 + $0x60] ss:$24 sps:$4 sm:$0xff]   ;;  %v3809_v46 = vld [vmem:[%s5110_s4 + $0x94] ss:$24 sps:$4 sm:$0xff]   ;;  %v3811_v48 = vld [vmem:[%s5110_s4 + $0x90] ss:$24 sps:$4 sm:$0xff]  }
  0x43   : > { %3457 = vmatprep.subr.bf16.mxu0 %v4116_v1  ;;  %593 = vrot.lane.b32.xlu0 %v4291_v4, %s4122_s28  ;;  %s4128_s28 = smov 104   ;;  %v3814_v47 = vld [vmem:[%s5110_s4 + $0x9c] ss:$24 sps:$4 sm:$0xff]   ;;  %v3812_v49 = vld [vmem:[%s5110_s4 + $0x98] ss:$24 sps:$4 sm:$0xff]  }
  0x44   : > { %603 = vrot.lane.b32.xlu1 %v4291_v4, %s5074_s29  ;;  %v3815_v50 = vld [vmem:[%s5110_s4 + $0xc4] ss:$24 sps:$4 sm:$0xff]   ;;  %v660_v52 = vld [vmem:[%s5110_s4 + $0xf0] sm:$0xff]  ;;  %v3817_v54 = vld [vmem:[%s5110_s4 + $0xc0] ss:$24 sps:$4 sm:$0xff]   ;;  %s3305_s29 = sshll.u32 %s4248_s18, 7 }
  0x45   : > { %886 = vmatpush1.bf16.msra.mxu1 %v3799_v36  ;;  %v3820_v51 = vld [vmem:[%s5110_s4 + $0xcc] ss:$24 sps:$4 sm:$0xff]   ;;  %v661_v53 = vld [vmem:[%s5110_s4 + $0xf8] sm:$0xff]  ;;  %v3818_v55 = vld [vmem:[%s5110_s4 + $0xc8] ss:$24 sps:$4 sm:$0xff]   ;;  %v3294_v56 = vcombine.high %v660_v52, %v660_v52  ;;  %v3293_v57 = vcombine.low %v660_v52, %v660_v52  ;;  %s1025_s3 = sadd.s32 1, %s3305_s29 }
  0x46   : > { %3458 = vmatpush3.bf16.msra.mxu0 %v3789_v5  ;;  %887 = vmatprep.subr.bf16.mxu1 %v3803_v41  ;;  %v3296_v58 = vcombine.high %v661_v53, %v661_v53  ;;  %v3295_v0 = vcombine.low %v661_v53, %v661_v53  ;;  %v3831_v27 = vld [vmem:[%s5110_s4 + $0x70] ss:$24 sps:$4 sm:$0xff]   ;;  %v3836_v28 = vld [vmem:[%s5110_s4 + $0xa4] ss:$24 sps:$4 sm:$0xff]   ;;  %s4506_s12 = sld [smem:[#allocation4 + %s3305_s29]] }
  0x47   : > { %3459 = vmatprep.subr.bf16.mxu0 %v4116_v1  ;;  %613 = vrot.lane.b32.xlu0 %v4291_v4, %s4124_s19  ;;  %s4125_s19 = smov 112   ;;  %v866_v59 = vsel %vm864_vm2, %v3293_v57, 0  ;;  %v3842_v36 = vld [vmem:[%s5114_s6] sm:$0xff]  }
  0x48   : > { %v872_v3 = vsel %vm864_vm2, %v3295_v0, 0 }
  0x49   : > { %888 = vmatpush1.bf16.msra.mxu1 %v3805_v43 }
  0x4a   : > { %3460 = vmatpush3.bf16.msra.mxu0 %v3790_v6  ;;  %889 = vmatprep.subr.bf16.mxu1 %v3809_v46  ;;  %v3827_v6 = vld [vmem:[%s5110_s4 + $0x14] ss:$24 sps:$4 sm:$0xff]  }
  0x4b   : > { %924 = vmatprep.subr.bf16.mxu0 %v3796_v32  ;;  %v3837_v32 = vld [vmem:[%s5110_s4 + $0xd0] ss:$24 sps:$4 sm:$0xff]  }
  0x4d   : > { %3462 = vmatmul.mubr.msk.bf16.vlgmr.msra.gmra.mrb[0].mxu0 %vm500_vm1, %v459_v8  ;;  %890 = vmatpush1.bf16.msra.mxu1 %v3811_v48 }
  0x4e   : > { %925 = vmatpush1.bf16.msra.mxu0 %v3794_v31  ;;  %891 = vmatprep.subr.bf16.mxu1 %v3815_v50  ;;  %v662_v31 = vld [vmem:[%s5110_s4 + $0x100] sm:$0xff] }
  0x4f   : > { %926 = vmatprep.subr.bf16.mxu0 %v3802_v35  ;;  %v3298_v33 = vcombine.high %v662_v31, %v662_v31 }
  0x51   : > { %892 = vmatpush1.bf16.msra.mxu1 %v3817_v54 }
  0x52   : > { %927 = vmatpush1.bf16.msra.mxu0 %v3800_v40  ;;  %3299 = vmatprep.subr.msk.bf16.mxu1 %vm864_vm2, %v3294_v56 }
  0x53   : > { %928 = vmatprep.subr.bf16.mxu0 %v3808_v42  ;;  %v663_v42 = vld [vmem:[%s5115_s5] sm:$0x3f] }
  0x55   : > { %894 = vmatpush1.bf16.msra.mxu1 %v866_v59 }
  0x56   : > { %929 = vmatpush1.bf16.msra.mxu0 %v3806_v45  ;;  %965 = vmatprep.subr.bf16.mxu1 %v3827_v6 }
  0x57   : > { %930 = vmatprep.subr.bf16.mxu0 %v3814_v47 }
  0x5a   : > { %931 = vmatpush1.bf16.msra.mxu0 %v3812_v49 }
  0x5b   : > { %932 = vmatprep.subr.bf16.mxu0 %v3820_v51 }
  0x5e   : > { %933 = vmatpush1.bf16.msra.mxu0 %v3818_v55 }
  0x5f   : > { %3301 = vmatprep.subr.msk.bf16.mxu0 %vm864_vm2, %v3296_v58 }
  0x62   : > { %935 = vmatpush1.bf16.msra.mxu0 %v872_v3 }
  0x63   : > { %3481 = vmatprep.subr.bf16.mxu0 %v4116_v1 }
  0xad   : > { %v554_v9 = vpop.permute.xlu0 %553 }
  0xae   : > { %v574_v10 = vpop.permute.xlu1 %573 }
  0xb1   : > { %v564_v11 = vpop.permute.xlu0 %563 }
  0xb2   : > { %v584_v12 = vpop.permute.xlu1 %583 }
  0xb5   : > { %v594_v17 = vpop.permute.xlu0 %593 }
  0xb6   : > { %v604_v24 = vpop.permute.xlu1 %603 }
  0xb9   : > { %v614_v34 = vpop.permute.xlu0 %613 }
 0x120   : > { %v4316_v13 = vpop.f32.mrb[0].mxu0 }
 0x121   : > { %v3463_v14 = vpop.f32.mrb[1].mxu0  ;;  %v566_v15 = vadd.f32 %v564_v11, %v4316_v13  ;;  %v556_v16 = vadd.f32 %v554_v9, %v4316_v13  ;;  %v586_v19 = vadd.f32 %v584_v12, %v4316_v13  ;;  %v576_v20 = vadd.f32 %v574_v10, %v4316_v13 }
 0x122   : > { %v541_v18 = vpop.f32.mrb[2].mxu0  ;;  %v606_v29 = vadd.f32 %v604_v24, %v4316_v13  ;;  %v596_v30 = vadd.f32 %v594_v17, %v4316_v13  ;;  %v616_v39 = vadd.f32 %v614_v34, %v4316_v13  ;;  %v551_v60 = vadd.f32 %v4291_v4, %v4316_v13  ;;  %v623_v17 = vld [vmem:[%s5112_s2] sm:$0xff] }
 0x123   : > { %v3464_v21 = vpop.f32.mrb[3].mxu0  ;;  %v567_v22 = vmax.f32 %v566_v15, 0.0  ;;  %v557_v23 = vmax.f32 %v556_v16, 0.0  ;;  %v587_v25 = vmax.f32 %v586_v19, 0.0  ;;  %v577_v26 = vmax.f32 %v576_v20, 0.0 }
 0x124   : > { %v607_v37 = vmax.f32 %v606_v29, 0.0  ;;  %v597_v38 = vmax.f32 %v596_v30, 0.0  ;;  %v617_v44 = vmax.f32 %v616_v39, 0.0  ;;  %v552_v61 = vmax.f32 %v551_v60, 0.0  ;;  %v3825_v20 = vld [vmem:[%s5110_s4 + $0x10] ss:$24 sps:$4 sm:$0xff]  }
 0x125   : > { %569 = vrot.lane.b32.xlu0 %v567_v22, %s4125_s19  ;;  %559 = vrot.lane.b32.xlu1 %v557_v23, %s4126_s21  ;;  %v4132_v9 = vmov 0   ;;  %v3830_v22 = vld [vmem:[%s5110_s4 + $0x44] ss:$24 sps:$4 sm:$0xff]   ;;  %v3828_v24 = vld [vmem:[%s5110_s4 + $0x40] ss:$24 sps:$4 sm:$0xff]   ;;  %v3297_v34 = vcombine.low %v662_v31, %v662_v31  ;;  %s1280_s19 = sadd.s32 2, %s3305_s29 }
 0x126   : > { %915 = vmatprep.mubr.bf16.mxu1 %v4132_v9  ;;  %956 = vmatprep.mubr.bf16.mxu0 %v4132_v9  ;;  %v4419_v23 = vld [vmem:[%s5113_s7] sm:$0xff]   ;;  %v3839_v30 = vld [vmem:[%s5110_s4 + $0xd4] ss:$24 sps:$4 sm:$0xff]   ;;  %s4508_s21 = sld [smem:[#allocation4 + %s1025_s3]] }
 0x127   : > { %v3834_v29 = vld [vmem:[%s5110_s4 + $0xa0] ss:$24 sps:$4 sm:$0xff]   ;;  %v878_v35 = vsel %vm864_vm2, %v3297_v34, 0  ;;  %s4512_s22 = sld [smem:[#allocation5 + %s1280_s19]] }
 0x129   : > { %589 = vrot.lane.b32.xlu0 %v587_v25, %s5078_s27  ;;  %579 = vrot.lane.b32.xlu1 %v577_v26, %s4128_s28  ;;  %s5079_s28 = smov 80   ;;  %v3833_v25 = vld [vmem:[%s5110_s4 + $0x74] ss:$24 sps:$4 sm:$0xff]   ;;  %s1017_s4 = sand.u32 7, %s4506_s12 }
 0x12a   : > { %v4434_v26 = vld [vmem:[%s5113_s7 + $0x8] sm:$0xff]  }
 0x12c   : > { %s1027_s27 = sshra.s32 %s4508_s21, 3  ;;  %s1030_s7 = sand.u32 7, %s4508_s21 }
 0x12d   : > { %609 = vrot.lane.b32.xlu0 %v607_v37, %s5079_s28  ;;  %599 = vrot.lane.b32.xlu1 %v597_v38, %s4130_s30  ;;  %s4131_s30 = smov 72   ;;  %v3843_v37 = vld [vmem:[%s5114_s6 + $0x8] sm:$0xff]   ;;  %v665_v38 = vlaneseq  ;;  %s4510_s28 = sld [smem:[#allocation5 + %s1025_s3]] }
 0x12e   : > { %s1282_s19 = sshra.s32 %s4512_s22, 3  ;;  %s3307_s5 = smul.u32 48, %s1027_s27 }
 0x12f   : > { %v4485_v39 = vshrl.u32 %v665_v38, 7  ;;  %s3315_s13 = smul.u32 48, %s1282_s19  ;;  %s1285_s23 = sand.u32 7, %s4512_s22 }
 0x130   : > { %s1033_s25 = sadd.s32 %s3307_s5, %s1030_s7  ;;  %s5117_s7 = smov 32  }
 0x131   : > { %619 = vrot.lane.b32.xlu1 %v617_v44, %s4131_s30  ;;  %v667_v40 = vsub.s32 0, %v4485_v39  ;;  %v4489_v41 = vsub.s32 2, %v4485_v39  ;;  %v4495_v43 = vsub.s32 1, %v4485_v39  ;;  %v4498_v44 = vsub.s32 3, %v4485_v39  ;;  %s1014_s30 = sshra.s32 %s4506_s12, 3  ;;  %s1288_s27 = sadd.s32 %s3315_s13, %s1285_s23 }
 0x132   : > { %s3306_s3 = smul.u32 48, %s1014_s30  ;;  %s5118_s13 = smov 48  }
 0x133   : > { %v668_v45 = vrot.slane %v663_v42, %v667_v40  ;;  %v676_v46 = vrot.slane %v663_v42, %v4489_v41  ;;  %v672_v47 = vrot.slane %v663_v42, %v4495_v43  ;;  %v680_v48 = vrot.slane %v663_v42, %v4498_v44  ;;  %s1269_s2 = sshra.s32 %s4510_s28, 3  ;;  %s1272_s30 = sand.u32 7, %s4510_s28 }
 0x134   : > { %s3314_s6 = smul.u32 48, %s1269_s2  ;;  %s1020_s17 = sadd.s32 %s3306_s3, %s1017_s4 }
 0x135   : > { %s1021_s16 = scalar_lea.vmem [#allocation2], %s1020_s17  ;;  %s1034_s2 = scalar_lea.vmem [#allocation2], %s1033_s25 }
 0x136   : > { %s1275_s1 = sadd.s32 %s3314_s6, %s1272_s30  ;;  %s1289_s4 = scalar_lea.vmem [#allocation2], %s1288_s27 }
 0x137   : > { %s1276_s21 = scalar_lea.vmem [#allocation2], %s1275_s1  ;;  %s5116_s6 = smov 16  }
 0x138   : > { %s5119_s27 = sld [smem:[#allocation23_spill]]  ;;  %s5121_s23 = sld [smem:[#allocation26_spill]] }
 0x197   : > { %v570_v62 = vpop.permute.xlu0 %569  ;;  %v560_v63 = vpop.permute.xlu1 %559 }
 0x198   : > { %v562_v2 = vmax.f32 %v552_v61, %v560_v63  ;;  %v683_v61 = vsub.s32 4, %v4485_v39 }
 0x19a   : > { %v572_v5 = vmax.f32 %v562_v2, %v570_v62  ;;  %v687_v62 = vsub.s32 5, %v4485_v39  ;;  %v684_v63 = vrot.slane %v663_v42, %v683_v61 }
 0x19b   : > { %v590_v7 = vpop.permute.xlu0 %589  ;;  %v580_v8 = vpop.permute.xlu1 %579 }
 0x19c   : > { %v582_v4 = vmax.f32 %v572_v5, %v580_v8  ;;  %v688_v0 = vrot.slane %v663_v42, %v687_v62 }
 0x19e   : > { %v592_v10 = vmax.f32 %v582_v4, %v590_v7 }
 0x19f   : > { %v600_v11 = vpop.permute.xlu1 %599  ;;  %v610_v13 = vpop.permute.xlu0 %609 }
 0x1a0   : > { %v602_v12 = vmax.f32 %v592_v10, %v600_v11 }
 0x1a2   : > { %v612_v14 = vmax.f32 %v602_v12, %v610_v13 }
 0x1a3   : > { %v620_v15 = vpop.permute.xlu1 %619 }
 0x1a4   : > { %v622_v16 = vmax.f32 %v612_v14, %v620_v15 }
 0x1a6   : > { %625 = vrot.lane.b32.xlu0 %v622_v16, %s5111_s26  ;;  %s4516_s26 = sld [smem:[#allocation5 + %s3305_s29]] }
 0x1ac   : > { %s1257_s29 = sshra.s32 %s4516_s26, 3  ;;  %s1260_s12 = sand.u32 7, %s4516_s26 }
 0x1ad   : > { %s3313_s20 = smul.u32 48, %s1257_s29 }
 0x1af   : > { %s1263_s11 = sadd.s32 %s3313_s20, %s1260_s12 }
 0x1b0   : > { %s1264_s5 = scalar_lea.vmem [#allocation2], %s1263_s11 }
 0x218   : > { %v626_v18 = vpop.permute.xlu0 %625 }
 0x219   : > { %v628_v19 = vsel %vm500_vm1, %v623_v17, %v626_v18 }
 0x21a   : > { %v629_v21 = vpack.c.bf16 %v628_v19, %v628_v19 }
 0x21c   : > { %3300 = vmatmul.mubr.msk.bf16.vlgmr.msra.gmra.mrb[0].mxu1 %vm860_vm3, %v629_v21  ;;  %3302 = vmatmul.mubr.msk.bf16.vlgmr.msra.gmra.mrb[4].mxu0 %vm860_vm3, %v629_v21 }
 0x21d   : > { %966 = vmatpush1.bf16.msra.mxu1 %v3825_v20  ;;  %997 = vmatprep.mubr.bf16.mxu1 %v4132_v9 }
 0x21e   : > { %967 = vmatprep.subr.bf16.mxu1 %v3830_v22  ;;  %3482 = vmatpush3.bf16.msra.mxu0 %v4419_v23 }
 0x21f   : > { %3483 = vmatprep.subr.bf16.mxu0 %v4116_v1  ;;  %3485 = vmatprep.mubr.msk.bf16.mxu0 %vm4117_vm0, %v4116_v1 }
 0x221   : > { %968 = vmatpush1.bf16.msra.mxu1 %v3828_v24 }
 0x222   : > { %969 = vmatprep.subr.bf16.mxu1 %v3833_v25  ;;  %3484 = vmatpush3.bf16.msra.mxu0 %v4434_v26 }
 0x223   : > { %3497 = vmatprep.subr.bf16.mxu0 %v4116_v1 }
 0x225   : > { %970 = vmatpush1.bf16.msra.mxu1 %v3831_v27  ;;  %3486 = vmatmul.mubr.bf16.vlgmr.msra.gmra.mrb[8].mxu0 %v4132_v9 }
 0x226   : > { %971 = vmatprep.subr.bf16.mxu1 %v3836_v28  ;;  %3498 = vmatpush3.bf16.msra.mxu0 %v4419_v23 }
 0x227   : > { %3499 = vmatprep.subr.bf16.mxu0 %v4116_v1  ;;  %3501 = vmatprep.mubr.msk.bf16.mxu0 %vm4117_vm0, %v4116_v1 }
 0x229   : > { %972 = vmatpush1.bf16.msra.mxu1 %v3834_v29 }
 0x22a   : > { %973 = vmatprep.subr.bf16.mxu1 %v3839_v30  ;;  %3500 = vmatpush3.bf16.msra.mxu0 %v4434_v26 }
 0x22b   : > { %3513 = vmatprep.subr.bf16.mxu0 %v4116_v1 }
 0x22d   : > { %974 = vmatpush1.bf16.msra.mxu1 %v3837_v32 }
 0x22e   : > { %3303 = vmatprep.subr.msk.bf16.mxu1 %vm864_vm2, %v3298_v33 }
 0x231   : > { %976 = vmatpush1.bf16.msra.mxu1 %v878_v35 }
 0x232   : > { %3465 = vmatprep.subr.bf16.mxu1 %v4116_v1 }
 0x234   : > { %3304 = vmatmul.mubr.msk.bf16.vlgmr.msra.gmra.mrb[4].mxu1 %vm860_vm3, %v629_v21 }
 0x235   : > { %3466 = vmatpush3.bf16.msra.mxu1 %v3842_v36  ;;  %3469 = vmatprep.mubr.msk.bf16.mxu1 %vm4117_vm0, %v4116_v1 }
 0x236   : > { %3467 = vmatprep.subr.bf16.mxu1 %v4116_v1 }
 0x239   : > { %3468 = vmatpush3.bf16.msra.mxu1 %v3843_v37 }
 0x23a   : > { %3473 = vmatprep.subr.bf16.mxu1 %v4116_v1 }
 0x23c   : > { %3470 = vmatmul.mubr.bf16.vlgmr.msra.gmra.mrb[8].mxu1 %v4132_v9 }
 0x23d   : > { %3474 = vmatpush3.bf16.msra.mxu1 %v3842_v36  ;;  %3477 = vmatprep.mubr.msk.bf16.mxu1 %vm4117_vm0, %v4116_v1 }
 0x23e   : > { %3475 = vmatprep.subr.bf16.mxu1 %v4116_v1 }
 0x241   : > { %3476 = vmatpush3.bf16.msra.mxu1 %v3843_v37 }
 0x242   : > { %3489 = vmatprep.subr.bf16.mxu1 %v4116_v1 }
 0x2ef   : > { %v917_v49 = vpop.f32.mrb[0].mxu1  ;;  %v958_v50 = vpop.f32.mrb[4].mxu0 }
 0x2f0   : > { %v918_v51 = vadd.f32 %v917_v49, %v668_v45  ;;  %v959_v52 = vadd.f32 %v958_v50, %v676_v46  ;;  %v919_v53 = vpop.f32.mrb[1].mxu1  ;;  %v960_v54 = vpop.f32.mrb[5].mxu0 }
 0x2f1   : > { %v920_v55 = vadd.f32 %v919_v53, %v672_v47  ;;  %v961_v56 = vadd.f32 %v960_v54, %v680_v48  ;;  %v921_v57 = vpop.f32.mrb[2].mxu1  ;;  %v962_v58 = vpop.f32.mrb[6].mxu0 }
 0x2f2   : > { %1006 = vst [vmem:[#allocation2] sm:$0xff] %v918_v51  ;;  %1008 = vst [vmem:[#allocation2 + $0x10] sm:$0xff] %v959_v52  ;;  %v922_v59 = vpop.f32.mrb[3].mxu1  ;;  %v963_v60 = vpop.f32.mrb[7].mxu0 }
 0x2f3   : > { %1007 = vst [vmem:[#allocation2 + $0x8] sm:$0xff] %v920_v55  ;;  %1009 = vst [vmem:[#allocation2 + $0x18] sm:$0xff] %v961_v56 }
 0x2f8   : > { %v1411_v45 = vpop.f32.mrb[8].mxu0 }
 0x2f9   : > { %v3487_v46 = vpop.f32.mrb[9].mxu0 }
 0x2fa   : > { %v1414_v47 = vpop.f32.mrb[10].mxu0 }
 0x2fb   : > { %v3488_v49 = vpop.f32.mrb[11].mxu0 }
 0x307   : > { %v999_v2 = vpop.f32.mrb[4].mxu1 }
 0x308   : > { %v4522_v3 = vadd.f32 %v999_v2, %v684_v63  ;;  %v1001_v5 = vpop.f32.mrb[5].mxu1 }
 0x309   : > { %v4525_v6 = vadd.f32 %v1001_v5, %v688_v0  ;;  %v1003_v7 = vpop.f32.mrb[6].mxu1 }
 0x30a   : > { %1010 = vst [vmem:[#allocation2 + $0x20] sm:$0xff] %v4522_v3  ;;  %v1004_v8 = vpop.f32.mrb[7].mxu1 }
 0x30b   : > { %1011 = vst [vmem:[#allocation2 + $0x28] sm:$0xff] %v4525_v6  ;;  %v1605_v46 = vrot.slane %v4525_v6, 3  ;;  %v1607_v49 = vrot.slane %v4525_v6, 1 }
 0x30f   : > { %v1147_v27 = vpop.f32.mrb[8].mxu1 }
 0x310   : > { %v3471_v31 = vpop.f32.mrb[9].mxu1 }
 0x311   : > { %v1150_v32 = vpop.f32.mrb[10].mxu1 }
 0x312   : > { %v1022_v4 = vld [vmem:[%s1021_s16] ss:$8 sm:$0xf]  ;;  %v3472_v33 = vpop.f32.mrb[11].mxu1 }
 0x313   : > { %v1023_v10 = vld [vmem:[%s1021_s16] ss:$8 sm:$0x30]  ;;  %s4133_s16 = smov 64  }
 0x314   : > { %v1024_v11 = vor.u32 %v1023_v10, %v1022_v4  ;;  %v1035_v12 = vld [vmem:[%s1034_s2] ss:$8 sm:$0xf] }
 0x315   : > { %v1036_v13 = vld [vmem:[%s1034_s2] ss:$8 sm:$0x30] }
 0x316   : > { %v1037_v14 = vor.u32 %v1036_v13, %v1035_v12  ;;  %v1055_v15 = vrot.slane %v1024_v11, %v4495_v43  ;;  %v1277_v16 = vld [vmem:[%s1276_s21] ss:$8 sm:$0xf] }
 0x317   : > { %v1278_v17 = vld [vmem:[%s1276_s21] ss:$8 sm:$0x30] }
 0x318   : > { %v1049_v18 = vrot.slane %v1037_v14, %v4495_v43  ;;  %v1042_v19 = vrot.slane %v1037_v14, %v667_v40  ;;  %v1290_v20 = vld [vmem:[%s1289_s4] ss:$8 sm:$0xf]  ;;  %v1279_v29 = vor.u32 %v1278_v17, %v1277_v16 }
 0x319   : > { %v1291_v21 = vld [vmem:[%s1289_s4] ss:$8 sm:$0x30] }
 0x31a   : > { %v1057_v22 = vsel %vm1044_vm4, %v1049_v18, %v1055_v15  ;;  %v1045_v24 = vsel %vm1044_vm4, %v1024_v11, %v1042_v19  ;;  %v1265_v25 = vld [vmem:[%s1264_s5] ss:$8 sm:$0xf]  ;;  %v1292_v30 = vor.u32 %v1291_v21, %v1290_v20  ;;  %v1322_v36 = vrot.slane %v1279_v29, %v4498_v44 }
 0x31b   : > { %1059 = vrot.lane.b32.xlu1 %v1057_v22, %s5116_s6  ;;  %1063 = vrot.lane.b32.xlu0 %v1045_v24, %s5116_s6  ;;  %v1266_v28 = vld [vmem:[%s1264_s5] ss:$8 sm:$0x30]  ;;  %v1303_v40 = vrot.slane %v1279_v29, %v4489_v41 }
 0x31c   : > { %v1267_v34 = vor.u32 %v1266_v28, %v1265_v25  ;;  %v1317_v35 = vrot.slane %v1292_v30, %v4498_v44  ;;  %v1309_v43 = vrot.slane %v1292_v30, %v4489_v41 }
 0x31e   : > { %v1327_v37 = vrot.slane %v1267_v34, %v4498_v44  ;;  %v1329_v38 = vsel %vm1044_vm4, %v1317_v35, %v1322_v36  ;;  %v1297_v39 = vrot.slane %v1267_v34, %v4489_v41 }
 0x31f   : > { %1066 = vrot.lane.b32.xlu1 %v1057_v22, %s5117_s7  ;;  %1069 = vrot.lane.b32.xlu0 %v1045_v24, %s5117_s7 }
 0x320   : > { %v1330_v42 = vsel %vm1312_vm5, %v1329_v38, %v1327_v37  ;;  %v1311_v44 = vsel %vm1044_vm4, %v1297_v39, %v1303_v40 }
 0x321   : > { %v1313_v48 = vsel %vm1312_vm5, %v1311_v44, %v1309_v43  ;;  %v1601_v44 = vrot.slane %v4525_v6, 7 }
 0x323   : > { %1072 = vrot.lane.b32.xlu1 %v1057_v22, %s5118_s13  ;;  %1075 = vrot.lane.b32.xlu0 %v1045_v24, %s5118_s13 }
 0x327   : > { %1078 = vrot.lane.b32.xlu1 %v1057_v22, %s4133_s16  ;;  %1332 = vrot.lane.b32.xlu0 %v1330_v42, %s5116_s6 }
 0x32b   : > { %1336 = vrot.lane.b32.xlu1 %v1313_v48, %s5116_s6  ;;  %1339 = vrot.lane.b32.xlu0 %v1330_v42, %s5117_s7 }
 0x32f   : > { %1342 = vrot.lane.b32.xlu1 %v1313_v48, %s5117_s7  ;;  %1345 = vrot.lane.b32.xlu0 %v1330_v42, %s5118_s13 }
 0x333   : > { %1348 = vrot.lane.b32.xlu1 %v1313_v48, %s5118_s13  ;;  %1351 = vrot.lane.b32.xlu0 %v1330_v42, %s4133_s16 }
 0x38d   : > { %v1060_v41 = vpop.permute.xlu1 %1059  ;;  %v1064_v50 = vpop.permute.xlu0 %1063 }
 0x38e   : > { %v1082_v51 = vsel %vm1081_vm6, %v1045_v24, %v1060_v41 }
 0x38f   : > { %v1084_v52 = vsel %vm1083_vm7, %v1082_v51, %v1064_v50 }
 0x391   : > { %v1067_v53 = vpop.permute.xlu1 %1066  ;;  %v1070_v54 = vpop.permute.xlu0 %1069 }
 0x392   : > { %v1086_v55 = vsel %vm1085_vm8, %v1084_v52, %v1067_v53 }
 0x393   : > { %v1088_v56 = vsel %vm1087_vm9, %v1086_v55, %v1070_v54 }
 0x395   : > { %v1073_v57 = vpop.permute.xlu1 %1072  ;;  %v1076_v58 = vpop.permute.xlu0 %1075 }
 0x396   : > { %v1089_v59 = vsel %vm500_vm1, %v1088_v56, %v1073_v57 }
 0x397   : > { %v1091_v60 = vsel %vm1090_vm10, %v1089_v59, %v1076_v58 }
 0x399   : > { %v1079_v61 = vpop.permute.xlu1 %1078  ;;  %v1333_v62 = vpop.permute.xlu0 %1332 }
 0x39a   : > { %v4571_v63 = vsel %vm1092_vm11, %v1091_v60, %v1079_v61  ;;  %v1354_v2 = vsel %vm1081_vm6, %v1313_v48, %v1333_v62  ;;  %v4629_v60 = vld [vmem:[%s5062_s8] sm:$0xff]  }
 0x39b   : > { %v1153_v0 = vadd.f32 %v1147_v27, %v4571_v63 }
 0x39d   : > { %3852 = vtanh.f32 %v1153_v0  ;;  %v1337_v5 = vpop.permute.xlu1 %1336  ;;  %v1340_v7 = vpop.permute.xlu0 %1339  ;;  %v3310_v21 = vmul.f32 -1.442695, %v1153_v0 }
 0x39e   : > { %v1355_v8 = vsel %vm1083_vm7, %v1354_v2, %v1337_v5 }
 0x39f   : > { %v1356_v4 = vsel %vm1085_vm8, %v1355_v8, %v1340_v7 }
 0x3a1   : > { %v1343_v10 = vpop.permute.xlu1 %1342  ;;  %v1346_v11 = vpop.permute.xlu0 %1345 }
 0x3a2   : > { %v1357_v12 = vsel %vm1087_vm9, %v1356_v4, %v1343_v10 }
 0x3a3   : > { %v1358_v13 = vsel %vm500_vm1, %v1357_v12, %v1346_v11 }
 0x3a5   : > { %v1349_v14 = vpop.permute.xlu1 %1348  ;;  %v1352_v15 = vpop.permute.xlu0 %1351 }
 0x3a6   : > { %v1359_v16 = vsel %vm1090_vm10, %v1358_v13, %v1349_v14 }
 0x3a7   : > { %v3853_v17 = vpop.eup %3852  ;;  %v4581_v18 = vsel %vm1092_vm11, %v1359_v16, %v1352_v15 }
 0x3a8   : > { %v1417_v19 = vadd.f32 %v1411_v45, %v4581_v18  ;;  %1163 = vrot.lane.b32.xlu1 %v3853_v17, %s4133_s16  ;;  %v1603_v45 = vrot.slane %v4525_v6, 5 }
 0x3aa   : > { %3854 = vtanh.f32 %v1417_v19  ;;  %v3318_v22 = vmul.f32 -1.442695, %v1417_v19  ;;  %v1609_v47 = vsel %vm1044_vm4, %v1601_v44, %v1603_v45 }
 0x3ab   : > { %3856 = vpow2.f32 %v3310_v21  ;;  %v1610_v48 = vsel %vm1312_vm5, %v1609_v47, %v1605_v46 }
 0x3ac   : > { %3858 = vpow2.f32 %v3318_v22  ;;  %v1612_v41 = vsel %vm1611_vm12, %v1610_v48, %v1607_v49 }
 0x3ad   : > { %v1613_v50 = vsel %vm864_vm2, %v1612_v41, %v1601_v44 }
 0x3ae   : > { %v1615_v53 = vsel %vm1614_vm13, %v1613_v50, %v1603_v45 }
 0x3af   : > { %v1617_v55 = vsel %vm1616_vm14, %v1615_v53, %v1605_v46 }
 0x3b0   : > { %v1619_v56 = vsel %vm1618_vm15, %v1617_v55, %v1607_v49 }
 0x3b4   : > { %v3855_v20 = vpop.eup %3854 }
 0x3b5   : > { %1427 = vrot.lane.b32.xlu0 %v3855_v20, %s4133_s16  ;;  %v3857_v24 = vpop.eup %3856 }
 0x3b6   : > { %v1157_v25 = vadd.f32 1.0, %v3857_v24  ;;  %v3859_v27 = vpop.eup %3858 }
 0x3b7   : > { %v1421_v28 = vadd.f32 1.0, %v3859_v27 }
 0x3b8   : > { %3860 = vrcp.f32 %v1157_v25 }
 0x3b9   : > { %3862 = vrcp.f32 %v1421_v28 }
 0x3c2   : > { %v3861_v29 = vpop.eup %3860 }
 0x3c3   : > { %v3863_v32 = vpop.eup %3862  ;;  %v1161_v35 = vmul.f32 0.0, %v3861_v29 }
 0x3c4   : > { %v1425_v38 = vmul.f32 0.0, %v3863_v32 }
 0x41a   : > { %v1164_v30 = vpop.permute.xlu1 %1163 }
 0x41b   : > { %v1166_v31 = vmul.f32 %v3861_v29, %v1164_v30 }
 0x41d   : > { %1168 = vrot.lane.b32.xlu1 %v1166_v31, %s5117_s7 }
 0x427   : > { %v1428_v33 = vpop.permute.xlu0 %1427 }
 0x428   : > { %v1430_v34 = vmul.f32 %v3863_v32, %v1428_v33 }
 0x42a   : > { %1432 = vrot.lane.b32.xlu0 %v1430_v34, %s5117_s7 }
 0x48f   : > { %v1169_v36 = vpop.permute.xlu1 %1168 }
 0x490   : > { %v4588_v37 = vadd.f32 %v1169_v36, %v1161_v35 }
 0x492   : > { %3864 = vtanh.f32 %v4588_v37 }
 0x49c   : > { %v3865_v39 = vpop.eup %3864  ;;  %v1433_v40 = vpop.permute.xlu0 %1432 }
 0x49d   : > { %v4591_v42 = vadd.f32 %v1433_v40, %v1425_v38  ;;  %1174 = vrot.lane.b32.xlu1 %v3865_v39, %s4133_s16 }
 0x49f   : > { %3866 = vtanh.f32 %v4591_v42  ;;  %v1501_v41 = vrot.slane %v4591_v42, 7 }
 0x4a9   : > { %v3867_v43 = vpop.eup %3866 }
 0x4aa   : > { %1438 = vrot.lane.b32.xlu0 %v3867_v43, %s4133_s16 }
 0x50f   : > { %v1175_v51 = vpop.permute.xlu1 %1174 }
 0x510   : > { %v1177_v52 = vmul.f32 %v3861_v29, %v1175_v51 }
 0x512   : > { %v1178_v54 = vpack.c.bf16 %v1177_v52, %v1177_v52 }
 0x514   : > { %1180 = vrot.lane.b32.xlu1 %v1178_v54, %s5117_s7 }
 0x518   : > { %1621 = vrot.lane.b32.xlu1 %v1619_v56, %s5116_s6 }
 0x51c   : > { %v1439_v6 = vpop.permute.xlu0 %1438  ;;  %1628 = vrot.lane.b32.xlu1 %v1619_v56, %s5117_s7 }
 0x51d   : > { %v1441_v57 = vmul.f32 %v3863_v32, %v1439_v6 }
 0x51f   : > { %v1442_v58 = vpack.c.bf16 %v1441_v57, %v1441_v57 }
 0x520   : > { %1634 = vrot.lane.b32.xlu1 %v1619_v56, %s5118_s13 }
 0x521   : > { %1444 = vrot.lane.b32.xlu0 %v1442_v58, %s5117_s7 }
 0x524   : > { %1640 = vrot.lane.b32.xlu1 %v1619_v56, %s4133_s16 }
 0x525   : > { %1625 = vrot.lane.b32.xlu0 %v4522_v3, %s5116_s6  ;;  %s455_s6 = sand.u32 1, %s4104_s0  }
 0x526   : > { %s456_s1 = scalar_lea.vmem [#allocation6], %s455_s6  ;;  %s3183_s28 = scalar_lea.sflag [#allocation7], %s455_s6 }
 0x527   : > { %s3195_s17 = sshll.u32 %s456_s1, 4  ;;  %s5015_s17 = int_to_ptr.vmem [resolvable:$true] %s3195_s17 }
 0x528   : > { %s4048_s22 = scalar_lea.vmem %s5015_s17, 16 }
 0x529   : > { %1631 = vrot.lane.b32.xlu0 %v4522_v3, %s5117_s7  ;;  %p4049_p6 = scmp.ne.s32.totalorder %s5015_s17, %s4048_s22 }
 0x52b   : > { %p4050_p7 = pnand %p4049_p6, %p4265_p1 }
 0x52d   : > { %1637 = vrot.lane.b32.xlu0 %v4522_v3, %s5118_s13  ;;  %s3363_s13 = sshll.u32 %s4248_s18, 4  ;;  %p4051_p8 = pneg %p4050_p7 }
 0x52e   : > { %s5013_s25 = scalar_lea.hbm %s5121_s23, %s3363_s13  ;;  %s4135_s18 = smov [#allocation6]  }
 0x52f   : > { %s4052_s26 = sshll.u32 %s4135_s18, 4  ;;  %s4053_s26 = int_to_ptr.vmem [resolvable:$false] %s4052_s26 }
 0x530   : > { %s4054_s3 = scalar_lea.vmem %s4053_s26, 32  ;;  %p4055_p9 = scmp.lt.s32.totalorder %s5015_s17, %s4053_s26 }
 0x531   : > { %p4056_p10 = scmp.lt.s32.totalorder %s4054_s3, %s4048_s22 }
 0x533   : > { %p4057_p11 = por %p4056_p10, %p4055_p9 }
 0x535   : > { %p4058_p12 = pnand %p4057_p11, %p4051_p8 }
 0x586   : > { %v1181_v59 = vpop.permute.xlu1 %1180 }
 0x587   : > { %3478 = vmatmul.mubr.msk.bf16.vlgmr.msra.gmra.mrb[12].mxu1 %vm1083_vm7, %v1181_v59 }
 0x588   : > { %3490 = vmatpush3.bf16.msra.mxu1 %v4419_v23  ;;  %3493 = vmatprep.mubr.msk.bf16.mxu1 %vm4117_vm0, %v4116_v1  ;;  %v4636_v23 = vld [vmem:[%s5062_s8 + $0x8] sm:$0xff]  }
 0x589   : > { %3491 = vmatprep.subr.bf16.mxu1 %v4116_v1 }
 0x58a   : > { %v1622_v0 = vpop.permute.xlu1 %1621 }
 0x58b   : > { %v1643_v4 = vsel %vm1081_vm6, %v4522_v3, %v1622_v0 }
 0x58c   : > { %3492 = vmatpush3.bf16.msra.mxu1 %v4434_v26 }
 0x58d   : > { %3505 = vmatprep.subr.bf16.mxu1 %v4116_v1 }
 0x58e   : > { %v1629_v8 = vpop.permute.xlu1 %1628 }
 0x592   : > { %v1635_v14 = vpop.permute.xlu1 %1634 }
 0x593   : > { %v1445_v61 = vpop.permute.xlu0 %1444 }
 0x594   : > { %3494 = vmatmul.mubr.msk.bf16.vlgmr.msra.gmra.mrb[16].mxu1 %vm1083_vm7, %v1445_v61 }
 0x595   : > { %3506 = vmatpush3.bf16.msra.mxu1 %v4629_v60  ;;  %3509 = vmatprep.mubr.msk.bf16.mxu1 %vm4117_vm0, %v4116_v1 }
 0x596   : > { %3507 = vmatprep.subr.bf16.mxu1 %v4116_v1  ;;  %v1641_v25 = vpop.permute.xlu1 %1640 }
 0x597   : > { %v1626_v5 = vpop.permute.xlu0 %1625 }
 0x598   : > { %v1644_v11 = vsel %vm1083_vm7, %v1643_v4, %v1626_v5 }
 0x599   : > { %3508 = vmatpush3.bf16.msra.mxu1 %v4636_v23  ;;  %v1645_v12 = vsel %vm1085_vm8, %v1644_v11, %v1629_v8 }
 0x59a   : > { %3521 = vmatprep.subr.bf16.mxu1 %v4116_v1 }
 0x59b   : > { %v1632_v10 = vpop.permute.xlu0 %1631 }
 0x59c   : > { %3510 = vmatmul.mubr.bf16.vlgmr.msra.gmra.mrb[20].mxu1 %v4132_v9  ;;  %v1646_v15 = vsel %vm1087_vm9, %v1645_v12, %v1632_v10 }
 0x59d   : > { %3522 = vmatpush3.bf16.msra.mxu1 %v4629_v60  ;;  %3525 = vmatprep.mubr.msk.bf16.mxu1 %vm4117_vm0, %v4116_v1  ;;  %v1647_v24 = vsel %vm500_vm1, %v1646_v15, %v1635_v14 }
 0x59e   : > { %3523 = vmatprep.subr.bf16.mxu1 %v4116_v1 }
 0x59f   : > { %v1638_v19 = vpop.permute.xlu0 %1637 }
 0x5a0   : > { %v1648_v3 = vsel %vm1090_vm10, %v1647_v24, %v1638_v19 }
 0x5a1   : > { %3524 = vmatpush3.bf16.msra.mxu1 %v4636_v23  ;;  %v4661_v27 = vsel %vm1092_vm11, %v1648_v3, %v1641_v25 }
 0x5a2   : > { %3537 = vmatprep.subr.bf16.mxu1 %v4116_v1 }
 0x65a   : > { %v4650_v26 = vpop.f32.mrb[12].mxu1 }
 0x65b   : > { %v3479_v62 = vpop.f32.mrb[13].mxu1 }
 0x65c   : > { %v1222_v2 = vpop.f32.mrb[14].mxu1 }
 0x65d   : > { %v3480_v7 = vpop.f32.mrb[15].mxu1 }
 0x667   : > { %v1483_v13 = vpop.f32.mrb[16].mxu1 }
 0x668   : > { %v1490_v16 = vrot.slane %v1483_v13, 7  ;;  %v3495_v17 = vpop.f32.mrb[17].mxu1 }
 0x669   : > { %v1486_v20 = vpop.f32.mrb[18].mxu1 }
 0x66a   : > { %v1492_v21 = vadd.f32 %v1490_v16, %v4581_v18  ;;  %v3496_v22 = vpop.f32.mrb[19].mxu1 }
 0x66c   : > { %3868 = vtanh.f32 %v1492_v21  ;;  %v3320_v35 = vmul.f32 -1.442695, %v1492_v21 }
 0x66f   : > { %v1700_v28 = vpop.f32.mrb[20].mxu1 }
 0x670   : > { %v1706_v29 = vadd.f32 %v1700_v28, %v4661_v27  ;;  %v3511_v30 = vpop.f32.mrb[21].mxu1 }
 0x671   : > { %v1703_v31 = vpop.f32.mrb[22].mxu1 }
 0x672   : > { %3870 = vtanh.f32 %v1706_v29  ;;  %v3512_v32 = vpop.f32.mrb[23].mxu1  ;;  %v3325_v36 = vmul.f32 -1.442695, %v1706_v29 }
 0x673   : > { %3872 = vpow2.f32 %v3320_v35 }
 0x674   : > { %3874 = vpow2.f32 %v3325_v36 }
 0x676   : > { %v3869_v33 = vpop.eup %3868 }
 0x677   : > { %1505 = vrot.lane.b32.xlu0 %v3869_v33, %s4133_s16 }
 0x67c   : > { %v3871_v34 = vpop.eup %3870 }
 0x67d   : > { %1716 = vrot.lane.b32.xlu1 %v3871_v34, %s4133_s16  ;;  %v3873_v38 = vpop.eup %3872 }
 0x67e   : > { %v1496_v39 = vadd.f32 1.0, %v3873_v38  ;;  %v3875_v40 = vpop.eup %3874 }
 0x67f   : > { %v1710_v43 = vadd.f32 1.0, %v3875_v40 }
 0x680   : > { %3876 = vrcp.f32 %v1496_v39 }
 0x681   : > { %3878 = vrcp.f32 %v1710_v43 }
 0x68a   : > { %v3877_v44 = vpop.eup %3876 }
 0x68b   : > { %v3879_v47 = vpop.eup %3878  ;;  %v1503_v50 = vmul.f32 %v3877_v44, %v1501_v41 }
 0x68c   : > { %v1714_v53 = vmul.f32 0.0, %v3879_v47 }
 0x6e9   : > { %v1506_v45 = vpop.permute.xlu0 %1505 }
 0x6ea   : > { %v1508_v46 = vmul.f32 %v3877_v44, %v1506_v45 }
 0x6ec   : > { %1510 = vrot.lane.b32.xlu0 %v1508_v46, %s5117_s7 }
 0x6ef   : > { %v1717_v48 = vpop.permute.xlu1 %1716 }
 0x6f0   : > { %v1719_v49 = vmul.f32 %v3879_v47, %v1717_v48 }
 0x6f2   : > { %1721 = vrot.lane.b32.xlu1 %v1719_v49, %s5117_s7 }
 0x75e   : > { %v1511_v51 = vpop.permute.xlu0 %1510 }
 0x75f   : > { %v4669_v52 = vadd.f32 %v1511_v51, %v1503_v50 }
 0x761   : > { %3880 = vtanh.f32 %v4669_v52 }
 0x764   : > { %v1722_v54 = vpop.permute.xlu1 %1721 }
 0x765   : > { %v1724_v55 = vadd.f32 %v1722_v54, %v1714_v53 }
 0x767   : > { %3882 = vtanh.f32 %v1724_v55  ;;  %v1790_v25 = vrot.slane %v1724_v55, 7 }
 0x76b   : > { %v3881_v56 = vpop.eup %3880 }
 0x76c   : > { %1516 = vrot.lane.b32.xlu0 %v3881_v56, %s4133_s16 }
 0x771   : > { %v3883_v6 = vpop.eup %3882 }
 0x772   : > { %1727 = vrot.lane.b32.xlu1 %v3883_v6, %s4133_s16 }
 0x7de   : > { %v1517_v57 = vpop.permute.xlu0 %1516 }
 0x7df   : > { %v1519_v58 = vmul.f32 %v3877_v44, %v1517_v57 }
 0x7e1   : > { %v1520_v59 = vpack.c.bf16 %v1519_v58, %v1519_v58 }
 0x7e3   : > { %v1522_v42 = vshrl.u32 %v1520_v59, 16 }
 0x7e4   : > { %v1728_v61 = vpop.permute.xlu1 %1727 }
 0x7e5   : > { %v4674_v62 = vmul.f32 %v3879_v47, %v1728_v61  ;;  %1524 = vrot.lane.b32.xlu0 %v1522_v42, %s5117_s7 }
 0x7e7   : > { %v1731_v0 = vpack.c.bf16 %v4674_v62, %v4674_v62 }
 0x7e9   : > { %1733 = vrot.lane.b32.xlu1 %v1731_v0, %s5117_s7 }
 0x857   : > { %v1525_v2 = vpop.permute.xlu0 %1524 }
 0x858   : > { %3502 = vmatmul.mubr.msk.bf16.vlgmr.msra.gmra.mrb[12].mxu0 %vm1083_vm7, %v1525_v2 }
 0x859   : > { %3514 = vmatpush3.bf16.msra.mxu0 %v4629_v60  ;;  %3517 = vmatprep.mubr.msk.bf16.mxu0 %vm4117_vm0, %v4116_v1 }
 0x85a   : > { %3515 = vmatprep.subr.bf16.mxu0 %v4116_v1 }
 0x85b   : > { %v1734_v5 = vpop.permute.xlu1 %1733 }
 0x85d   : > { %3516 = vmatpush3.bf16.msra.mxu0 %v4636_v23 }
 0x85e   : > { %3529 = vmatprep.subr.bf16.mxu0 %v4116_v1 }
 0x860   : > { %3518 = vmatmul.mubr.msk.bf16.vlgmr.msra.gmra.mrb[16].mxu0 %vm1083_vm7, %v1734_v5 }
 0x861   : > { %3530 = vmatpush3.bf16.msra.mxu0 %v4629_v60  ;;  %3533 = vmatprep.mubr.msk.bf16.mxu0 %vm4117_vm0, %v4116_v1 }
 0x862   : > { %3531 = vmatprep.subr.bf16.mxu0 %v4116_v1 }
 0x865   : > { %3532 = vmatpush3.bf16.msra.mxu0 %v4636_v23 }
 0x866   : > { %3545 = vmatprep.subr.bf16.mxu0 %v4116_v1 }
 0x92b   : > { %v4694_v7 = vpop.f32.mrb[12].mxu0 }
 0x92c   : > { %v3503_v8 = vpop.f32.mrb[13].mxu0 }
 0x92d   : > { %v1566_v4 = vpop.f32.mrb[14].mxu0 }
 0x92e   : > { %v3504_v10 = vpop.f32.mrb[15].mxu0 }
 0x933   : > { %v1772_v11 = vpop.f32.mrb[16].mxu0 }
 0x934   : > { %v1779_v12 = vrot.slane %v1772_v11, 7  ;;  %v3519_v13 = vpop.f32.mrb[17].mxu0 }
 0x935   : > { %v1775_v14 = vpop.f32.mrb[18].mxu0 }
 0x936   : > { %v1781_v15 = vadd.f32 %v1779_v12, %v4661_v27  ;;  %v3520_v16 = vpop.f32.mrb[19].mxu0 }
 0x938   : > { %3884 = vtanh.f32 %v1781_v15  ;;  %v3327_v19 = vmul.f32 -1.442695, %v1781_v15 }
 0x93a   : > { %3886 = vpow2.f32 %v3327_v19 }
 0x942   : > { %v3885_v17 = vpop.eup %3884 }
 0x943   : > { %1794 = vrot.lane.b32.xlu0 %v3885_v17, %s4133_s16 }
 0x944   : > { %v3887_v20 = vpop.eup %3886 }
 0x945   : > { %v1785_v21 = vadd.f32 1.0, %v3887_v20 }
 0x947   : > { %3888 = vrcp.f32 %v1785_v21 }
 0x951   : > { %v3889_v22 = vpop.eup %3888 }
 0x952   : > { %v1792_v28 = vmul.f32 %v3889_v22, %v1790_v25 }
 0x9b5   : > { %v1795_v24 = vpop.permute.xlu0 %1794 }
 0x9b6   : > { %v1797_v3 = vmul.f32 %v3889_v22, %v1795_v24 }
 0x9b8   : > { %1799 = vrot.lane.b32.xlu1 %v1797_v3, %s5117_s7 }
 0xa2a   : > { %v1800_v29 = vpop.permute.xlu1 %1799 }
 0xa2b   : > { %v1802_v30 = vadd.f32 %v1800_v29, %v1792_v28 }
 0xa2d   : > { %3890 = vtanh.f32 %v1802_v30  ;;  %v1870_v53 = vrot.slane %v1802_v30, 7 }
 0xa37   : > { %v3891_v31 = vpop.eup %3890 }
 0xa38   : > { %1805 = vrot.lane.b32.xlu0 %v3891_v31, %s4133_s16 }
 0xaaa   : > { %v1806_v32 = vpop.permute.xlu0 %1805 }
 0xaab   : > { %v4700_v33 = vmul.f32 %v3889_v22, %v1806_v32 }
 0xaad   : > { %v1809_v34 = vpack.c.bf16 %v4700_v33, %v4700_v33 }
 0xaaf   : > { %v1811_v35 = vshrl.u32 %v1809_v34, 16 }
 0xab1   : > { %1813 = vrot.lane.b32.xlu1 %v1811_v35, %s5117_s7 }
 0xb23   : > { %v1814_v36 = vpop.permute.xlu1 %1813 }
 0xb24   : > { %3526 = vmatmul.mubr.msk.bf16.vlgmr.msra.gmra.mrb[24].mxu1 %vm1083_vm7, %v1814_v36 }
 0xb25   : > { %3538 = vmatpush3.bf16.msra.mxu1 %v4629_v60  ;;  %3541 = vmatprep.mubr.msk.bf16.mxu1 %vm4117_vm0, %v4116_v1 }
 0xb26   : > { %3539 = vmatprep.subr.bf16.mxu1 %v4116_v1 }
 0xb29   : > { %3540 = vmatpush3.bf16.msra.mxu1 %v4636_v23 }
 0xb2a   : > { %3553 = vmatprep.subr.bf16.mxu1 %v4116_v1 }
 0xbf7   : > { %v1852_v38 = vpop.f32.mrb[24].mxu1 }
 0xbf8   : > { %v1859_v39 = vrot.slane %v1852_v38, 6  ;;  %v3527_v40 = vpop.f32.mrb[25].mxu1 }
 0xbf9   : > { %v1855_v43 = vpop.f32.mrb[26].mxu1 }
 0xbfa   : > { %v1861_v44 = vadd.f32 %v1859_v39, %v4661_v27  ;;  %v3528_v45 = vpop.f32.mrb[27].mxu1 }
 0xbfc   : > { %3892 = vtanh.f32 %v1861_v44  ;;  %v3329_v47 = vmul.f32 -1.442695, %v1861_v44 }
 0xbfe   : > { %3894 = vpow2.f32 %v3329_v47 }
 0xc06   : > { %v3893_v46 = vpop.eup %3892 }
 0xc07   : > { %1874 = vrot.lane.b32.xlu0 %v3893_v46, %s4133_s16 }
 0xc08   : > { %v3895_v48 = vpop.eup %3894 }
 0xc09   : > { %v1865_v49 = vadd.f32 1.0, %v3895_v48 }
 0xc0b   : > { %3896 = vrcp.f32 %v1865_v49 }
 0xc15   : > { %v3897_v41 = vpop.eup %3896 }
 0xc16   : > { %v1872_v54 = vmul.f32 %v3897_v41, %v1870_v53 }
 0xc79   : > { %v1875_v50 = vpop.permute.xlu0 %1874 }
 0xc7a   : > { %v1877_v51 = vmul.f32 %v3897_v41, %v1875_v50 }
 0xc7c   : > { %1879 = vrot.lane.b32.xlu1 %v1877_v51, %s5117_s7 }
 0xcee   : > { %v1880_v55 = vpop.permute.xlu1 %1879 }
 0xcef   : > { %v1882_v56 = vadd.f32 %v1880_v55, %v1872_v54 }
 0xcf1   : > { %3898 = vtanh.f32 %v1882_v56  ;;  %v1949_v19 = vrot.slane %v1882_v56, 7 }
 0xcfb   : > { %v3899_v6 = vpop.eup %3898 }
 0xcfc   : > { %1885 = vrot.lane.b32.xlu0 %v3899_v6, %s4133_s16 }
 0xd6e   : > { %v1886_v57 = vpop.permute.xlu0 %1885 }
 0xd6f   : > { %v4716_v58 = vmul.f32 %v3897_v41, %v1886_v57 }
 0xd71   : > { %v1889_v59 = vpack.c.bf16 %v4716_v58, %v4716_v58 }
 0xd73   : > { %v1891_v42 = vrot.slane %v1889_v59, 1 }
 0xd75   : > { %1892 = vrot.lane.b32.xlu1 %v1891_v42, %s5117_s7 }
 0xde7   : > { %v1893_v61 = vpop.permute.xlu1 %1892 }
 0xde8   : > { %3534 = vmatmul.mubr.msk.bf16.vlgmr.msra.gmra.mrb[20].mxu0 %vm1083_vm7, %v1893_v61 }
 0xde9   : > { %3546 = vmatpush3.bf16.msra.mxu0 %v4629_v60  ;;  %3549 = vmatprep.mubr.msk.bf16.mxu0 %vm4117_vm0, %v4116_v1 }
 0xdea   : > { %3547 = vmatprep.subr.bf16.mxu0 %v4116_v1 }
 0xded   : > { %3548 = vmatpush3.bf16.msra.mxu0 %v4636_v23 }
 0xdee   : > { %3561 = vmatprep.subr.bf16.mxu0 %v4116_v1 }
 0xebb   : > { %v1931_v0 = vpop.f32.mrb[20].mxu0 }
 0xebc   : > { %v1938_v2 = vrot.slane %v1931_v0, 5  ;;  %v3535_v5 = vpop.f32.mrb[21].mxu0 }
 0xebd   : > { %v1934_v8 = vpop.f32.mrb[22].mxu0 }
 0xebe   : > { %v1940_v4 = vadd.f32 %v1938_v2, %v4661_v27  ;;  %v3536_v10 = vpop.f32.mrb[23].mxu0 }
 0xec0   : > { %3900 = vtanh.f32 %v1940_v4  ;;  %v3331_v12 = vmul.f32 -1.442695, %v1940_v4 }
 0xec2   : > { %3902 = vpow2.f32 %v3331_v12 }
 0xeca   : > { %v3901_v11 = vpop.eup %3900 }
 0xecb   : > { %1953 = vrot.lane.b32.xlu0 %v3901_v11, %s4133_s16 }
 0xecc   : > { %v3903_v13 = vpop.eup %3902 }
 0xecd   : > { %v1944_v14 = vadd.f32 1.0, %v3903_v13 }
 0xecf   : > { %3904 = vrcp.f32 %v1944_v14 }
 0xed9   : > { %v3905_v15 = vpop.eup %3904 }
 0xeda   : > { %v1951_v20 = vmul.f32 %v3905_v15, %v1949_v19 }
 0xf3d   : > { %v1954_v16 = vpop.permute.xlu0 %1953 }
 0xf3e   : > { %v1956_v17 = vmul.f32 %v3905_v15, %v1954_v16 }
 0xf40   : > { %1958 = vrot.lane.b32.xlu1 %v1956_v17, %s5117_s7 }
 0xfb2   : > { %v1959_v21 = vpop.permute.xlu1 %1958 }
 0xfb3   : > { %v1961_v22 = vadd.f32 %v1959_v21, %v1951_v20 }
 0xfb5   : > { %3906 = vtanh.f32 %v1961_v22  ;;  %v2030_v49 = vrot.slane %v1961_v22, 7 }
 0xfbf   : > { %v3907_v24 = vpop.eup %3906 }
 0xfc0   : > { %1964 = vrot.lane.b32.xlu0 %v3907_v24, %s4133_s16 }
0x1032   : > { %v1965_v3 = vpop.permute.xlu0 %1964 }
0x1033   : > { %v4732_v25 = vmul.f32 %v3905_v15, %v1965_v3 }
0x1035   : > { %v1968_v28 = vpack.c.bf16 %v4732_v25, %v4732_v25 }
0x1037   : > { %v1970_v29 = vshrl.u32 %v1968_v28, 16 }
0x1039   : > { %v1972_v30 = vrot.slane %v1970_v29, 1 }
0x103b   : > { %1973 = vrot.lane.b32.xlu1 %v1972_v30, %s5117_s7 }
0x10ad   : > { %v1974_v31 = vpop.permute.xlu1 %1973 }
0x10ae   : > { %3542 = vmatmul.mubr.msk.bf16.vlgmr.msra.gmra.mrb[28].mxu1 %vm1083_vm7, %v1974_v31 }
0x10af   : > { %3554 = vmatpush3.bf16.msra.mxu1 %v4629_v60  ;;  %3557 = vmatprep.mubr.msk.bf16.mxu1 %vm4117_vm0, %v4116_v1 }
0x10b0   : > { %3555 = vmatprep.subr.bf16.mxu1 %v4116_v1 }
0x10b3   : > { %3556 = vmatpush3.bf16.msra.mxu1 %v4636_v23 }
0x10b4   : > { %3569 = vmatprep.subr.bf16.mxu1 %v4116_v1 }
0x1181   : > { %v2012_v32 = vpop.f32.mrb[28].mxu1 }
0x1182   : > { %v2019_v34 = vrot.slane %v2012_v32, 4  ;;  %v3543_v35 = vpop.f32.mrb[29].mxu1 }
0x1183   : > { %v2015_v36 = vpop.f32.mrb[30].mxu1 }
0x1184   : > { %v2021_v38 = vadd.f32 %v2019_v34, %v4661_v27  ;;  %v3544_v39 = vpop.f32.mrb[31].mxu1 }
0x1186   : > { %3908 = vtanh.f32 %v2021_v38  ;;  %v3333_v43 = vmul.f32 -1.442695, %v2021_v38 }
0x1188   : > { %3910 = vpow2.f32 %v3333_v43 }
0x1190   : > { %v3909_v40 = vpop.eup %3908 }
0x1191   : > { %2034 = vrot.lane.b32.xlu0 %v3909_v40, %s4133_s16 }
0x1192   : > { %v3911_v44 = vpop.eup %3910 }
0x1193   : > { %v2025_v45 = vadd.f32 1.0, %v3911_v44 }
0x1195   : > { %3912 = vrcp.f32 %v2025_v45 }
0x119f   : > { %v3913_v46 = vpop.eup %3912 }
0x11a0   : > { %v2032_v41 = vmul.f32 %v3913_v46, %v2030_v49 }
0x1203   : > { %v2035_v47 = vpop.permute.xlu0 %2034 }
0x1204   : > { %v2037_v48 = vmul.f32 %v3913_v46, %v2035_v47 }
0x1206   : > { %2039 = vrot.lane.b32.xlu1 %v2037_v48, %s5117_s7 }
0x1278   : > { %v2040_v50 = vpop.permute.xlu1 %2039 }
0x1279   : > { %v2042_v51 = vadd.f32 %v2040_v50, %v2032_v41 }
0x127b   : > { %3914 = vtanh.f32 %v2042_v51  ;;  %v2109_v13 = vrot.slane %v2042_v51, 7 }
0x1285   : > { %v3915_v53 = vpop.eup %3914 }
0x1286   : > { %2045 = vrot.lane.b32.xlu0 %v3915_v53, %s4133_s16 }
0x12f8   : > { %v2046_v54 = vpop.permute.xlu0 %2045 }
0x12f9   : > { %v4748_v55 = vmul.f32 %v3913_v46, %v2046_v54 }
0x12fb   : > { %v2049_v56 = vpack.c.bf16 %v4748_v55, %v4748_v55 }
0x12fd   : > { %v2051_v6 = vrot.slane %v2049_v56, 2 }
0x12ff   : > { %2052 = vrot.lane.b32.xlu1 %v2051_v6, %s5117_s7 }
0x1371   : > { %v2053_v57 = vpop.permute.xlu1 %2052 }
0x1372   : > { %3550 = vmatmul.mubr.msk.bf16.vlgmr.msra.gmra.mrb[24].mxu0 %vm1083_vm7, %v2053_v57 }
0x1373   : > { %3562 = vmatpush3.bf16.msra.mxu0 %v4629_v60  ;;  %3565 = vmatprep.mubr.msk.bf16.mxu0 %vm4117_vm0, %v4116_v1 }
0x1374   : > { %3563 = vmatprep.subr.bf16.mxu0 %v4116_v1 }
0x1377   : > { %3564 = vmatpush3.bf16.msra.mxu0 %v4636_v23 }
0x1378   : > { %3577 = vmatprep.subr.bf16.mxu0 %v4116_v1 }
0x1445   : > { %v2091_v59 = vpop.f32.mrb[24].mxu0 }
0x1446   : > { %v2098_v42 = vrot.slane %v2091_v59, 3  ;;  %v3551_v61 = vpop.f32.mrb[25].mxu0 }
0x1447   : > { %v2094_v0 = vpop.f32.mrb[26].mxu0 }
0x1448   : > { %v2100_v2 = vadd.f32 %v2098_v42, %v4661_v27  ;;  %v3552_v5 = vpop.f32.mrb[27].mxu0 }
0x144a   : > { %3916 = vtanh.f32 %v2100_v2  ;;  %v3335_v60 = vmul.f32 -1.442695, %v2100_v2 }
0x144c   : > { %3918 = vpow2.f32 %v3335_v60 }
0x1454   : > { %v3917_v8 = vpop.eup %3916 }
0x1455   : > { %2113 = vrot.lane.b32.xlu0 %v3917_v8, %s4133_s16 }
0x1456   : > { %v3919_v4 = vpop.eup %3918 }
0x1457   : > { %v2104_v10 = vadd.f32 1.0, %v3919_v4 }
0x1459   : > { %3920 = vrcp.f32 %v2104_v10 }
0x1463   : > { %v3921_v11 = vpop.eup %3920 }
0x1464   : > { %v2111_v14 = vmul.f32 %v3921_v11, %v2109_v13 }
0x14c7   : > { %v2114_v23 = vpop.permute.xlu0 %2113 }
0x14c8   : > { %v2116_v12 = vmul.f32 %v3921_v11, %v2114_v23 }
0x14ca   : > { %2118 = vrot.lane.b32.xlu1 %v2116_v12, %s5117_s7 }
0x153c   : > { %v2119_v15 = vpop.permute.xlu1 %2118 }
0x153d   : > { %v2121_v16 = vadd.f32 %v2119_v15, %v2111_v14 }
0x153f   : > { %3922 = vtanh.f32 %v2121_v16  ;;  %v2190_v45 = vrot.slane %v2121_v16, 7 }
0x1549   : > { %v3923_v17 = vpop.eup %3922 }
0x154a   : > { %2124 = vrot.lane.b32.xlu0 %v3923_v17, %s4133_s16  ;;  %v2323_v17 = vrot.slane %v4748_v55, 1 }
0x15bc   : > { %v2125_v19 = vpop.permute.xlu0 %2124 }
0x15bd   : > { %v4764_v20 = vmul.f32 %v3921_v11, %v2125_v19 }
0x15bf   : > { %v2128_v21 = vpack.c.bf16 %v4764_v20, %v4764_v20  ;;  %v2313_v10 = vrot.slane %v4764_v20, 3 }
0x15c1   : > { %v2130_v22 = vshrl.u32 %v2128_v21, 16  ;;  %v3751_v23 = vpack.i.bf16 %v2313_v10, %v4716_v58  ;;  %v3756_v21 = vpack.i.bf16 %v2323_v17, %v4732_v25 }
0x15c3   : > { %v2132_v24 = vrot.slane %v2130_v22, 2  ;;  %v2339_v22 = vrot.slane %v4716_v58, 5 }
0x15c5   : > { %2133 = vrot.lane.b32.xlu1 %v2132_v24, %s5117_s7  ;;  %v3771_v24 = vpack.i.bf16 %v2339_v22, %v4764_v20 }
0x1637   : > { %v2134_v3 = vpop.permute.xlu1 %2133 }
0x1638   : > { %3558 = vmatmul.mubr.msk.bf16.vlgmr.msra.gmra.mrb[32].mxu1 %vm1083_vm7, %v2134_v3 }
0x1639   : > { %3573 = vmatprep.mubr.msk.bf16.mxu1 %vm4117_vm0, %v4116_v1 }
0x170b   : > { %v2172_v28 = vpop.f32.mrb[32].mxu1 }
0x170c   : > { %v2179_v29 = vrot.slane %v2172_v28, 2  ;;  %v3559_v30 = vpop.f32.mrb[33].mxu1  ;;  %v2355_v28 = vrot.slane %v4674_v62, 1 }
0x170d   : > { %v2175_v31 = vpop.f32.mrb[34].mxu1  ;;  %v3848_v30 = vld [vmem:[%s5063_s9] sm:$0xff]  }
0x170e   : > { %v2181_v32 = vadd.f32 %v2179_v29, %v4661_v27  ;;  %v3560_v34 = vpop.f32.mrb[35].mxu1  ;;  %v4807_v31 = vld [vmem:[%s5064_s10] sm:$0xff]   ;;  %3570 = vmatpush3.bf16.msra.mxu1 %v3848_v30 }
0x170f   : > { %3571 = vmatprep.subr.bf16.mxu1 %v4116_v1  ;;  %v4817_v34 = vld [vmem:[%s5064_s10 + $0x8] sm:$0xff]  }
0x1710   : > { %3924 = vtanh.f32 %v2181_v32  ;;  %v3337_v36 = vmul.f32 -1.442695, %v2181_v32 }
0x1712   : > { %3926 = vpow2.f32 %v3337_v36  ;;  %v3850_v36 = vld [vmem:[%s5063_s9 + $0x8] sm:$0xff]  }
0x1713   : > { %3572 = vmatpush3.bf16.msra.mxu1 %v3850_v36 }
0x1714   : > { %3585 = vmatprep.subr.bf16.mxu1 %v4116_v1 }
0x171a   : > { %v3925_v35 = vpop.eup %3924 }
0x171b   : > { %2194 = vrot.lane.b32.xlu0 %v3925_v35, %s4133_s16  ;;  %v2331_v35 = vrot.slane %v4732_v25, 7 }
0x171c   : > { %v3927_v38 = vpop.eup %3926 }
0x171d   : > { %v2185_v39 = vadd.f32 1.0, %v3927_v38  ;;  %v3766_v38 = vpack.i.bf16 %v2331_v35, %v4748_v55 }
0x171f   : > { %3928 = vrcp.f32 %v2185_v39 }
0x1729   : > { %v3929_v40 = vpop.eup %3928 }
0x172a   : > { %v2192_v46 = vmul.f32 %v3929_v40, %v2190_v45 }
0x178d   : > { %v2195_v43 = vpop.permute.xlu0 %2194 }
0x178e   : > { %v2197_v44 = vmul.f32 %v3929_v40, %v2195_v43 }
0x1790   : > { %2199 = vrot.lane.b32.xlu1 %v2197_v44, %s5117_s7 }
0x1802   : > { %v2200_v47 = vpop.permute.xlu1 %2199 }
0x1803   : > { %v2202_v48 = vadd.f32 %v2200_v47, %v2192_v46 }
0x1805   : > { %3930 = vtanh.f32 %v2202_v48 }
0x180f   : > { %v3931_v49 = vpop.eup %3930 }
0x1810   : > { %2205 = vrot.lane.b32.xlu0 %v3931_v49, %s4133_s16 }
0x1882   : > { %v2206_v41 = vpop.permute.xlu0 %2205 }
0x1883   : > { %v4776_v50 = vmul.f32 %v3929_v40, %v2206_v41 }
0x1885   : > { %v2209_v51 = vpack.c.bf16 %v4776_v50, %v4776_v50  ;;  %v2303_v15 = vrot.slane %v4776_v50, 5 }
0x1887   : > { %v2211_v53 = vrot.slane %v2209_v51, 3  ;;  %v3746_v19 = vpack.i.bf16 %v2303_v15, %v4700_v33 }
0x1889   : > { %2212 = vrot.lane.b32.xlu1 %v2211_v53, %s5117_s7 }
0x18fb   : > { %v2213_v54 = vpop.permute.xlu1 %2212 }
0x18fc   : > { %3566 = vmatmul.mubr.msk.bf16.vlgmr.msra.gmra.mrb[28].mxu0 %vm1083_vm7, %v2213_v54 }
0x18fd   : > { %3581 = vmatprep.mubr.msk.bf16.mxu0 %vm4117_vm0, %v4116_v1  ;;  %3578 = vmatpush3.bf16.msra.mxu0 %v4807_v31 }
0x18fe   : > { %3579 = vmatprep.subr.bf16.mxu0 %v4116_v1 }
0x1901   : > { %3580 = vmatpush3.bf16.msra.mxu0 %v4817_v34 }
0x1902   : > { %3593 = vmatprep.subr.bf16.mxu0 %v4116_v1 }
0x1904   : > { %3582 = vmatmul.mubr.bf16.vlgmr.msra.gmra.mrb[32].mxu0 %v4132_v9 }
0x1905   : > { %3594 = vmatpush3.bf16.msra.mxu0 %v4807_v31  ;;  %3597 = vmatprep.mubr.msk.bf16.mxu0 %vm4117_vm0, %v4116_v1 }
0x1906   : > { %3595 = vmatprep.subr.bf16.mxu0 %v4116_v1 }
0x1909   : > { %3596 = vmatpush3.bf16.msra.mxu0 %v4817_v34 }
0x190a   : > { %3609 = vmatprep.subr.bf16.mxu0 %v4116_v1 }
0x19cf   : > { %v2251_v56 = vpop.f32.mrb[28].mxu0 }
0x19d0   : > { %v2258_v6 = vrot.slane %v2251_v56, 1  ;;  %v3567_v57 = vpop.f32.mrb[29].mxu0 }
0x19d1   : > { %v2254_v59 = vpop.f32.mrb[30].mxu0 }
0x19d2   : > { %v2260_v42 = vadd.f32 %v2258_v6, %v4661_v27  ;;  %v3568_v61 = vpop.f32.mrb[31].mxu0  ;;  %v2269_v27 = vrot.slane %v2202_v48, 7 }
0x19d4   : > { %3932 = vtanh.f32 %v2260_v42  ;;  %v3339_v2 = vmul.f32 -1.442695, %v2260_v42 }
0x19d6   : > { %3934 = vpow2.f32 %v3339_v2 }
0x19de   : > { %v3933_v0 = vpop.eup %3932 }
0x19df   : > { %2273 = vrot.lane.b32.xlu0 %v3933_v0, %s4133_s16 }
0x19e0   : > { %v3935_v5 = vpop.eup %3934 }
0x19e1   : > { %v2264_v8 = vadd.f32 1.0, %v3935_v5 }
0x19e3   : > { %3936 = vrcp.f32 %v2264_v8 }
0x19ed   : > { %v3937_v60 = vpop.eup %3936 }
0x19ee   : > { %v2271_v12 = vmul.f32 %v3937_v60, %v2269_v27 }
0x1a51   : > { %v2274_v4 = vpop.permute.xlu0 %2273 }
0x1a52   : > { %v2276_v11 = vmul.f32 %v3937_v60, %v2274_v4 }
0x1a54   : > { %2278 = vrot.lane.b32.xlu1 %v2276_v11, %s5117_s7 }
0x1a58   : > { %3752 = vrot.lane.b32.xlu1 %v3751_v23, %s5117_s7 }
0x1ac6   : > { %v2279_v13 = vpop.permute.xlu1 %2278 }
0x1ac7   : > { %v2281_v14 = vadd.f32 %v2279_v13, %v2271_v12 }
0x1ac9   : > { %3938 = vtanh.f32 %v2281_v14 }
0x1aca   : > { %v3753_v39 = vpop.permute.xlu1 %3752 }
0x1acb   : > { %v3755_v43 = vunpack.i.h.bf16 %v3753_v39  ;;  %v3754_v44 = vunpack.i.l.bf16 %v3753_v39 }
0x1acd   : > { %v2317_v53 = vsel %vm1081_vm6, %v3754_v44, %v3755_v43 }
0x1ad3   : > { %v3939_v16 = vpop.eup %3938 }
0x1ad4   : > { %2284 = vrot.lane.b32.xlu0 %v3939_v16, %s4133_s16 }
0x1ad8   : > { %3747 = vrot.lane.b32.xlu0 %v3746_v19, %s5117_s7 }
0x1adc   : > { %3757 = vrot.lane.b32.xlu0 %v3756_v21, %s5117_s7  ;;  %v2484_v21 = vpop.f32.mrb[32].mxu0 }
0x1add   : > { %v3583_v22 = vpop.f32.mrb[33].mxu0 }
0x1ae0   : > { %3772 = vrot.lane.b32.xlu0 %v3771_v24, %s5117_s7  ;;  %v2487_v24 = vpop.f32.mrb[34].mxu0 }
0x1b46   : > { %v2285_v3 = vpop.permute.xlu0 %2284 }
0x1b47   : > { %v2287_v29 = vmul.f32 %v3937_v60, %v2285_v3  ;;  %v3584_v3 = vpop.f32.mrb[35].mxu0 }
0x1b49   : > { %v3781_v58 = vpack.i.bf16 %v2355_v28, %v2287_v29  ;;  %v2293_v32 = vrot.slane %v2287_v29, 7  ;;  %v3340_v28 = vld [vmem:[%s5119_s27] ss:$0 sm:$0xff] }
0x1b4b   : > { %3782 = vrot.lane.b32.xlu0 %v3781_v58, %s5117_s7  ;;  %v3761_v20 = vpack.i.bf16 %v2293_v32, %v4674_v62  ;;  %v2347_v62 = vrot.slane %v4700_v33, 3  ;;  %v3748_v33 = vpop.permute.xlu0 %3747 }
0x1b4c   : > { %v3750_v40 = vunpack.i.h.bf16 %v3748_v33  ;;  %v3749_v9 = vunpack.i.l.bf16 %v3748_v33 }
0x1b4d   : > { %3762 = vrot.lane.b32.xlu1 %v3761_v20, %s5117_s7  ;;  %v3776_v25 = vpack.i.bf16 %v2347_v62, %v4776_v50 }
0x1b4e   : > { %v2307_v50 = vsel %vm1081_vm6, %v3749_v9, %v3750_v40 }
0x1b4f   : > { %v3758_v55 = vpop.permute.xlu0 %3757 }
0x1b50   : > { %v3760_v46 = vunpack.i.h.bf16 %v3758_v55  ;;  %v3759_v47 = vunpack.i.l.bf16 %v3758_v55 }
0x1b51   : > { %3767 = vrot.lane.b32.xlu1 %v3766_v38, %s5117_s7 }
0x1b52   : > { %v2327_v6 = vsel %vm1081_vm6, %v3759_v47, %v3760_v46 }
0x1b53   : > { %v3773_v48 = vpop.permute.xlu0 %3772 }
0x1b54   : > { %v3775_v0 = vunpack.i.h.bf16 %v3773_v48  ;;  %v3774_v2 = vunpack.i.l.bf16 %v3773_v48 }
0x1b55   : > { %3777 = vrot.lane.b32.xlu1 %v3776_v25, %s5117_s7 }
0x1b56   : > { %v2343_v12 = vsel %vm1081_vm6, %v3774_v2, %v3775_v0 }
0x1bbd   : > { %v3783_v57 = vpop.permute.xlu0 %3782 }
0x1bbe   : > { %v3785_v60 = vunpack.i.h.bf16 %v3783_v57  ;;  %v3784_v4 = vunpack.i.l.bf16 %v3783_v57 }
0x1bbf   : > { %v3763_v45 = vpop.permute.xlu1 %3762 }
0x1bc0   : > { %v3765_v49 = vunpack.i.h.bf16 %v3763_v45  ;;  %v3764_v41 = vunpack.i.l.bf16 %v3763_v45  ;;  %v2359_v15 = vsel %vm1081_vm6, %v3784_v4, %v3785_v60 }
0x1bc2   : > { %v2297_v51 = vsel %vm1081_vm6, %v3764_v41, %v3765_v49 }
0x1bc3   : > { %v2360_v54 = vsel %vm1044_vm4, %v2297_v51, %v2307_v50  ;;  %v3768_v56 = vpop.permute.xlu1 %3767 }
0x1bc4   : > { %v2361_v59 = vsel %vm1312_vm5, %v2360_v54, %v2317_v53  ;;  %v3770_v42 = vunpack.i.h.bf16 %v3768_v56  ;;  %v3769_v61 = vunpack.i.l.bf16 %v3768_v56 }
0x1bc5   : > { %v2362_v5 = vsel %vm1611_vm12, %v2361_v59, %v2327_v6 }
0x1bc6   : > { %v2335_v8 = vsel %vm1081_vm6, %v3769_v61, %v3770_v42 }
0x1bc7   : > { %v2363_v10 = vsel %vm864_vm2, %v2362_v5, %v2335_v8  ;;  %v3778_v11 = vpop.permute.xlu1 %3777 }
0x1bc8   : > { %v3780_v23 = vunpack.i.h.bf16 %v3778_v11  ;;  %v3779_v27 = vunpack.i.l.bf16 %v3778_v11  ;;  %v2364_v14 = vsel %vm1614_vm13, %v2363_v10, %v2343_v12 }
0x1bca   : > { %v2351_v13 = vsel %vm1081_vm6, %v3779_v27, %v3780_v23 }
0x1bcb   : > { %v2365_v16 = vsel %vm1616_vm14, %v2364_v14, %v2351_v13 }
0x1bcc   : > { %v2366_v17 = vsel %vm1618_vm15, %v2365_v16, %v2359_v15 }
0x1bcd   : > { %v2367_v19 = vpack.c.bf16 %v2366_v17, %v2366_v17 }
0x1bcf   : > { %3574 = vmatmul.mubr.msk.bf16.vlgmr.msra.gmra.mrb[36].mxu1 %vm1083_vm7, %v2367_v19 }
0x1bd0   : > { %3586 = vmatpush3.bf16.msra.mxu1 %v4807_v31  ;;  %3589 = vmatprep.mubr.msk.bf16.mxu1 %vm4117_vm0, %v4116_v1 }
0x1bd1   : > { %3587 = vmatprep.subr.bf16.mxu1 %v4116_v1 }
0x1bd4   : > { %3588 = vmatpush3.bf16.msra.mxu1 %v4817_v34 }
0x1bd5   : > { %3601 = vmatprep.subr.bf16.mxu1 %v4116_v1 }
0x1ca2   : > { %v2428_v29 = vpop.f32.mrb[36].mxu1 }
0x1ca3   : > { %v4864_v30 = vadd.f32 %v3340_v28, %v2428_v29  ;;  %v3575_v58 = vpop.f32.mrb[37].mxu1 }
0x1ca4   : > { %v2431_v32 = vpop.f32.mrb[38].mxu1 }
0x1ca5   : > { %v3576_v20 = vpop.f32.mrb[39].mxu1  ;;  %v2490_v35 = vadd.f32 %v2484_v21, %v4864_v30 }
0x1ca7   : > { %3940 = vtanh.f32 %v2490_v35  ;;  %v3346_v38 = vmul.f32 -1.442695, %v2490_v35 }
0x1ca9   : > { %3942 = vpow2.f32 %v3346_v38 }
0x1cb1   : > { %v3941_v36 = vpop.eup %3940 }
0x1cb2   : > { %2500 = vrot.lane.b32.xlu1 %v3941_v36, %s4133_s16 }
0x1cb3   : > { %v3943_v62 = vpop.eup %3942 }
0x1cb4   : > { %v2494_v25 = vadd.f32 1.0, %v3943_v62 }
0x1cb6   : > { %3944 = vrcp.f32 %v2494_v25 }
0x1cc0   : > { %v3945_v33 = vpop.eup %3944 }
0x1cc1   : > { %v2498_v40 = vmul.f32 0.0, %v3945_v33 }
0x1d24   : > { %v2501_v55 = vpop.permute.xlu1 %2500 }
0x1d25   : > { %v2503_v39 = vmul.f32 %v3945_v33, %v2501_v55 }
0x1d27   : > { %2505 = vrot.lane.b32.xlu0 %v2503_v39, %s5117_s7 }
0x1d99   : > { %v2506_v9 = vpop.permute.xlu0 %2505 }
0x1d9a   : > { %v2508_v43 = vadd.f32 %v2506_v9, %v2498_v40 }
0x1d9c   : > { %3946 = vtanh.f32 %v2508_v43  ;;  %v2574_v2 = vrot.slane %v2508_v43, 7 }
0x1da6   : > { %v3947_v44 = vpop.eup %3946 }
0x1da7   : > { %2511 = vrot.lane.b32.xlu1 %v3947_v44, %s4133_s16 }
0x1e19   : > { %v2512_v45 = vpop.permute.xlu1 %2511 }
0x1e1a   : > { %v2514_v46 = vmul.f32 %v3945_v33, %v2512_v45 }
0x1e1c   : > { %v2515_v47 = vpack.c.bf16 %v2514_v46, %v2514_v46 }
0x1e1e   : > { %2517 = vrot.lane.b32.xlu0 %v2515_v47, %s5117_s7 }
0x1e90   : > { %v2518_v48 = vpop.permute.xlu0 %2517 }
0x1e91   : > { %3590 = vmatmul.mubr.msk.bf16.vlgmr.msra.gmra.mrb[40].mxu1 %vm1083_vm7, %v2518_v48 }
0x1e92   : > { %3602 = vmatpush3.bf16.msra.mxu1 %v4807_v31  ;;  %3605 = vmatprep.mubr.msk.bf16.mxu1 %vm4117_vm0, %v4116_v1 }
0x1e93   : > { %3603 = vmatprep.subr.bf16.mxu1 %v4116_v1 }
0x1e96   : > { %3604 = vmatpush3.bf16.msra.mxu1 %v4817_v34 }
0x1e97   : > { %3617 = vmatprep.subr.bf16.mxu1 %v4116_v1 }
0x1f64   : > { %v2556_v49 = vpop.f32.mrb[40].mxu1 }
0x1f65   : > { %v2563_v41 = vrot.slane %v2556_v49, 7  ;;  %v3591_v50 = vpop.f32.mrb[41].mxu1 }
0x1f66   : > { %v2559_v51 = vpop.f32.mrb[42].mxu1 }
0x1f67   : > { %v2565_v53 = vadd.f32 %v2563_v41, %v4864_v30  ;;  %v3592_v54 = vpop.f32.mrb[43].mxu1 }
0x1f69   : > { %3948 = vtanh.f32 %v2565_v53  ;;  %v3348_v6 = vmul.f32 -1.442695, %v2565_v53 }
0x1f6b   : > { %3950 = vpow2.f32 %v3348_v6 }
0x1f73   : > { %v3949_v56 = vpop.eup %3948 }
0x1f74   : > { %2578 = vrot.lane.b32.xlu1 %v3949_v56, %s4133_s16 }
0x1f75   : > { %v3951_v57 = vpop.eup %3950 }
0x1f76   : > { %v2569_v59 = vadd.f32 1.0, %v3951_v57 }
0x1f78   : > { %3952 = vrcp.f32 %v2569_v59 }
0x1f82   : > { %v3953_v42 = vpop.eup %3952 }
0x1f83   : > { %v2576_v5 = vmul.f32 %v3953_v42, %v2574_v2 }
0x1fe6   : > { %v2579_v61 = vpop.permute.xlu1 %2578 }
0x1fe7   : > { %v2581_v0 = vmul.f32 %v3953_v42, %v2579_v61 }
0x1fe9   : > { %2583 = vrot.lane.b32.xlu0 %v2581_v0, %s5117_s7 }
0x205b   : > { %v2584_v8 = vpop.permute.xlu0 %2583 }
0x205c   : > { %v2586_v60 = vadd.f32 %v2584_v8, %v2576_v5 }
0x205e   : > { %3954 = vtanh.f32 %v2586_v60  ;;  %v2654_v32 = vrot.slane %v2586_v60, 7 }
0x2068   : > { %v3955_v4 = vpop.eup %3954 }
0x2069   : > { %2589 = vrot.lane.b32.xlu1 %v3955_v4, %s4133_s16 }
0x20db   : > { %v2590_v10 = vpop.permute.xlu1 %2589 }
0x20dc   : > { %v2592_v11 = vmul.f32 %v3953_v42, %v2590_v10 }
0x20de   : > { %v2593_v23 = vpack.c.bf16 %v2592_v11, %v2592_v11 }
0x20e0   : > { %v2595_v27 = vshrl.u32 %v2593_v23, 16 }
0x20e2   : > { %2597 = vrot.lane.b32.xlu0 %v2595_v27, %s5117_s7 }
0x2154   : > { %v2598_v12 = vpop.permute.xlu0 %2597 }
0x2155   : > { %3598 = vmatmul.mubr.msk.bf16.vlgmr.msra.gmra.mrb[36].mxu0 %vm1083_vm7, %v2598_v12 }
0x2156   : > { %3610 = vmatpush3.bf16.msra.mxu0 %v4807_v31  ;;  %3613 = vmatprep.mubr.msk.bf16.mxu0 %vm4117_vm0, %v4116_v1 }
0x2157   : > { %3611 = vmatprep.subr.bf16.mxu0 %v4116_v1 }
0x215a   : > { %3612 = vmatpush3.bf16.msra.mxu0 %v4817_v34 }
0x215b   : > { %3625 = vmatprep.subr.bf16.mxu0 %v4116_v1 }
0x2228   : > { %v2636_v13 = vpop.f32.mrb[36].mxu0 }
0x2229   : > { %v2643_v14 = vrot.slane %v2636_v13, 6  ;;  %v3599_v15 = vpop.f32.mrb[37].mxu0 }
0x222a   : > { %v2639_v16 = vpop.f32.mrb[38].mxu0 }
0x222b   : > { %v2645_v17 = vadd.f32 %v2643_v14, %v4864_v30  ;;  %v3600_v19 = vpop.f32.mrb[39].mxu0 }
0x222d   : > { %3956 = vtanh.f32 %v2645_v17  ;;  %v3350_v22 = vmul.f32 -1.442695, %v2645_v17 }
0x222f   : > { %3958 = vpow2.f32 %v3350_v22 }
0x2237   : > { %v3957_v21 = vpop.eup %3956 }
0x2238   : > { %2658 = vrot.lane.b32.xlu1 %v3957_v21, %s4133_s16 }
0x2239   : > { %v3959_v24 = vpop.eup %3958 }
0x223a   : > { %v2649_v3 = vadd.f32 1.0, %v3959_v24 }
0x223c   : > { %3960 = vrcp.f32 %v2649_v3 }
0x2246   : > { %v3961_v28 = vpop.eup %3960 }
0x2247   : > { %v2656_v20 = vmul.f32 %v3961_v28, %v2654_v32 }
0x22aa   : > { %v2659_v29 = vpop.permute.xlu1 %2658 }
0x22ab   : > { %v2661_v58 = vmul.f32 %v3961_v28, %v2659_v29 }
0x22ad   : > { %2663 = vrot.lane.b32.xlu0 %v2661_v58, %s5117_s7 }
0x231f   : > { %v2664_v35 = vpop.permute.xlu0 %2663 }
0x2320   : > { %v2666_v36 = vadd.f32 %v2664_v35, %v2656_v20 }
0x2322   : > { %3962 = vtanh.f32 %v2666_v36  ;;  %v2733_v54 = vrot.slane %v2666_v36, 7 }
0x232c   : > { %v3963_v38 = vpop.eup %3962 }
0x232d   : > { %2669 = vrot.lane.b32.xlu1 %v3963_v38, %s4133_s16 }
0x239f   : > { %v2670_v62 = vpop.permute.xlu1 %2669 }
0x23a0   : > { %v2672_v25 = vmul.f32 %v3961_v28, %v2670_v62 }
0x23a2   : > { %v2673_v33 = vpack.c.bf16 %v2672_v25, %v2672_v25 }
0x23a4   : > { %v2675_v55 = vrot.slane %v2673_v33, 1 }
0x23a6   : > { %2676 = vrot.lane.b32.xlu0 %v2675_v55, %s5117_s7 }
0x2418   : > { %v2677_v39 = vpop.permute.xlu0 %2676 }
0x2419   : > { %3606 = vmatmul.mubr.msk.bf16.vlgmr.msra.gmra.mrb[44].mxu1 %vm1083_vm7, %v2677_v39 }
0x241a   : > { %3618 = vmatpush3.bf16.msra.mxu1 %v4807_v31  ;;  %3621 = vmatprep.mubr.msk.bf16.mxu1 %vm4117_vm0, %v4116_v1 }
0x241b   : > { %3619 = vmatprep.subr.bf16.mxu1 %v4116_v1 }
0x241e   : > { %3620 = vmatpush3.bf16.msra.mxu1 %v4817_v34 }
0x241f   : > { %3633 = vmatprep.subr.bf16.mxu1 %v4116_v1 }
0x24ec   : > { %v2715_v40 = vpop.f32.mrb[44].mxu1 }
0x24ed   : > { %v2722_v9 = vrot.slane %v2715_v40, 5  ;;  %v3607_v43 = vpop.f32.mrb[45].mxu1 }
0x24ee   : > { %v2718_v44 = vpop.f32.mrb[46].mxu1 }
0x24ef   : > { %v2724_v45 = vadd.f32 %v2722_v9, %v4864_v30  ;;  %v3608_v46 = vpop.f32.mrb[47].mxu1 }
0x24f1   : > { %3964 = vtanh.f32 %v2724_v45  ;;  %v3352_v48 = vmul.f32 -1.442695, %v2724_v45 }
0x24f3   : > { %3966 = vpow2.f32 %v3352_v48 }
0x24fb   : > { %v3965_v47 = vpop.eup %3964 }
0x24fc   : > { %2737 = vrot.lane.b32.xlu1 %v3965_v47, %s4133_s16 }
0x24fd   : > { %v3967_v49 = vpop.eup %3966 }
0x24fe   : > { %v2728_v41 = vadd.f32 1.0, %v3967_v49 }
0x2500   : > { %3968 = vrcp.f32 %v2728_v41 }
0x250a   : > { %v3969_v50 = vpop.eup %3968 }
0x250b   : > { %v2735_v56 = vmul.f32 %v3969_v50, %v2733_v54 }
0x256e   : > { %v2738_v51 = vpop.permute.xlu1 %2737 }
0x256f   : > { %v2740_v53 = vmul.f32 %v3969_v50, %v2738_v51 }
0x2571   : > { %2742 = vrot.lane.b32.xlu0 %v2740_v53, %s5117_s7 }
0x25e3   : > { %v2743_v6 = vpop.permute.xlu0 %2742 }
0x25e4   : > { %v2745_v57 = vadd.f32 %v2743_v6, %v2735_v56 }
0x25e6   : > { %3970 = vtanh.f32 %v2745_v57  ;;  %v2814_v21 = vrot.slane %v2745_v57, 7 }
0x25f0   : > { %v3971_v59 = vpop.eup %3970 }
0x25f1   : > { %2748 = vrot.lane.b32.xlu1 %v3971_v59, %s4133_s16 }
0x2663   : > { %v2749_v42 = vpop.permute.xlu1 %2748 }
0x2664   : > { %v2751_v61 = vmul.f32 %v3969_v50, %v2749_v42 }
0x2666   : > { %v2752_v0 = vpack.c.bf16 %v2751_v61, %v2751_v61 }
0x2668   : > { %v2754_v2 = vshrl.u32 %v2752_v0, 16 }
0x266a   : > { %v2756_v5 = vrot.slane %v2754_v2, 1 }
0x266c   : > { %2757 = vrot.lane.b32.xlu0 %v2756_v5, %s5117_s7 }
0x26de   : > { %v2758_v8 = vpop.permute.xlu0 %2757 }
0x26df   : > { %3614 = vmatmul.mubr.msk.bf16.vlgmr.msra.gmra.mrb[40].mxu0 %vm1083_vm7, %v2758_v8 }
0x26e0   : > { %3626 = vmatpush3.bf16.msra.mxu0 %v4807_v31  ;;  %3629 = vmatprep.mubr.msk.bf16.mxu0 %vm4117_vm0, %v4116_v1 }
0x26e1   : > { %3627 = vmatprep.subr.bf16.mxu0 %v4116_v1 }
0x26e4   : > { %3628 = vmatpush3.bf16.msra.mxu0 %v4817_v34 }
0x27b2   : > { %v2796_v60 = vpop.f32.mrb[40].mxu0 }
0x27b3   : > { %v2803_v4 = vrot.slane %v2796_v60, 4  ;;  %v3615_v10 = vpop.f32.mrb[41].mxu0 }
0x27b4   : > { %v2799_v11 = vpop.f32.mrb[42].mxu0 }
0x27b5   : > { %v2805_v23 = vadd.f32 %v2803_v4, %v4864_v30  ;;  %v3616_v27 = vpop.f32.mrb[43].mxu0 }
0x27b7   : > { %3972 = vtanh.f32 %v2805_v23  ;;  %v3354_v13 = vmul.f32 -1.442695, %v2805_v23  ;;  %v1570_v23 = vrot.slane %v4694_v7, 6 }
0x27b9   : > { %3974 = vpow2.f32 %v3354_v13 }
0x27c1   : > { %v3973_v12 = vpop.eup %3972 }
0x27c2   : > { %2818 = vrot.lane.b32.xlu1 %v3973_v12, %s4133_s16 }
0x27c3   : > { %v3975_v14 = vpop.eup %3974 }
0x27c4   : > { %v2809_v15 = vadd.f32 1.0, %v3975_v14  ;;  %v1226_v14 = vrot.slane %v4650_v26, 7 }
0x27c6   : > { %3976 = vrcp.f32 %v2809_v15  ;;  %v1572_v15 = vadd.f32 %v1570_v23, %v4581_v18 }
0x27d0   : > { %v3977_v16 = vpop.eup %3976 }
0x27d1   : > { %v2816_v22 = vmul.f32 %v3977_v16, %v2814_v21 }
0x2834   : > { %v2819_v17 = vpop.permute.xlu1 %2818 }
0x2835   : > { %v2821_v19 = vmul.f32 %v3977_v16, %v2819_v17 }
0x2837   : > { %2823 = vrot.lane.b32.xlu0 %v2821_v19, %s5117_s7 }
0x28a9   : > { %v2824_v24 = vpop.permute.xlu0 %2823 }
0x28aa   : > { %v2826_v3 = vadd.f32 %v2824_v24, %v2816_v22 }
0x28ac   : > { %3978 = vtanh.f32 %v2826_v3 }
0x28b6   : > { %v3979_v28 = vpop.eup %3978 }
0x28b7   : > { %2829 = vrot.lane.b32.xlu1 %v3979_v28, %s4133_s16 }
0x2929   : > { %v2830_v29 = vpop.permute.xlu1 %2829 }
0x292a   : > { %v2832_v58 = vmul.f32 %v3977_v16, %v2830_v29  ;;  %v1228_v16 = vadd.f32 %v1226_v14, %v4571_v63  ;;  %v3322_v63 = vmul.f32 -1.442695, %v1572_v15  ;;  %v3095_v14 = vld [vmem:[%s5068_s14 + $0x38] sm:$0xff] }
0x292c   : > { %v2833_v32 = vpack.c.bf16 %v2832_v58, %v2832_v58 }
0x292e   : > { %v2835_v20 = vrot.slane %v2833_v32, 2 }
0x2930   : > { %2836 = vrot.lane.b32.xlu0 %v2835_v20, %s5117_s7 }
0x29a2   : > { %v2837_v35 = vpop.permute.xlu0 %2836 }
0x29a3   : > { %3622 = vmatmul.mubr.msk.bf16.vlgmr.msra.gmra.mrb[48].mxu1 %vm1083_vm7, %v2837_v35 }
0x29a4   : > { %3634 = vmatpush3.bf16.msra.mxu1 %v4807_v31  ;;  %3637 = vmatprep.mubr.msk.bf16.mxu1 %vm4117_vm0, %v4116_v1 }
0x29a5   : > { %3635 = vmatprep.subr.bf16.mxu1 %v4116_v1 }
0x29a8   : > { %3636 = vmatpush3.bf16.msra.mxu1 %v4817_v34  ;;  %v2893_v34 = vrot.slane %v2826_v3, 7  ;;  %v3312_v3 = vmul.f32 -1.442695, %v1228_v16 }
0x2a76   : > { %v2875_v36 = vpop.f32.mrb[48].mxu1 }
0x2a77   : > { %v2882_v38 = vrot.slane %v2875_v36, 3  ;;  %v3623_v62 = vpop.f32.mrb[49].mxu1 }
0x2a78   : > { %v2878_v25 = vpop.f32.mrb[50].mxu1 }
0x2a79   : > { %v2884_v33 = vadd.f32 %v2882_v38, %v4864_v30  ;;  %v3624_v55 = vpop.f32.mrb[51].mxu1 }
0x2a7b   : > { %3980 = vtanh.f32 %v2884_v33  ;;  %v3356_v40 = vmul.f32 -1.442695, %v2884_v33 }
0x2a7d   : > { %3982 = vpow2.f32 %v3356_v40 }
0x2a85   : > { %v3981_v39 = vpop.eup %3980 }
0x2a86   : > { %2897 = vrot.lane.b32.xlu1 %v3981_v39, %s4133_s16 }
0x2a87   : > { %v3983_v31 = vpop.eup %3982 }
0x2a88   : > { %v2888_v9 = vadd.f32 1.0, %v3983_v31 }
0x2a8a   : > { %3984 = vrcp.f32 %v2888_v9 }
0x2a94   : > { %v3985_v43 = vpop.eup %3984 }
0x2a95   : > { %v2895_v46 = vmul.f32 %v3985_v43, %v2893_v34 }
0x2af8   : > { %v2898_v44 = vpop.permute.xlu1 %2897 }
0x2af9   : > { %v2900_v45 = vmul.f32 %v3985_v43, %v2898_v44 }
0x2afb   : > { %2902 = vrot.lane.b32.xlu0 %v2900_v45, %s5117_s7 }
0x2b6d   : > { %v2903_v47 = vpop.permute.xlu0 %2902 }
0x2b6e   : > { %v2905_v48 = vadd.f32 %v2903_v47, %v2895_v46  ;;  %v1581_v47 = vrot.slane %v4669_v52, 7 }
0x2b70   : > { %3986 = vtanh.f32 %v2905_v48 }
0x2b7a   : > { %v3987_v49 = vpop.eup %3986 }
0x2b7b   : > { %2908 = vrot.lane.b32.xlu1 %v3987_v49, %s4133_s16 }
0x2bed   : > { %v2909_v41 = vpop.permute.xlu1 %2908 }
0x2bee   : > { %v2911_v50 = vmul.f32 %v3985_v43, %v2909_v41 }
0x2bf0   : > { %v2912_v51 = vpack.c.bf16 %v2911_v50, %v2911_v50  ;;  %v1237_v50 = vrot.slane %v4588_v37, 7  ;;  %v3088_v37 = vld [vmem:[%s5068_s14] sm:$0xff] }
0x2bf2   : > { %v2914_v53 = vshrl.u32 %v2912_v51, 16 }
0x2bf4   : > { %v2916_v54 = vrot.slane %v2914_v53, 2 }
0x2bf6   : > { %2917 = vrot.lane.b32.xlu0 %v2916_v54, %s5117_s7 }
0x2c68   : > { %v2918_v56 = vpop.permute.xlu0 %2917 }
0x2c69   : > { %3630 = vmatmul.mubr.msk.bf16.vlgmr.msra.gmra.mrb[44].mxu0 %vm1083_vm7, %v2918_v56 }
0x2c6a   : > { %3665 = vmatprep.mubr.msk.f32.mxu0 %vm4117_vm0, %v4116_v1  ;;  %v2974_v1 = vrot.slane %v2905_v48, 7 }
0x2d3c   : > { %v2956_v6 = vpop.f32.mrb[44].mxu0 }
0x2d3d   : > { %v2963_v57 = vrot.slane %v2956_v6, 2  ;;  %v3631_v59 = vpop.f32.mrb[45].mxu0 }
0x2d3e   : > { %v2959_v42 = vpop.f32.mrb[46].mxu0 }
0x2d3f   : > { %v2965_v61 = vadd.f32 %v2963_v57, %v4864_v30  ;;  %v3632_v0 = vpop.f32.mrb[47].mxu0 }
0x2d40   : > { %v3089_v0 = vld [vmem:[%s5068_s14 + $0x8] sm:$0xff] }
0x2d41   : > { %3988 = vtanh.f32 %v2965_v61  ;;  %v3358_v5 = vmul.f32 -1.442695, %v2965_v61 }
0x2d43   : > { %3990 = vpow2.f32 %v3358_v5  ;;  %v4134_v5 = vmov 0.0|0.0  }
0x2d44   : > { %3668 = vmatprep.subr.bf16.mxu0 %v4134_v5 }
0x2d4b   : > { %v3989_v2 = vpop.eup %3988 }
0x2d4c   : > { %2978 = vrot.lane.b32.xlu1 %v3989_v2, %s4133_s16  ;;  %v3090_v2 = vld [vmem:[%s5068_s14 + $0x10] sm:$0xff] }
0x2d4d   : > { %v3991_v8 = vpop.eup %3990 }
0x2d4e   : > { %v2969_v60 = vadd.f32 1.0, %v3991_v8  ;;  %v3669_v8 = vpack.c.bf16 %v3089_v0, %v3088_v37 }
0x2d50   : > { %3992 = vrcp.f32 %v2969_v60  ;;  %v3091_v60 = vld [vmem:[%s5068_s14 + $0x18] sm:$0xff]  ;;  %3670 = vmatpush3.bf16.msra.mxu0 %v3669_v8 }
0x2d51   : > { %3671 = vmatprep.subr.bf16.mxu0 %v4134_v5 }
0x2d5a   : > { %v3993_v4 = vpop.eup %3992 }
0x2d5b   : > { %v2976_v27 = vmul.f32 %v3993_v4, %v2974_v1  ;;  %v3093_v1 = vld [vmem:[%s5068_s14 + $0x28] sm:$0xff] }
0x2dbe   : > { %v2979_v10 = vpop.permute.xlu1 %2978 }
0x2dbf   : > { %v2981_v11 = vmul.f32 %v3993_v4, %v2979_v10 }
0x2dc1   : > { %2983 = vrot.lane.b32.xlu0 %v2981_v11, %s5117_s7  ;;  %v3092_v11 = vld [vmem:[%s5068_s14 + $0x20] sm:$0xff] }
0x2e33   : > { %v2984_v12 = vpop.permute.xlu0 %2983 }
0x2e34   : > { %v4936_v13 = vadd.f32 %v2984_v12, %v2976_v27  ;;  %v3675_v12 = vpack.c.bf16 %v3093_v1, %v3092_v11 }
0x2e36   : > { %3994 = vtanh.f32 %v4936_v13  ;;  %v3053_v52 = vrot.slane %v4936_v13, 7  ;;  %v3094_v13 = vld [vmem:[%s5068_s14 + $0x30] sm:$0xff] }
0x2e37   : > { %3996 = vtanh.f32 %v1572_v15 }
0x2e38   : > { %3998 = vtanh.f32 %v1228_v16 }
0x2e39   : > { %4000 = vpow2.f32 %v3322_v63 }
0x2e3a   : > { %4002 = vpow2.f32 %v3312_v3 }
0x2e40   : > { %v3995_v17 = vpop.eup %3994 }
0x2e41   : > { %2989 = vrot.lane.b32.xlu1 %v3995_v17, %s4133_s16  ;;  %v3997_v19 = vpop.eup %3996 }
0x2e42   : > { %v3999_v7 = vpop.eup %3998 }
0x2e43   : > { %v4001_v28 = vpop.eup %4000 }
0x2e44   : > { %v1576_v35 = vadd.f32 1.0, %v4001_v28  ;;  %v4003_v62 = vpop.eup %4002 }
0x2e45   : > { %1585 = vrot.lane.b32.xlu1 %v3997_v19, %s4133_s16  ;;  %v1232_v25 = vadd.f32 1.0, %v4003_v62  ;;  %v3678_v19 = vpack.c.bf16 %v3095_v14, %v3094_v13 }
0x2e49   : > { %1241 = vrot.lane.b32.xlu1 %v3999_v7, %s4133_s16  ;;  %v3096_v7 = vld [vmem:[%s5068_s14 + $0x40] sm:$0xff] }
0x2eb3   : > { %v2990_v21 = vpop.permute.xlu1 %2989 }
0x2eb4   : > { %v2992_v22 = vmul.f32 %v3993_v4, %v2990_v21  ;;  %v3672_v4 = vpack.c.bf16 %v3091_v60, %v3090_v2  ;;  %v3097_v21 = vld [vmem:[%s5068_s14 + $0x48] sm:$0xff] }
0x2eb6   : > { %v2993_v26 = vpack.c.bf16 %v2992_v22, %v2992_v22  ;;  %3673 = vmatpush3.bf16.msra.mxu0 %v3672_v4  ;;  %v3681_v22 = vpack.c.bf16 %v3097_v21, %v3096_v7 }
0x2eb7   : > { %v1586_v33 = vpop.permute.xlu1 %1585  ;;  %3674 = vmatprep.subr.bf16.mxu0 %v4134_v5 }
0x2eb8   : > { %v2995_v24 = vrot.slane %v2993_v26, 3  ;;  %v3098_v26 = vld [vmem:[%s5068_s14 + $0x50] sm:$0xff] }
0x2eba   : > { %2996 = vrot.lane.b32.xlu0 %v2995_v24, %s5117_s7  ;;  %3676 = vmatpush3.bf16.msra.mxu0 %v3675_v12  ;;  %v3099_v24 = vld [vmem:[%s5068_s14 + $0x58] sm:$0xff] }
0x2ebb   : > { %v1242_v31 = vpop.permute.xlu1 %1241  ;;  %3677 = vmatprep.subr.bf16.mxu0 %v4134_v5 }
0x2ebe   : > { %3679 = vmatpush3.bf16.msra.mxu0 %v3678_v19 }
0x2ebf   : > { %3680 = vmatprep.subr.bf16.mxu0 %v4134_v5 }
0x2ec2   : > { %3682 = vmatpush3.bf16.msra.mxu0 %v3681_v22 }
0x2ec3   : > { %3683 = vmatprep.subr.bf16.mxu0 %v4134_v5 }
0x2f2c   : > { %v2997_v18 = vpop.permute.xlu0 %2996 }
0x2f2d   : > { %3638 = vmatmul.mubr.msk.bf16.vlgmr.msra.gmra.mrb[52].mxu1 %vm1083_vm7, %v2997_v18  ;;  %v3684_v18 = vpack.c.bf16 %v3099_v24, %v3098_v26 }
0x2f2f   : > { %3685 = vmatpush3.bf16.msra.mxu0 %v3684_v18 }
0x3000   : > { %v3035_v29 = vpop.f32.mrb[52].mxu1 }
0x3001   : > { %v3042_v58 = vrot.slane %v3035_v29, 1  ;;  %v3639_v32 = vpop.f32.mrb[53].mxu1 }
0x3002   : > { %v3038_v20 = vpop.f32.mrb[54].mxu1 }
0x3003   : > { %v3044_v36 = vadd.f32 %v3042_v58, %v4864_v30  ;;  %v3640_v38 = vpop.f32.mrb[55].mxu1 }
0x3004   : > { %v3100_v38 = vld [vmem:[%s5069_s15] sm:$0x1] }
0x3005   : > { %4004 = vtanh.f32 %v3044_v36  ;;  %v3360_v30 = vmul.f32 -1.442695, %v3044_v36 }
0x3006   : > { %4006 = vrcp.f32 %v1576_v35 }
0x3007   : > { %4008 = vrcp.f32 %v1232_v25 }
0x3008   : > { %4010 = vpow2.f32 %v3360_v30 }
0x300f   : > { %v4005_v55 = vpop.eup %4004 }
0x3010   : > { %3057 = vrot.lane.b32.xlu0 %v4005_v55, %s4133_s16  ;;  %v4007_v39 = vpop.eup %4006 }
0x3011   : > { %v1588_v40 = vmul.f32 %v4007_v39, %v1586_v33  ;;  %v4009_v9 = vpop.eup %4008  ;;  %v1583_v49 = vmul.f32 %v4007_v39, %v1581_v47 }
0x3012   : > { %v1244_v43 = vmul.f32 %v4009_v9, %v1242_v31  ;;  %v4011_v44 = vpop.eup %4010  ;;  %v1239_v53 = vmul.f32 %v4009_v9, %v1237_v50 }
0x3013   : > { %v3048_v45 = vadd.f32 1.0, %v4011_v44 }
0x3014   : > { %1590 = vrot.lane.b32.xlu0 %v1588_v40, %s5117_s7 }
0x3015   : > { %4012 = vrcp.f32 %v3048_v45 }
0x3018   : > { %1246 = vrot.lane.b32.xlu0 %v1244_v43, %s5117_s7 }
0x301f   : > { %v4951_v34 = vpop.eup %4012 }
0x3020   : > { %v3055_v59 = vmul.f32 %v4951_v34, %v3053_v52 }
0x3082   : > { %v3058_v46 = vpop.permute.xlu0 %3057 }
0x3083   : > { %v3060_v48 = vmul.f32 %v4951_v34, %v3058_v46 }
0x3085   : > { %3062 = vrot.lane.b32.xlu1 %v3060_v48, %s5117_s7 }
0x3086   : > { %v1591_v41 = vpop.permute.xlu0 %1590 }
0x3087   : > { %v1593_v51 = vadd.f32 %v1591_v41, %v1583_v49 }
0x3089   : > { %4014 = vtanh.f32 %v1593_v51 }
0x308a   : > { %v1247_v54 = vpop.permute.xlu0 %1246 }
0x308b   : > { %v1249_v56 = vadd.f32 %v1247_v54, %v1239_v53 }
0x308d   : > { %4016 = vtanh.f32 %v1249_v56 }
0x3093   : > { %v4015_v6 = vpop.eup %4014 }
0x3094   : > { %1596 = vrot.lane.b32.xlu1 %v4015_v6, %s4133_s16 }
0x3097   : > { %v4017_v57 = vpop.eup %4016 }
0x3098   : > { %1252 = vrot.lane.b32.xlu1 %v4017_v57, %s4133_s16 }
0x30f7   : > { %v3063_v42 = vpop.permute.xlu1 %3062 }
0x30f8   : > { %v3065_v61 = vadd.f32 %v3063_v42, %v3055_v59 }
0x30fa   : > { %4018 = vtanh.f32 %v3065_v61 }
0x3104   : > { %v4019_v10 = vpop.eup %4018 }
0x3105   : > { %3068 = vrot.lane.b32.xlu0 %v4019_v10, %s4133_s16 }
0x3106   : > { %v1597_v23 = vpop.permute.xlu1 %1596 }
0x3107   : > { %v1599_v27 = vmul.f32 %v4007_v39, %v1597_v23 }
0x3109   : > { %v3077_v15 = vrot.slane %v1599_v27, 1 }
0x310a   : > { %v1253_v16 = vpop.permute.xlu1 %1252 }
0x310b   : > { %v1255_v17 = vmul.f32 %v4009_v9, %v1253_v16  ;;  %3078 = vrot.lane.b32.xlu1 %v3077_v15, %s4133_s16 }
0x310d   : > { %3073 = vrot.lane.b32.xlu0 %v1255_v17, %s5117_s7  ;;  %s5120_s7 = smov 96  }
0x3177   : > { %v3069_v63 = vpop.permute.xlu0 %3068 }
0x3178   : > { %v3071_v3 = vmul.f32 %v4951_v34, %v3069_v63 }
0x317a   : > { %v3082_v28 = vrot.slane %v3071_v3, 6 }
0x317c   : > { %3083 = vrot.lane.b32.xlu0 %v3082_v28, %s5120_s7 }
0x317d   : > { %v3079_v58 = vpop.permute.xlu1 %3078 }
0x317f   : > { %v3074_v29 = vpop.permute.xlu0 %3073 }
0x3180   : > { %v3086_v32 = vsel %vm1083_vm7, %v3074_v29, %v3079_v58 }
0x31ee   : > { %v3084_v20 = vpop.permute.xlu0 %3083 }
0x31ef   : > { %v3087_v35 = vsel %vm1087_vm9, %v3086_v32, %v3084_v20 }
0x31f0   : > { %v3102_v36 = vrot.slane %v3087_v35, 1 }
0x31f2   : > { %3666 = vmatmul.mubr.msk.f32.vlgmr.msra.gmra.mrb[48].mxu0 %vm1090_vm10, %v3102_v36 }
0x32c5   : > { %v3171_v62 = vpop.f32.mrb[48].mxu0 }
0x32c6   : > { %v3172_v25 = vadd.f32 %v3171_v62, %v3100_v38  ;;  %v3667_v33 = vpop.f32.mrb[49].mxu0 }
0x32c8   : > { %v3362_v55 = vmul.f32 -1.442695, %v3172_v25 }
0x32ca   : > { %4020 = vpow2.f32 %v3362_v55 }
0x32d4   : > { %v4021_v39 = vpop.eup %4020 }
0x32d5   : > { %v3178_v40 = vadd.f32 1.0, %v4021_v39 }
0x32d7   : > { %4022 = vrcp.f32 %v3178_v40 }
0x32e1   : > { %v4023_v31 = vpop.eup %4022 }
0x32e2   : > { %3181 = vst [vmem:[%s456_s1] sm:$0x1] %v4023_v31 }
0x32e3   : > { %4061 = shalt.err (!%p4058_p12)
}
0x32e4   : > { %s4062_s19 = scalar_lea.hbm %s5013_s25, 16  ;;  %s4066_s12 = scalar_lea.hbm %s5121_s23, 64 }
0x32e5   : > { %p4063_p13 = scmp.ne.s32.totalorder %s5013_s25, %s4062_s19  ;;  %p4067_p4 = scmp.lt.u32.totalorder %s5013_s25, %s5121_s23 }
0x32e6   : > { %p4068_p5 = scmp.lt.u32.totalorder %s4066_s12, %s4062_s19  ;;  %p4070_p7 = scmp.lt.u32.totalorder %s4062_s19, %s5013_s25 }
0x32e7   : > { %p4064_p0 = pnand %p4063_p13, %p4265_p1 }
0x32e8   : > { %p4069_p6 = por %p4068_p5, %p4067_p4 }
0x32e9   : > { %p4065_p3 = pneg %p4064_p0 }
0x32ea   : > { %p4071_p8 = por %p4070_p7, %p4069_p6 }
0x32ec   : > { %p4072_p9 = pnand %p4071_p8, %p4065_p3 }
0x32ee   : > { %4075 = shalt.err (!%p4072_p9)
}
0x32ef   : > { %3686 = dma.vmem_to_hbm [thread:$0]  (%p4265_p1), %s5015_s17, 16, %s5013_s25, %s3183_s28  }
0x32f0 PF: > { %s5122_s2 = sld [smem:[#allocation12_spill]]  ;;  %s5123_s21 = sld [smem:[#allocation10_spill]] }
0x32f6   : > { %p3692_p10 = scmp.ge.s32.totalorder %s5122_s2, 2  ;;  %s3207_s4 = sand.u32 1, %s5123_s21  }
0x32f7   : > { %s3208_s5 = scalar_lea.sflag [#allocation7], %s3207_s4 }
0x32f8   : > { %p3689_p11 = pnand %p3692_p10, %p4269_p2 }
0x32fa   : > { %4095 = dma.done.wait (!%p3689_p11), %s3208_s5, 16  }
0x32fb   : > { %4097 = vsyncadd (!%p3689_p11), %s3208_s5, 4294967280  ;;  %s5125_s11 = sld [smem:[#allocation13_spill]]  ;;  %s5126_s6 = sld [smem:[#allocation11_spill]] }
0x32fc   : > { %s5127_s17 = sld [smem:[#allocation14_spill]]  ;;  %s5128_s1 = smov %s4104_s0 }
0x3301   : > { %p36_p12 = scmp.ge.s32.totalorder %s5125_s11, 6   ;;  %s5129_s0 = smov %s5126_s6 }
0x3303   :  { %38 = sbr.rel (!%p36_p12) target bundleno = 37 (0x25), region = 113 }
0x330a   :  { %3212 = vsyncpa [#allocation7], 1 }
0x330b   :  { %3214 = vsyncpa [#allocation7 + $0x1], 1 }

</bundles_post_ra>
